<compile_context>
chip_gen: v6e
topology: v6e:2x2x1
jax: 0.10.0
libtpu: 0.0.40
codegen_flags: <defaults>
</compile_context>

<pallas_src>
import numpy as np
import jax
import jax.numpy as jnp
from jax import lax
from jax.experimental import pallas as pl
from jax.experimental.pallas import tpu as pltpu


# ----------------------------------------------------------------------------
# in-kernel numerics helpers
# ----------------------------------------------------------------------------
def _matmul(a, b):
    return jnp.dot(a, b, preferred_element_type=jnp.float32)


def _matmul_t(a, b):
    # a @ b.T without materialising the transpose
    return lax.dot_general(a, b, (((1,), (1,)), ((), ())),
                           preferred_element_type=jnp.float32)


def _softmax_exact(x):
    m = jnp.max(x, axis=-1, keepdims=True)
    e = jnp.exp(x - m)
    return e / jnp.sum(e, axis=-1, keepdims=True)


def _log_softmax(x):
    m = jnp.max(x, axis=-1, keepdims=True)
    s = x - m
    return s - jnp.log(jnp.sum(jnp.exp(s), axis=-1, keepdims=True))


def _gru_cell(gi, gh, h, Hh):
    # PyTorch gate order r, z, n ;  h' = (1-z)*n + z*h
    r = jax.nn.sigmoid(gi[:, 0:Hh] + gh[:, 0:Hh])
    z = jax.nn.sigmoid(gi[:, Hh:2 * Hh] + gh[:, Hh:2 * Hh])
    n = jnp.tanh(gi[:, 2 * Hh:3 * Hh] + r * gh[:, 2 * Hh:3 * Hh])
    return (1.0 - z) * n + z * h


# ----------------------------------------------------------------------------
# fully fused forward kernel (encoder + decoder + attn2cov)
# ----------------------------------------------------------------------------
def make_forward_kernel(*, V, E, H, U, Tw, Td, W_total, NU, u_len_i, w_len_all):
    Hh = H // 2
    W_pad = Tw * U
    # GRU weight-slab row offsets (all multiples of 8 -> sublane aligned)
    r_wih_w = 0
    r_whh_w = r_wih_w + E
    r_wih_u = r_whh_w + Hh
    r_whh_u = r_wih_u + H
    r_wih_d = r_whh_u + Hh
    r_whh_d = r_wih_d + E
    n_rows = r_whh_d + H

    def kernel(ids_enc_ref, ids_dec_ref, emb_ref, gruw_ref, attnw_ref,
               bias_ref, seg_ref, p_ref,
               dec_ref, suw_ref, su_ref, cov_ref, uout_ref,
               wstate_ref, sdec_ref):
        f32 = jnp.float32

        # ----------------- embeddings via one-hot MXU matmul --------------
        emb = emb_ref[...]                                          # (V, 2E)
        iota_e = lax.broadcasted_iota(jnp.int32, (W_pad, V), 1)
        onehot_e = (ids_enc_ref[...] == iota_e).astype(f32)         # (W_pad, V)
        x_w = _matmul(onehot_e, emb[:, 0:E])                        # (W_pad, E)

        iota_d = lax.broadcasted_iota(jnp.int32, (Td, V), 1)
        onehot_d = (ids_dec_ref[...] == iota_d).astype(f32)         # (Td, V)
        yt_all = _matmul(onehot_d, emb[:, E:2 * E])                 # (Td, E)

        # ----------------- word-level bidirectional GRU --------------------
        wih_w = gruw_ref[r_wih_w:r_wih_w + E, :]                    # (E, 6Hh)
        whh_w = gruw_ref[r_whh_w:r_whh_w + Hh, :]                   # (Hh, 6Hh)
        gi_w = _matmul(x_w, wih_w) + bias_ref[0:1, :]               # (W_pad, 6Hh)
        bhh_w = bias_ref[1:2, :]

        h2 = jnp.zeros((2 * U, Hh), f32)        # rows 0:U fwd, U:2U bwd
        for t in range(Tw):                     # fully unrolled (static)
            tb = Tw - 1 - t
            gh = _matmul(h2, whh_w) + bhh_w                         # (2U, 6Hh)
            gi_f = gi_w[t * U:(t + 1) * U, 0:3 * Hh]
            gi_b = gi_w[tb * U:(tb + 1) * U, 3 * Hh:6 * Hh]
            h_f = _gru_cell(gi_f, gh[0:U, 0:3 * Hh], h2[0:U, :], Hh)
            h_b = _gru_cell(gi_b, gh[U:2 * U, 3 * Hh:6 * Hh], h2[U:2 * U, :], Hh)
            h2 = jnp.concatenate([h_f, h_b], axis=0)
            wstate_ref[t * U:(t + 1) * U, 0:Hh] = h_f               # time-major rows
            wstate_ref[tb * U:(tb + 1) * U, Hh:H] = h_b

        # ----------------- last-valid-word select + utterance biGRU --------
        utt_rows = []
        for u in range(U):
            p = (w_len_all[u] - 1) * U + u          # static row index
            utt_rows.append(wstate_ref[p:p + 1, :])
        utt_in = jnp.concatenate(utt_rows, axis=0)                  # (U, H)

        wih_u = gruw_ref[r_wih_u:r_wih_u + H, :]
        whh_u = gruw_ref[r_whh_u:r_whh_u + Hh, :]
        gi_u = _matmul(utt_in, wih_u) + bias_ref[2:3, :]            # (U, 6Hh)
        bhh_u = bias_ref[3:4, :]

        h2u = jnp.zeros((2, Hh), f32)
        for t in range(U):
            tb = U - 1 - t
            gh = _matmul(h2u, whh_u) + bhh_u                        # (2, 6Hh)
            h_f = _gru_cell(gi_u[t:t + 1, 0:3 * Hh], gh[0:1, 0:3 * Hh],
                            h2u[0:1, :], Hh)
            h_b = _gru_cell(gi_u[tb:tb + 1, 3 * Hh:6 * Hh], gh[1:2, 3 * Hh:6 * Hh],
                            h2u[1:2, :], Hh)
            h2u = jnp.concatenate([h_f, h_b], axis=0)
            uout_ref[t:t + 1, 0:Hh] = h_f
            uout_ref[tb:tb + 1, Hh:H] = h_b

        # ----------------- decoder GRU state chain (serial, minimal) -------
        wih_d = gruw_ref[r_wih_d:r_wih_d + E, :]
        whh_d = gruw_ref[r_whh_d:r_whh_d + H, :]
        gi_d = _matmul(yt_all, wih_d) + bias_ref[4:5, :]            # (Td, 3H)
        bhh_d = bias_ref[5:6, :]

        h = uout_ref[u_len_i - 1:u_len_i, :]                        # (1, H)
        for t in range(Td):
            gh = _matmul(h, whh_d) + bhh_d
            h = _gru_cell(gi_d[t:t + 1, :], gh, h, H)
            sdec_ref[t:t + 1, :] = h
        S = sdec_ref[...]                                           # (Td, H)

        # ----------------- batched, time-invariant attention work ----------
        u_output = uout_ref[...]                                    # (U, H)
        w_states = wstate_ref[...]                                  # (W_pad, H)
        wuT = attnw_ref[:, 0:H]
        wwT = attnw_ref[:, H:2 * H]
        wout_ctx = attnw_ref[:, 2 * H:2 * H + V]
        wout_s = attnw_ref[:, 2 * H + V:2 * H + 2 * V]

        bu = bias_ref[6:7, 0:H]
        bw = bias_ref[7:8, 0:H]
        wd_row = bias_ref[8:9, 0:V]
        wy_row = bias_ref[9:10, 0:E]
        ws_row = bias_ref[10:11, 0:H]
        bs = bias_ref[11:12, 0:1]
        bo = bias_ref[12:13, 0:V]
        umask = bias_ref[13:14, 0:U]

        u_proj = _matmul(u_output, wuT) + bu                        # (U, H)
        w_proj = _matmul(w_states, wwT) + bw                        # (W_pad, H)

        su_raw = _matmul_t(S, u_proj)                               # (Td, U)
        su_raw = jnp.where(umask > 0.5, su_raw, -jnp.inf)
        su0_all = _softmax_exact(su_raw)                            # (Td, U)

        sw_raw = _matmul_t(S, w_proj)                               # (Td, W_pad)
        Ew = jnp.exp(sw_raw - jnp.max(sw_raw, axis=-1, keepdims=True))
        seg = seg_ref[...]                                          # (NU, W_pad)
        denom = _matmul_t(Ew, seg)                                  # (Td, NU)

        gys_all = (jnp.sum(yt_all * wy_row, axis=-1, keepdims=True)
                   + jnp.sum(S * ws_row, axis=-1, keepdims=True) + bs)   # (Td, 1)
        s_logits_all = _matmul(S, wout_s) + bo                      # (Td, V)
        P = p_ref[...]                                              # (W_pad, W_total)

        # ----------------- serial attention / output feedback loop ---------
        eu_prev = jnp.zeros((1, U), f32)
        gd_prev = jnp.zeros((1, 1), f32)
        cov_run = jnp.zeros((1, W_total), f32)
        for t in range(Td):                    # fully unrolled (static Td)
            gamma = jax.nn.sigmoid(gd_prev + gys_all[t:t + 1, :])   # (1, 1)
            su_t = (1.0 - gamma) * su0_all[t:t + 1, :] + gamma * eu_prev
            su_t = su_t / jnp.sum(su_t, axis=-1, keepdims=True)     # exact renorm
            eu_prev = su_t

            # per-utterance segment softmax folded into Ew/denom
            coef = su_t[:, 0:NU] / denom[t:t + 1, :]                # (1, NU)
            suw_pad = Ew[t:t + 1, :] * _matmul(coef, seg)           # (1, W_pad)

            ctx = _matmul(suw_pad, w_states)                        # (1, H)
            logits = _matmul(ctx, wout_ctx) + s_logits_all[t:t + 1, :]
            logp = _log_softmax(logits)                             # (1, V)
            gd_prev = jnp.sum(logp * wd_row, axis=-1, keepdims=True)

            suw_c = _matmul(suw_pad, P)            # padded -> compacted word axis
            dec_ref[t:t + 1, :] = logp
            su_ref[t:t + 1, :] = su_t
            suw_ref[t:t + 1, :] = suw_c
            cov_ref[t:t + 1, :] = cov_run          # fused attn2cov (exclusive sum)
            cov_run = cov_run + suw_c

    return kernel, n_rows


# ----------------------------------------------------------------------------
# driver
# ----------------------------------------------------------------------------
if __name__ == "__main__":
    # model hyper-parameters (small)
    V = 32          # vocab_size
    E = 16          # embedding_dim
    H = 32          # rnn_hidden_size == dec_hidden == mem_hidden
    Hh = H // 2     # per-direction hidden of the bi-GRUs
    B = 1           # reference decoder only broadcasts correctly for B == 1
    U = 3           # padded number of utterances
    Tw = 8          # padded words per utterance
    Td = 6          # target (decoder) length
    W_pad = Tw * U
    G = 3 * H       # fused gate width (== 6 * Hh)

    u_len = np.array([2], dtype=np.int32)
    w_len = np.array([[5, 3, 4]], dtype=np.int32)
    u_len_i = int(u_len[0])
    w_len_all = [int(x) for x in w_len[0]]
    NU = u_len_i
    off = [0]
    for j in range(u_len_i):
        off.append(off[-1] + w_len_all[j])
    W_total = off[-1]

    # ---- static ragged metadata on the padded (time-major) word axis ------
    seg_np = np.zeros((NU, W_pad), np.float32)     # segment mask per utterance
    P_np = np.zeros((W_pad, W_total), np.float32)  # padded -> compacted selector
    for u in range(NU):
        for t in range(w_len_all[u]):
            p = t * U + u
            seg_np[u, p] = 1.0
            P_np[p, off[u] + t] = 1.0
    umask_np = np.zeros((1, U), np.float32)
    umask_np[0, :u_len_i] = 1.0

    # ---- parameters (xavier-ish weights, zero biases as in param_init) ----
    key = jax.random.PRNGKey(0)
    keys = jax.random.split(key, 32)
    _ki = iter(keys)

    def nrm(shape, scale=0.1):
        return np.asarray(scale * jax.random.normal(next(_ki), shape,
                                                    dtype=jnp.float32))

    emb_enc = nrm((V, E))
    emb_dec = nrm((V, E))
    # word-level biGRU (input E, per-direction hidden Hh)
    wih_w = np.concatenate([nrm((E, 3 * Hh)), nrm((E, 3 * Hh))], axis=1)
    whh_w = np.concatenate([nrm((Hh, 3 * Hh)), nrm((Hh, 3 * Hh))], axis=1)
    # utterance-level biGRU (input H, per-direction hidden Hh)
    wih_u = np.concatenate([nrm((H, 3 * Hh)), nrm((H, 3 * Hh))], axis=1)
    whh_u = np.concatenate([nrm((Hh, 3 * Hh)), nrm((Hh, 3 * Hh))], axis=1)
    # decoder GRU (input E, hidden H)
    wih_d = nrm((E, 3 * H))
    whh_d = nrm((H, 3 * H))
    # attention / memory-gate / output weights (stored pre-transposed)
    wuT = nrm((H, H))
    wwT = nrm((H, H))
    wd = nrm((1, V))
    wy = nrm((1, E))
    ws = nrm((1, H))
    w_out = nrm((2 * H, V))
    wout_ctx, wout_s = w_out[0:H, :], w_out[H:2 * H, :]

    # ---- pack operands into slabs (done once, host-side) ------------------
    emb_slab = jnp.asarray(np.concatenate([emb_enc, emb_dec], axis=1))      # (V, 2E)
    gruw_slab = jnp.asarray(np.concatenate(
        [wih_w, whh_w, wih_u, whh_u, wih_d, whh_d], axis=0))                # (128, G)
    attnw_slab = jnp.asarray(np.concatenate(
        [wuT, wwT, wout_ctx, wout_s], axis=1))                              # (H, 2H+2V)

    def pad_row(v, width=G):
        v = np.asarray(v, np.float32).reshape(1, -1)
        out = np.zeros((1, width), np.float32)
        out[0, :v.shape[1]] = v
        return out

    zeros = np.zeros
    bias_rows = [
        pad_row(zeros(6 * Hh)),                # 0: b_ih word  [fwd|bwd]
        pad_row(zeros(6 * Hh)),                # 1: b_hh word  [fwd|bwd]
        pad_row(zeros(6 * Hh)),                # 2: b_ih utt   [fwd|bwd]
        pad_row(zeros(6 * Hh)),                # 3: b_hh utt   [fwd|bwd]
        pad_row(zeros(3 * H)),                 # 4: b_ih dec
        pad_row(zeros(3 * H)),                 # 5: b_hh dec
        pad_row(zeros(H)),                     # 6: bu
        pad_row(zeros(H)),                     # 7: bw
        pad_row(wd),                           # 8: mem_utt_d weight
        pad_row(wy),                           # 9: mem_utt_y weight
        pad_row(ws),                           # 10: mem_utt_s weight
        pad_row(zeros(1)),                     # 11: bs
        pad_row(zeros(V)),                     # 12: bo
        pad_row(umask_np),                     # 13: utterance mask
    ]
    bias_slab = jnp.asarray(np.concatenate(bias_rows, axis=0))              # (14, G)
    seg = jnp.asarray(seg_np)
    P = jnp.asarray(P_np)

    # ---- build the single fused kernel ------------------------------------
    kernel, n_gruw_rows = make_forward_kernel(
        V=V, E=E, H=H, U=U, Tw=Tw, Td=Td, W_total=W_total, NU=NU,
        u_len_i=u_len_i, w_len_all=w_len_all)
    assert gruw_slab.shape == (n_gruw_rows, G)

    vmem = pl.BlockSpec(memory_space=pltpu.MemorySpace.VMEM)
    fused_forward = pl.pallas_call(
        kernel,
        out_shape=(jax.ShapeDtypeStruct((Td, V), jnp.float32),        # log-probs
                   jax.ShapeDtypeStruct((Td, W_total), jnp.float32),  # scores_uw
                   jax.ShapeDtypeStruct((Td, U), jnp.float32),        # scores_u
                   jax.ShapeDtypeStruct((Td, W_total), jnp.float32),  # coverage
                   jax.ShapeDtypeStruct((U, H), jnp.float32)),        # u_output
        in_specs=[vmem] * 8,
        out_specs=(vmem, vmem, vmem, vmem, vmem),
        scratch_shapes=[pltpu.VMEM((W_pad, H), jnp.float32),   # word states
                        pltpu.VMEM((Td, H), jnp.float32)],     # decoder states
    )

    # ---- inputs ------------------------------------------------------------
    kin, ktgt = jax.random.split(next(_ki))
    inp = jax.random.randint(kin, (B, U, Tw), 1, V, dtype=jnp.int32)
    target = jax.random.randint(ktgt, (B, Td), 1, V, dtype=jnp.int32)

    @jax.jit
    def forward(inp, target):
        ids_enc = jnp.transpose(inp[0]).reshape(W_pad, 1)   # time-major word ids
        ids_dec = target[0].reshape(Td, 1)
        dec, suw, su, cov, uout = fused_forward(
            ids_enc, ids_dec, emb_slab, gruw_slab, attnw_slab, bias_slab, seg, P)
        return dec[None], uout[None], suw[None], cov[None], su[None]

    outs = jax.block_until_ready(forward(inp, target))
    dec_output, u_output, attn_scores, cov_scores, u_attn_scores = outs

    # sanity checks (properties guaranteed by the reference semantics)
    assert all(bool(jnp.all(jnp.isfinite(o))) for o in outs)
    assert dec_output.shape == (B, Td, V)
    assert u_output.shape == (B, U, H)
    assert attn_scores.shape == (B, Td, W_total)
    assert cov_scores.shape == (B, Td, W_total)
    assert u_attn_scores.shape == (B, Td, U)
    assert bool(jnp.allclose(jnp.sum(jnp.exp(dec_output), axis=-1), 1.0, atol=1e-3))
    assert bool(jnp.allclose(jnp.sum(attn_scores, axis=-1), 1.0, atol=1e-3))
    assert bool(jnp.allclose(jnp.sum(u_attn_scores, axis=-1), 1.0, atol=1e-3))
    # coverage is the exclusive prefix sum of the word-attention scores
    assert bool(jnp.allclose(cov_scores[:, 1:],
                             jnp.cumsum(attn_scores, axis=1)[:, :-1], atol=1e-5))
    # padded utterances must receive zero attention
    assert bool(jnp.allclose(u_attn_scores[..., u_len_i:], 0.0, atol=1e-6))

    print("KERNEL_OK")
</pallas_src>

<mosaic_0001>
module attributes {stable_mosaic.version = 11 : i64} {
  func.func @kernel(%arg0: memref<24x1xi32, #tpu.memory_space<vmem>>, %arg1: memref<6x1xi32, #tpu.memory_space<vmem>>, %arg2: memref<32x32xf32, #tpu.memory_space<vmem>>, %arg3: memref<128x96xf32, #tpu.memory_space<vmem>>, %arg4: memref<32x128xf32, #tpu.memory_space<vmem>>, %arg5: memref<14x96xf32, #tpu.memory_space<vmem>>, %arg6: memref<2x24xf32, #tpu.memory_space<vmem>>, %arg7: memref<24x8xf32, #tpu.memory_space<vmem>>, %arg8: memref<6x32xf32, #tpu.memory_space<vmem>>, %arg9: memref<6x8xf32, #tpu.memory_space<vmem>>, %arg10: memref<6x3xf32, #tpu.memory_space<vmem>>, %arg11: memref<6x8xf32, #tpu.memory_space<vmem>>, %arg12: memref<3x32xf32, #tpu.memory_space<vmem>>, %arg13: memref<24x32xf32, #tpu.memory_space<vmem>>, %arg14: memref<6x32xf32, #tpu.memory_space<vmem>>) attributes {dimension_semantics = [], scalar_prefetch = 0 : i64, scratch_operands = 2 : i64, tpu.core_type = #tpu.core_type<tc>} {
    %c0 = arith.constant 0 : index
    %c0_0 = arith.constant 0 : index
    %0 = vector.load %arg2[%c0, %c0_0] : memref<32x32xf32, #tpu.memory_space<vmem>>, vector<32x32xf32>
    %1 = tpu.iota {dimensions = array<i32: 1>} : vector<24x32xi32>
    %c0_1 = arith.constant 0 : index
    %c0_2 = arith.constant 0 : index
    %2 = vector.load %arg0[%c0_1, %c0_2] : memref<24x1xi32, #tpu.memory_space<vmem>>, vector<24x1xi32>
    %3 = vector.broadcast %2 : vector<24x1xi32> to vector<24x32xi32>
    %4 = arith.cmpi eq, %3, %1 : vector<24x32xi32>
    %5 = arith.extui %4 : vector<24x32xi1> to vector<24x32xi32>
    %6 = arith.sitofp %5 : vector<24x32xi32> to vector<24x32xf32>
    %7 = vector.extract_strided_slice %0 {offsets = [0, 0], sizes = [32, 16], strides = [1, 1]} : vector<32x32xf32> to vector<32x16xf32>
    %cst = arith.constant dense<0.000000e+00> : vector<24x16xf32>
    %8 = tpu.matmul %6, %7, %cst {dimension_numbers = #tpu.dot_dimension_numbers<[1], [0], [0], [1], [0, 0, 1, 1], [], []>} : vector<24x32xf32>, vector<32x16xf32>, vector<24x16xf32> -> vector<24x16xf32>
    %9 = tpu.iota {dimensions = array<i32: 1>} : vector<6x32xi32>
    %c0_3 = arith.constant 0 : index
    %c0_4 = arith.constant 0 : index
    %10 = vector.load %arg1[%c0_3, %c0_4] : memref<6x1xi32, #tpu.memory_space<vmem>>, vector<6x1xi32>
    %11 = vector.broadcast %10 : vector<6x1xi32> to vector<6x32xi32>
    %12 = arith.cmpi eq, %11, %9 : vector<6x32xi32>
    %13 = arith.extui %12 : vector<6x32xi1> to vector<6x32xi32>
    %14 = arith.sitofp %13 : vector<6x32xi32> to vector<6x32xf32>
    %15 = vector.extract_strided_slice %0 {offsets = [0, 16], sizes = [32, 16], strides = [1, 1]} : vector<32x32xf32> to vector<32x16xf32>
    %cst_5 = arith.constant dense<0.000000e+00> : vector<6x16xf32>
    %16 = tpu.matmul %14, %15, %cst_5 {dimension_numbers = #tpu.dot_dimension_numbers<[1], [0], [0], [1], [0, 0, 1, 1], [], []>} : vector<6x32xf32>, vector<32x16xf32>, vector<6x16xf32> -> vector<6x16xf32>
    %c0_6 = arith.constant 0 : index
    %c0_7 = arith.constant 0 : index
    %17 = vector.load %arg3[%c0_6, %c0_7] : memref<128x96xf32, #tpu.memory_space<vmem>>, vector<16x96xf32>
    %c16 = arith.constant 16 : index
    %c0_8 = arith.constant 0 : index
    %18 = vector.load %arg3[%c16, %c0_8] : memref<128x96xf32, #tpu.memory_space<vmem>>, vector<16x96xf32>
    %cst_9 = arith.constant dense<0.000000e+00> : vector<24x96xf32>
    %19 = tpu.matmul %8, %17, %cst_9 {dimension_numbers = #tpu.dot_dimension_numbers<[1], [0], [0], [1], [0, 0, 1, 1], [], []>} : vector<24x16xf32>, vector<16x96xf32>, vector<24x96xf32> -> vector<24x96xf32>
    %c0_10 = arith.constant 0 : index
    %c0_11 = arith.constant 0 : index
    %20 = vector.load %arg5[%c0_10, %c0_11] : memref<14x96xf32, #tpu.memory_space<vmem>>, vector<1x96xf32>
    %21 = vector.broadcast %20 : vector<1x96xf32> to vector<24x96xf32>
    %22 = arith.addf %19, %21 : vector<24x96xf32>
    %c1 = arith.constant 1 : index
    %c0_12 = arith.constant 0 : index
    %23 = vector.load %arg5[%c1, %c0_12] : memref<14x96xf32, #tpu.memory_space<vmem>>, vector<1x96xf32>
    %cst_13 = arith.constant 0.000000e+00 : f32
    %24 = vector.broadcast %cst_13 : f32 to vector<6x16xf32>
    %cst_14 = arith.constant dense<0.000000e+00> : vector<6x96xf32>
    %25 = tpu.matmul %24, %18, %cst_14 {dimension_numbers = #tpu.dot_dimension_numbers<[1], [0], [0], [1], [0, 0, 1, 1], [], []>} : vector<6x16xf32>, vector<16x96xf32>, vector<6x96xf32> -> vector<6x96xf32>
    %26 = vector.broadcast %23 : vector<1x96xf32> to vector<6x96xf32>
    %27 = arith.addf %25, %26 : vector<6x96xf32>
    %28 = vector.extract_strided_slice %22 {offsets = [0, 0], sizes = [3, 48], strides = [1, 1]} : vector<24x96xf32> to vector<3x48xf32>
    %29 = vector.extract_strided_slice %22 {offsets = [21, 48], sizes = [3, 48], strides = [1, 1]} : vector<24x96xf32> to vector<3x48xf32>
    %30 = vector.extract_strided_slice %27 {offsets = [0, 0], sizes = [3, 48], strides = [1, 1]} : vector<6x96xf32> to vector<3x48xf32>
    %31 = vector.extract_strided_slice %24 {offsets = [0, 0], sizes = [3, 16], strides = [1, 1]} : vector<6x16xf32> to vector<3x16xf32>
    %32 = vector.extract_strided_slice %28 {offsets = [0, 0], sizes = [3, 16], strides = [1, 1]} : vector<3x48xf32> to vector<3x16xf32>
    %33 = vector.extract_strided_slice %30 {offsets = [0, 0], sizes = [3, 16], strides = [1, 1]} : vector<3x48xf32> to vector<3x16xf32>
    %34 = arith.addf %32, %33 : vector<3x16xf32>
    %35 = arith.negf %34 : vector<3x16xf32>
    %36 = math.exp %35 : vector<3x16xf32>
    %cst_15 = arith.constant 1.000000e+00 : f32
    %37 = vector.broadcast %cst_15 : f32 to vector<3x16xf32>
    %38 = arith.addf %37, %36 : vector<3x16xf32>
    %39 = arith.divf %37, %38 : vector<3x16xf32>
    %40 = vector.extract_strided_slice %28 {offsets = [0, 16], sizes = [3, 16], strides = [1, 1]} : vector<3x48xf32> to vector<3x16xf32>
    %41 = vector.extract_strided_slice %30 {offsets = [0, 16], sizes = [3, 16], strides = [1, 1]} : vector<3x48xf32> to vector<3x16xf32>
    %42 = arith.addf %40, %41 : vector<3x16xf32>
    %43 = arith.negf %42 : vector<3x16xf32>
    %44 = math.exp %43 : vector<3x16xf32>
    %cst_16 = arith.constant 1.000000e+00 : f32
    %45 = vector.broadcast %cst_16 : f32 to vector<3x16xf32>
    %46 = arith.addf %45, %44 : vector<3x16xf32>
    %47 = arith.divf %45, %46 : vector<3x16xf32>
    %48 = vector.extract_strided_slice %28 {offsets = [0, 32], sizes = [3, 16], strides = [1, 1]} : vector<3x48xf32> to vector<3x16xf32>
    %49 = vector.extract_strided_slice %30 {offsets = [0, 32], sizes = [3, 16], strides = [1, 1]} : vector<3x48xf32> to vector<3x16xf32>
    %50 = arith.mulf %39, %49 : vector<3x16xf32>
    %51 = arith.addf %48, %50 : vector<3x16xf32>
    %52 = math.tanh %51 : vector<3x16xf32>
    %cst_17 = arith.constant 1.000000e+00 : f32
    %53 = vector.broadcast %cst_17 : f32 to vector<3x16xf32>
    %54 = arith.subf %53, %47 : vector<3x16xf32>
    %55 = arith.mulf %54, %52 : vector<3x16xf32>
    %56 = arith.mulf %47, %31 : vector<3x16xf32>
    %57 = arith.addf %55, %56 : vector<3x16xf32>
    %58 = vector.extract_strided_slice %27 {offsets = [3, 48], sizes = [3, 48], strides = [1, 1]} : vector<6x96xf32> to vector<3x48xf32>
    %59 = vector.extract_strided_slice %24 {offsets = [3, 0], sizes = [3, 16], strides = [1, 1]} : vector<6x16xf32> to vector<3x16xf32>
    %60 = vector.extract_strided_slice %29 {offsets = [0, 0], sizes = [3, 16], strides = [1, 1]} : vector<3x48xf32> to vector<3x16xf32>
    %61 = vector.extract_strided_slice %58 {offsets = [0, 0], sizes = [3, 16], strides = [1, 1]} : vector<3x48xf32> to vector<3x16xf32>
    %62 = arith.addf %60, %61 : vector<3x16xf32>
    %63 = arith.negf %62 : vector<3x16xf32>
    %64 = math.exp %63 : vector<3x16xf32>
    %cst_18 = arith.constant 1.000000e+00 : f32
    %65 = vector.broadcast %cst_18 : f32 to vector<3x16xf32>
    %66 = arith.addf %65, %64 : vector<3x16xf32>
    %67 = arith.divf %65, %66 : vector<3x16xf32>
    %68 = vector.extract_strided_slice %29 {offsets = [0, 16], sizes = [3, 16], strides = [1, 1]} : vector<3x48xf32> to vector<3x16xf32>
    %69 = vector.extract_strided_slice %58 {offsets = [0, 16], sizes = [3, 16], strides = [1, 1]} : vector<3x48xf32> to vector<3x16xf32>
    %70 = arith.addf %68, %69 : vector<3x16xf32>
    %71 = arith.negf %70 : vector<3x16xf32>
    %72 = math.exp %71 : vector<3x16xf32>
    %cst_19 = arith.constant 1.000000e+00 : f32
    %73 = vector.broadcast %cst_19 : f32 to vector<3x16xf32>
    %74 = arith.addf %73, %72 : vector<3x16xf32>
    %75 = arith.divf %73, %74 : vector<3x16xf32>
    %76 = vector.extract_strided_slice %29 {offsets = [0, 32], sizes = [3, 16], strides = [1, 1]} : vector<3x48xf32> to vector<3x16xf32>
    %77 = vector.extract_strided_slice %58 {offsets = [0, 32], sizes = [3, 16], strides = [1, 1]} : vector<3x48xf32> to vector<3x16xf32>
    %78 = arith.mulf %67, %77 : vector<3x16xf32>
    %79 = arith.addf %76, %78 : vector<3x16xf32>
    %80 = math.tanh %79 : vector<3x16xf32>
    %cst_20 = arith.constant 1.000000e+00 : f32
    %81 = vector.broadcast %cst_20 : f32 to vector<3x16xf32>
    %82 = arith.subf %81, %75 : vector<3x16xf32>
    %83 = arith.mulf %82, %80 : vector<3x16xf32>
    %84 = arith.mulf %75, %59 : vector<3x16xf32>
    %85 = arith.addf %83, %84 : vector<3x16xf32>
    %86 = tpu.concatenate %57, %85 in 0 : vector<3x16xf32>, vector<3x16xf32> -> vector<6x16xf32>
    %c0_21 = arith.constant 0 : index
    %c0_22 = arith.constant 0 : index
    %87 = vector.load %arg13[%c0_21, %c0_22] : memref<24x32xf32, #tpu.memory_space<vmem>>, vector<3x16xf32>
    tpu.vector_store %arg13[%c0_21, %c0_22], %57 {strides = array<i32>} : memref<24x32xf32, #tpu.memory_space<vmem>>, vector<3x16xf32>,
    %c21 = arith.constant 21 : index
    %c16_23 = arith.constant 16 : index
    %88 = vector.load %arg13[%c21, %c16_23] : memref<24x32xf32, #tpu.memory_space<vmem>>, vector<3x16xf32>
    tpu.vector_store %arg13[%c21, %c16_23], %85 {strides = array<i32>} : memref<24x32xf32, #tpu.memory_space<vmem>>, vector<3x16xf32>,
    %cst_24 = arith.constant dense<0.000000e+00> : vector<6x96xf32>
    %89 = tpu.matmul %86, %18, %cst_24 {dimension_numbers = #tpu.dot_dimension_numbers<[1], [0], [0], [1], [0, 0, 1, 1], [], []>} : vector<6x16xf32>, vector<16x96xf32>, vector<6x96xf32> -> vector<6x96xf32>
    %90 = vector.broadcast %23 : vector<1x96xf32> to vector<6x96xf32>
    %91 = arith.addf %89, %90 : vector<6x96xf32>
    %92 = vector.extract_strided_slice %22 {offsets = [3, 0], sizes = [3, 48], strides = [1, 1]} : vector<24x96xf32> to vector<3x48xf32>
    %93 = vector.extract_strided_slice %22 {offsets = [18, 48], sizes = [3, 48], strides = [1, 1]} : vector<24x96xf32> to vector<3x48xf32>
    %94 = vector.extract_strided_slice %91 {offsets = [0, 0], sizes = [3, 48], strides = [1, 1]} : vector<6x96xf32> to vector<3x48xf32>
    %95 = vector.extract_strided_slice %86 {offsets = [0, 0], sizes = [3, 16], strides = [1, 1]} : vector<6x16xf32> to vector<3x16xf32>
    %96 = vector.extract_strided_slice %92 {offsets = [0, 0], sizes = [3, 16], strides = [1, 1]} : vector<3x48xf32> to vector<3x16xf32>
    %97 = vector.extract_strided_slice %94 {offsets = [0, 0], sizes = [3, 16], strides = [1, 1]} : vector<3x48xf32> to vector<3x16xf32>
    %98 = arith.addf %96, %97 : vector<3x16xf32>
    %99 = arith.negf %98 : vector<3x16xf32>
    %100 = math.exp %99 : vector<3x16xf32>
    %cst_25 = arith.constant 1.000000e+00 : f32
    %101 = vector.broadcast %cst_25 : f32 to vector<3x16xf32>
    %102 = arith.addf %101, %100 : vector<3x16xf32>
    %103 = arith.divf %101, %102 : vector<3x16xf32>
    %104 = vector.extract_strided_slice %92 {offsets = [0, 16], sizes = [3, 16], strides = [1, 1]} : vector<3x48xf32> to vector<3x16xf32>
    %105 = vector.extract_strided_slice %94 {offsets = [0, 16], sizes = [3, 16], strides = [1, 1]} : vector<3x48xf32> to vector<3x16xf32>
    %106 = arith.addf %104, %105 : vector<3x16xf32>
    %107 = arith.negf %106 : vector<3x16xf32>
    %108 = math.exp %107 : vector<3x16xf32>
    %cst_26 = arith.constant 1.000000e+00 : f32
    %109 = vector.broadcast %cst_26 : f32 to vector<3x16xf32>
    %110 = arith.addf %109, %108 : vector<3x16xf32>
    %111 = arith.divf %109, %110 : vector<3x16xf32>
    %112 = vector.extract_strided_slice %92 {offsets = [0, 32], sizes = [3, 16], strides = [1, 1]} : vector<3x48xf32> to vector<3x16xf32>
    %113 = vector.extract_strided_slice %94 {offsets = [0, 32], sizes = [3, 16], strides = [1, 1]} : vector<3x48xf32> to vector<3x16xf32>
    %114 = arith.mulf %103, %113 : vector<3x16xf32>
    %115 = arith.addf %112, %114 : vector<3x16xf32>
    %116 = math.tanh %115 : vector<3x16xf32>
    %cst_27 = arith.constant 1.000000e+00 : f32
    %117 = vector.broadcast %cst_27 : f32 to vector<3x16xf32>
    %118 = arith.subf %117, %111 : vector<3x16xf32>
    %119 = arith.mulf %118, %116 : vector<3x16xf32>
    %120 = arith.mulf %111, %95 : vector<3x16xf32>
    %121 = arith.addf %119, %120 : vector<3x16xf32>
    %122 = vector.extract_strided_slice %91 {offsets = [3, 48], sizes = [3, 48], strides = [1, 1]} : vector<6x96xf32> to vector<3x48xf32>
    %123 = vector.extract_strided_slice %86 {offsets = [3, 0], sizes = [3, 16], strides = [1, 1]} : vector<6x16xf32> to vector<3x16xf32>
    %124 = vector.extract_strided_slice %93 {offsets = [0, 0], sizes = [3, 16], strides = [1, 1]} : vector<3x48xf32> to vector<3x16xf32>
    %125 = vector.extract_strided_slice %122 {offsets = [0, 0], sizes = [3, 16], strides = [1, 1]} : vector<3x48xf32> to vector<3x16xf32>
    %126 = arith.addf %124, %125 : vector<3x16xf32>
    %127 = arith.negf %126 : vector<3x16xf32>
    %128 = math.exp %127 : vector<3x16xf32>
    %cst_28 = arith.constant 1.000000e+00 : f32
    %129 = vector.broadcast %cst_28 : f32 to vector<3x16xf32>
    %130 = arith.addf %129, %128 : vector<3x16xf32>
    %131 = arith.divf %129, %130 : vector<3x16xf32>
    %132 = vector.extract_strided_slice %93 {offsets = [0, 16], sizes = [3, 16], strides = [1, 1]} : vector<3x48xf32> to vector<3x16xf32>
    %133 = vector.extract_strided_slice %122 {offsets = [0, 16], sizes = [3, 16], strides = [1, 1]} : vector<3x48xf32> to vector<3x16xf32>
    %134 = arith.addf %132, %133 : vector<3x16xf32>
    %135 = arith.negf %134 : vector<3x16xf32>
    %136 = math.exp %135 : vector<3x16xf32>
    %cst_29 = arith.constant 1.000000e+00 : f32
    %137 = vector.broadcast %cst_29 : f32 to vector<3x16xf32>
    %138 = arith.addf %137, %136 : vector<3x16xf32>
    %139 = arith.divf %137, %138 : vector<3x16xf32>
    %140 = vector.extract_strided_slice %93 {offsets = [0, 32], sizes = [3, 16], strides = [1, 1]} : vector<3x48xf32> to vector<3x16xf32>
    %141 = vector.extract_strided_slice %122 {offsets = [0, 32], sizes = [3, 16], strides = [1, 1]} : vector<3x48xf32> to vector<3x16xf32>
    %142 = arith.mulf %131, %141 : vector<3x16xf32>
    %143 = arith.addf %140, %142 : vector<3x16xf32>
    %144 = math.tanh %143 : vector<3x16xf32>
    %cst_30 = arith.constant 1.000000e+00 : f32
    %145 = vector.broadcast %cst_30 : f32 to vector<3x16xf32>
    %146 = arith.subf %145, %139 : vector<3x16xf32>
    %147 = arith.mulf %146, %144 : vector<3x16xf32>
    %148 = arith.mulf %139, %123 : vector<3x16xf32>
    %149 = arith.addf %147, %148 : vector<3x16xf32>
    %150 = tpu.concatenate %121, %149 in 0 : vector<3x16xf32>, vector<3x16xf32> -> vector<6x16xf32>
    %c3 = arith.constant 3 : index
    %c0_31 = arith.constant 0 : index
    %151 = vector.load %arg13[%c3, %c0_31] : memref<24x32xf32, #tpu.memory_space<vmem>>, vector<3x16xf32>
    tpu.vector_store %arg13[%c3, %c0_31], %121 {strides = array<i32>} : memref<24x32xf32, #tpu.memory_space<vmem>>, vector<3x16xf32>,
    %c18 = arith.constant 18 : index
    %c16_32 = arith.constant 16 : index
    %152 = vector.load %arg13[%c18, %c16_32] : memref<24x32xf32, #tpu.memory_space<vmem>>, vector<3x16xf32>
    tpu.vector_store %arg13[%c18, %c16_32], %149 {strides = array<i32>} : memref<24x32xf32, #tpu.memory_space<vmem>>, vector<3x16xf32>,
    %cst_33 = arith.constant dense<0.000000e+00> : vector<6x96xf32>
    %153 = tpu.matmul %150, %18, %cst_33 {dimension_numbers = #tpu.dot_dimension_numbers<[1], [0], [0], [1], [0, 0, 1, 1], [], []>} : vector<6x16xf32>, vector<16x96xf32>, vector<6x96xf32> -> vector<6x96xf32>
    %154 = vector.broadcast %23 : vector<1x96xf32> to vector<6x96xf32>
    %155 = arith.addf %153, %154 : vector<6x96xf32>
    %156 = vector.extract_strided_slice %22 {offsets = [6, 0], sizes = [3, 48], strides = [1, 1]} : vector<24x96xf32> to vector<3x48xf32>
    %157 = vector.extract_strided_slice %22 {offsets = [15, 48], sizes = [3, 48], strides = [1, 1]} : vector<24x96xf32> to vector<3x48xf32>
    %158 = vector.extract_strided_slice %155 {offsets = [0, 0], sizes = [3, 48], strides = [1, 1]} : vector<6x96xf32> to vector<3x48xf32>
    %159 = vector.extract_strided_slice %150 {offsets = [0, 0], sizes = [3, 16], strides = [1, 1]} : vector<6x16xf32> to vector<3x16xf32>
    %160 = vector.extract_strided_slice %156 {offsets = [0, 0], sizes = [3, 16], strides = [1, 1]} : vector<3x48xf32> to vector<3x16xf32>
    %161 = vector.extract_strided_slice %158 {offsets = [0, 0], sizes = [3, 16], strides = [1, 1]} : vector<3x48xf32> to vector<3x16xf32>
    %162 = arith.addf %160, %161 : vector<3x16xf32>
    %163 = arith.negf %162 : vector<3x16xf32>
    %164 = math.exp %163 : vector<3x16xf32>
    %cst_34 = arith.constant 1.000000e+00 : f32
    %165 = vector.broadcast %cst_34 : f32 to vector<3x16xf32>
    %166 = arith.addf %165, %164 : vector<3x16xf32>
    %167 = arith.divf %165, %166 : vector<3x16xf32>
    %168 = vector.extract_strided_slice %156 {offsets = [0, 16], sizes = [3, 16], strides = [1, 1]} : vector<3x48xf32> to vector<3x16xf32>
    %169 = vector.extract_strided_slice %158 {offsets = [0, 16], sizes = [3, 16], strides = [1, 1]} : vector<3x48xf32> to vector<3x16xf32>
    %170 = arith.addf %168, %169 : vector<3x16xf32>
    %171 = arith.negf %170 : vector<3x16xf32>
    %172 = math.exp %171 : vector<3x16xf32>
    %cst_35 = arith.constant 1.000000e+00 : f32
    %173 = vector.broadcast %cst_35 : f32 to vector<3x16xf32>
    %174 = arith.addf %173, %172 : vector<3x16xf32>
    %175 = arith.divf %173, %174 : vector<3x16xf32>
    %176 = vector.extract_strided_slice %156 {offsets = [0, 32], sizes = [3, 16], strides = [1, 1]} : vector<3x48xf32> to vector<3x16xf32>
    %177 = vector.extract_strided_slice %158 {offsets = [0, 32], sizes = [3, 16], strides = [1, 1]} : vector<3x48xf32> to vector<3x16xf32>
    %178 = arith.mulf %167, %177 : vector<3x16xf32>
    %179 = arith.addf %176, %178 : vector<3x16xf32>
    %180 = math.tanh %179 : vector<3x16xf32>
    %cst_36 = arith.constant 1.000000e+00 : f32
    %181 = vector.broadcast %cst_36 : f32 to vector<3x16xf32>
    %182 = arith.subf %181, %175 : vector<3x16xf32>
    %183 = arith.mulf %182, %180 : vector<3x16xf32>
    %184 = arith.mulf %175, %159 : vector<3x16xf32>
    %185 = arith.addf %183, %184 : vector<3x16xf32>
    %186 = vector.extract_strided_slice %155 {offsets = [3, 48], sizes = [3, 48], strides = [1, 1]} : vector<6x96xf32> to vector<3x48xf32>
    %187 = vector.extract_strided_slice %150 {offsets = [3, 0], sizes = [3, 16], strides = [1, 1]} : vector<6x16xf32> to vector<3x16xf32>
    %188 = vector.extract_strided_slice %157 {offsets = [0, 0], sizes = [3, 16], strides = [1, 1]} : vector<3x48xf32> to vector<3x16xf32>
    %189 = vector.extract_strided_slice %186 {offsets = [0, 0], sizes = [3, 16], strides = [1, 1]} : vector<3x48xf32> to vector<3x16xf32>
    %190 = arith.addf %188, %189 : vector<3x16xf32>
    %191 = arith.negf %190 : vector<3x16xf32>
    %192 = math.exp %191 : vector<3x16xf32>
    %cst_37 = arith.constant 1.000000e+00 : f32
    %193 = vector.broadcast %cst_37 : f32 to vector<3x16xf32>
    %194 = arith.addf %193, %192 : vector<3x16xf32>
    %195 = arith.divf %193, %194 : vector<3x16xf32>
    %196 = vector.extract_strided_slice %157 {offsets = [0, 16], sizes = [3, 16], strides = [1, 1]} : vector<3x48xf32> to vector<3x16xf32>
    %197 = vector.extract_strided_slice %186 {offsets = [0, 16], sizes = [3, 16], strides = [1, 1]} : vector<3x48xf32> to vector<3x16xf32>
    %198 = arith.addf %196, %197 : vector<3x16xf32>
    %199 = arith.negf %198 : vector<3x16xf32>
    %200 = math.exp %199 : vector<3x16xf32>
    %cst_38 = arith.constant 1.000000e+00 : f32
    %201 = vector.broadcast %cst_38 : f32 to vector<3x16xf32>
    %202 = arith.addf %201, %200 : vector<3x16xf32>
    %203 = arith.divf %201, %202 : vector<3x16xf32>
    %204 = vector.extract_strided_slice %157 {offsets = [0, 32], sizes = [3, 16], strides = [1, 1]} : vector<3x48xf32> to vector<3x16xf32>
    %205 = vector.extract_strided_slice %186 {offsets = [0, 32], sizes = [3, 16], strides = [1, 1]} : vector<3x48xf32> to vector<3x16xf32>
    %206 = arith.mulf %195, %205 : vector<3x16xf32>
    %207 = arith.addf %204, %206 : vector<3x16xf32>
    %208 = math.tanh %207 : vector<3x16xf32>
    %cst_39 = arith.constant 1.000000e+00 : f32
    %209 = vector.broadcast %cst_39 : f32 to vector<3x16xf32>
    %210 = arith.subf %209, %203 : vector<3x16xf32>
    %211 = arith.mulf %210, %208 : vector<3x16xf32>
    %212 = arith.mulf %203, %187 : vector<3x16xf32>
    %213 = arith.addf %211, %212 : vector<3x16xf32>
    %214 = tpu.concatenate %185, %213 in 0 : vector<3x16xf32>, vector<3x16xf32> -> vector<6x16xf32>
    %c6 = arith.constant 6 : index
    %c0_40 = arith.constant 0 : index
    %215 = vector.load %arg13[%c6, %c0_40] : memref<24x32xf32, #tpu.memory_space<vmem>>, vector<3x16xf32>
    tpu.vector_store %arg13[%c6, %c0_40], %185 {strides = array<i32>} : memref<24x32xf32, #tpu.memory_space<vmem>>, vector<3x16xf32>,
    %c15 = arith.constant 15 : index
    %c16_41 = arith.constant 16 : index
    %216 = vector.load %arg13[%c15, %c16_41] : memref<24x32xf32, #tpu.memory_space<vmem>>, vector<3x16xf32>
    tpu.vector_store %arg13[%c15, %c16_41], %213 {strides = array<i32>} : memref<24x32xf32, #tpu.memory_space<vmem>>, vector<3x16xf32>,
    %cst_42 = arith.constant dense<0.000000e+00> : vector<6x96xf32>
    %217 = tpu.matmul %214, %18, %cst_42 {dimension_numbers = #tpu.dot_dimension_numbers<[1], [0], [0], [1], [0, 0, 1, 1], [], []>} : vector<6x16xf32>, vector<16x96xf32>, vector<6x96xf32> -> vector<6x96xf32>
    %218 = vector.broadcast %23 : vector<1x96xf32> to vector<6x96xf32>
    %219 = arith.addf %217, %218 : vector<6x96xf32>
    %220 = vector.extract_strided_slice %22 {offsets = [9, 0], sizes = [3, 48], strides = [1, 1]} : vector<24x96xf32> to vector<3x48xf32>
    %221 = vector.extract_strided_slice %22 {offsets = [12, 48], sizes = [3, 48], strides = [1, 1]} : vector<24x96xf32> to vector<3x48xf32>
    %222 = vector.extract_strided_slice %219 {offsets = [0, 0], sizes = [3, 48], strides = [1, 1]} : vector<6x96xf32> to vector<3x48xf32>
    %223 = vector.extract_strided_slice %214 {offsets = [0, 0], sizes = [3, 16], strides = [1, 1]} : vector<6x16xf32> to vector<3x16xf32>
    %224 = vector.extract_strided_slice %220 {offsets = [0, 0], sizes = [3, 16], strides = [1, 1]} : vector<3x48xf32> to vector<3x16xf32>
    %225 = vector.extract_strided_slice %222 {offsets = [0, 0], sizes = [3, 16], strides = [1, 1]} : vector<3x48xf32> to vector<3x16xf32>
    %226 = arith.addf %224, %225 : vector<3x16xf32>
    %227 = arith.negf %226 : vector<3x16xf32>
    %228 = math.exp %227 : vector<3x16xf32>
    %cst_43 = arith.constant 1.000000e+00 : f32
    %229 = vector.broadcast %cst_43 : f32 to vector<3x16xf32>
    %230 = arith.addf %229, %228 : vector<3x16xf32>
    %231 = arith.divf %229, %230 : vector<3x16xf32>
    %232 = vector.extract_strided_slice %220 {offsets = [0, 16], sizes = [3, 16], strides = [1, 1]} : vector<3x48xf32> to vector<3x16xf32>
    %233 = vector.extract_strided_slice %222 {offsets = [0, 16], sizes = [3, 16], strides = [1, 1]} : vector<3x48xf32> to vector<3x16xf32>
    %234 = arith.addf %232, %233 : vector<3x16xf32>
    %235 = arith.negf %234 : vector<3x16xf32>
    %236 = math.exp %235 : vector<3x16xf32>
    %cst_44 = arith.constant 1.000000e+00 : f32
    %237 = vector.broadcast %cst_44 : f32 to vector<3x16xf32>
    %238 = arith.addf %237, %236 : vector<3x16xf32>
    %239 = arith.divf %237, %238 : vector<3x16xf32>
    %240 = vector.extract_strided_slice %220 {offsets = [0, 32], sizes = [3, 16], strides = [1, 1]} : vector<3x48xf32> to vector<3x16xf32>
    %241 = vector.extract_strided_slice %222 {offsets = [0, 32], sizes = [3, 16], strides = [1, 1]} : vector<3x48xf32> to vector<3x16xf32>
    %242 = arith.mulf %231, %241 : vector<3x16xf32>
    %243 = arith.addf %240, %242 : vector<3x16xf32>
    %244 = math.tanh %243 : vector<3x16xf32>
    %cst_45 = arith.constant 1.000000e+00 : f32
    %245 = vector.broadcast %cst_45 : f32 to vector<3x16xf32>
    %246 = arith.subf %245, %239 : vector<3x16xf32>
    %247 = arith.mulf %246, %244 : vector<3x16xf32>
    %248 = arith.mulf %239, %223 : vector<3x16xf32>
    %249 = arith.addf %247, %248 : vector<3x16xf32>
    %250 = vector.extract_strided_slice %219 {offsets = [3, 48], sizes = [3, 48], strides = [1, 1]} : vector<6x96xf32> to vector<3x48xf32>
    %251 = vector.extract_strided_slice %214 {offsets = [3, 0], sizes = [3, 16], strides = [1, 1]} : vector<6x16xf32> to vector<3x16xf32>
    %252 = vector.extract_strided_slice %221 {offsets = [0, 0], sizes = [3, 16], strides = [1, 1]} : vector<3x48xf32> to vector<3x16xf32>
    %253 = vector.extract_strided_slice %250 {offsets = [0, 0], sizes = [3, 16], strides = [1, 1]} : vector<3x48xf32> to vector<3x16xf32>
    %254 = arith.addf %252, %253 : vector<3x16xf32>
    %255 = arith.negf %254 : vector<3x16xf32>
    %256 = math.exp %255 : vector<3x16xf32>
    %cst_46 = arith.constant 1.000000e+00 : f32
    %257 = vector.broadcast %cst_46 : f32 to vector<3x16xf32>
    %258 = arith.addf %257, %256 : vector<3x16xf32>
    %259 = arith.divf %257, %258 : vector<3x16xf32>
    %260 = vector.extract_strided_slice %221 {offsets = [0, 16], sizes = [3, 16], strides = [1, 1]} : vector<3x48xf32> to vector<3x16xf32>
    %261 = vector.extract_strided_slice %250 {offsets = [0, 16], sizes = [3, 16], strides = [1, 1]} : vector<3x48xf32> to vector<3x16xf32>
    %262 = arith.addf %260, %261 : vector<3x16xf32>
    %263 = arith.negf %262 : vector<3x16xf32>
    %264 = math.exp %263 : vector<3x16xf32>
    %cst_47 = arith.constant 1.000000e+00 : f32
    %265 = vector.broadcast %cst_47 : f32 to vector<3x16xf32>
    %266 = arith.addf %265, %264 : vector<3x16xf32>
    %267 = arith.divf %265, %266 : vector<3x16xf32>
    %268 = vector.extract_strided_slice %221 {offsets = [0, 32], sizes = [3, 16], strides = [1, 1]} : vector<3x48xf32> to vector<3x16xf32>
    %269 = vector.extract_strided_slice %250 {offsets = [0, 32], sizes = [3, 16], strides = [1, 1]} : vector<3x48xf32> to vector<3x16xf32>
    %270 = arith.mulf %259, %269 : vector<3x16xf32>
    %271 = arith.addf %268, %270 : vector<3x16xf32>
    %272 = math.tanh %271 : vector<3x16xf32>
    %cst_48 = arith.constant 1.000000e+00 : f32
    %273 = vector.broadcast %cst_48 : f32 to vector<3x16xf32>
    %274 = arith.subf %273, %267 : vector<3x16xf32>
    %275 = arith.mulf %274, %272 : vector<3x16xf32>
    %276 = arith.mulf %267, %251 : vector<3x16xf32>
    %277 = arith.addf %275, %276 : vector<3x16xf32>
    %278 = tpu.concatenate %249, %277 in 0 : vector<3x16xf32>, vector<3x16xf32> -> vector<6x16xf32>
    %c9 = arith.constant 9 : index
    %c0_49 = arith.constant 0 : index
    %279 = vector.load %arg13[%c9, %c0_49] : memref<24x32xf32, #tpu.memory_space<vmem>>, vector<3x16xf32>
    tpu.vector_store %arg13[%c9, %c0_49], %249 {strides = array<i32>} : memref<24x32xf32, #tpu.memory_space<vmem>>, vector<3x16xf32>,
    %c12 = arith.constant 12 : index
    %c16_50 = arith.constant 16 : index
    %280 = vector.load %arg13[%c12, %c16_50] : memref<24x32xf32, #tpu.memory_space<vmem>>, vector<3x16xf32>
    tpu.vector_store %arg13[%c12, %c16_50], %277 {strides = array<i32>} : memref<24x32xf32, #tpu.memory_space<vmem>>, vector<3x16xf32>,
    %cst_51 = arith.constant dense<0.000000e+00> : vector<6x96xf32>
    %281 = tpu.matmul %278, %18, %cst_51 {dimension_numbers = #tpu.dot_dimension_numbers<[1], [0], [0], [1], [0, 0, 1, 1], [], []>} : vector<6x16xf32>, vector<16x96xf32>, vector<6x96xf32> -> vector<6x96xf32>
    %282 = vector.broadcast %23 : vector<1x96xf32> to vector<6x96xf32>
    %283 = arith.addf %281, %282 : vector<6x96xf32>
    %284 = vector.extract_strided_slice %22 {offsets = [12, 0], sizes = [3, 48], strides = [1, 1]} : vector<24x96xf32> to vector<3x48xf32>
    %285 = vector.extract_strided_slice %22 {offsets = [9, 48], sizes = [3, 48], strides = [1, 1]} : vector<24x96xf32> to vector<3x48xf32>
    %286 = vector.extract_strided_slice %283 {offsets = [0, 0], sizes = [3, 48], strides = [1, 1]} : vector<6x96xf32> to vector<3x48xf32>
    %287 = vector.extract_strided_slice %278 {offsets = [0, 0], sizes = [3, 16], strides = [1, 1]} : vector<6x16xf32> to vector<3x16xf32>
    %288 = vector.extract_strided_slice %284 {offsets = [0, 0], sizes = [3, 16], strides = [1, 1]} : vector<3x48xf32> to vector<3x16xf32>
    %289 = vector.extract_strided_slice %286 {offsets = [0, 0], sizes = [3, 16], strides = [1, 1]} : vector<3x48xf32> to vector<3x16xf32>
    %290 = arith.addf %288, %289 : vector<3x16xf32>
    %291 = arith.negf %290 : vector<3x16xf32>
    %292 = math.exp %291 : vector<3x16xf32>
    %cst_52 = arith.constant 1.000000e+00 : f32
    %293 = vector.broadcast %cst_52 : f32 to vector<3x16xf32>
    %294 = arith.addf %293, %292 : vector<3x16xf32>
    %295 = arith.divf %293, %294 : vector<3x16xf32>
    %296 = vector.extract_strided_slice %284 {offsets = [0, 16], sizes = [3, 16], strides = [1, 1]} : vector<3x48xf32> to vector<3x16xf32>
    %297 = vector.extract_strided_slice %286 {offsets = [0, 16], sizes = [3, 16], strides = [1, 1]} : vector<3x48xf32> to vector<3x16xf32>
    %298 = arith.addf %296, %297 : vector<3x16xf32>
    %299 = arith.negf %298 : vector<3x16xf32>
    %300 = math.exp %299 : vector<3x16xf32>
    %cst_53 = arith.constant 1.000000e+00 : f32
    %301 = vector.broadcast %cst_53 : f32 to vector<3x16xf32>
    %302 = arith.addf %301, %300 : vector<3x16xf32>
    %303 = arith.divf %301, %302 : vector<3x16xf32>
    %304 = vector.extract_strided_slice %284 {offsets = [0, 32], sizes = [3, 16], strides = [1, 1]} : vector<3x48xf32> to vector<3x16xf32>
    %305 = vector.extract_strided_slice %286 {offsets = [0, 32], sizes = [3, 16], strides = [1, 1]} : vector<3x48xf32> to vector<3x16xf32>
    %306 = arith.mulf %295, %305 : vector<3x16xf32>
    %307 = arith.addf %304, %306 : vector<3x16xf32>
    %308 = math.tanh %307 : vector<3x16xf32>
    %cst_54 = arith.constant 1.000000e+00 : f32
    %309 = vector.broadcast %cst_54 : f32 to vector<3x16xf32>
    %310 = arith.subf %309, %303 : vector<3x16xf32>
    %311 = arith.mulf %310, %308 : vector<3x16xf32>
    %312 = arith.mulf %303, %287 : vector<3x16xf32>
    %313 = arith.addf %311, %312 : vector<3x16xf32>
    %314 = vector.extract_strided_slice %283 {offsets = [3, 48], sizes = [3, 48], strides = [1, 1]} : vector<6x96xf32> to vector<3x48xf32>
    %315 = vector.extract_strided_slice %278 {offsets = [3, 0], sizes = [3, 16], strides = [1, 1]} : vector<6x16xf32> to vector<3x16xf32>
    %316 = vector.extract_strided_slice %285 {offsets = [0, 0], sizes = [3, 16], strides = [1, 1]} : vector<3x48xf32> to vector<3x16xf32>
    %317 = vector.extract_strided_slice %314 {offsets = [0, 0], sizes = [3, 16], strides = [1, 1]} : vector<3x48xf32> to vector<3x16xf32>
    %318 = arith.addf %316, %317 : vector<3x16xf32>
    %319 = arith.negf %318 : vector<3x16xf32>
    %320 = math.exp %319 : vector<3x16xf32>
    %cst_55 = arith.constant 1.000000e+00 : f32
    %321 = vector.broadcast %cst_55 : f32 to vector<3x16xf32>
    %322 = arith.addf %321, %320 : vector<3x16xf32>
    %323 = arith.divf %321, %322 : vector<3x16xf32>
    %324 = vector.extract_strided_slice %285 {offsets = [0, 16], sizes = [3, 16], strides = [1, 1]} : vector<3x48xf32> to vector<3x16xf32>
    %325 = vector.extract_strided_slice %314 {offsets = [0, 16], sizes = [3, 16], strides = [1, 1]} : vector<3x48xf32> to vector<3x16xf32>
    %326 = arith.addf %324, %325 : vector<3x16xf32>
    %327 = arith.negf %326 : vector<3x16xf32>
    %328 = math.exp %327 : vector<3x16xf32>
    %cst_56 = arith.constant 1.000000e+00 : f32
    %329 = vector.broadcast %cst_56 : f32 to vector<3x16xf32>
    %330 = arith.addf %329, %328 : vector<3x16xf32>
    %331 = arith.divf %329, %330 : vector<3x16xf32>
    %332 = vector.extract_strided_slice %285 {offsets = [0, 32], sizes = [3, 16], strides = [1, 1]} : vector<3x48xf32> to vector<3x16xf32>
    %333 = vector.extract_strided_slice %314 {offsets = [0, 32], sizes = [3, 16], strides = [1, 1]} : vector<3x48xf32> to vector<3x16xf32>
    %334 = arith.mulf %323, %333 : vector<3x16xf32>
    %335 = arith.addf %332, %334 : vector<3x16xf32>
    %336 = math.tanh %335 : vector<3x16xf32>
    %cst_57 = arith.constant 1.000000e+00 : f32
    %337 = vector.broadcast %cst_57 : f32 to vector<3x16xf32>
    %338 = arith.subf %337, %331 : vector<3x16xf32>
    %339 = arith.mulf %338, %336 : vector<3x16xf32>
    %340 = arith.mulf %331, %315 : vector<3x16xf32>
    %341 = arith.addf %339, %340 : vector<3x16xf32>
    %342 = tpu.concatenate %313, %341 in 0 : vector<3x16xf32>, vector<3x16xf32> -> vector<6x16xf32>
    %c12_58 = arith.constant 12 : index
    %c0_59 = arith.constant 0 : index
    %343 = vector.load %arg13[%c12_58, %c0_59] : memref<24x32xf32, #tpu.memory_space<vmem>>, vector<3x16xf32>
    tpu.vector_store %arg13[%c12_58, %c0_59], %313 {strides = array<i32>} : memref<24x32xf32, #tpu.memory_space<vmem>>, vector<3x16xf32>,
    %c9_60 = arith.constant 9 : index
    %c16_61 = arith.constant 16 : index
    %344 = vector.load %arg13[%c9_60, %c16_61] : memref<24x32xf32, #tpu.memory_space<vmem>>, vector<3x16xf32>
    tpu.vector_store %arg13[%c9_60, %c16_61], %341 {strides = array<i32>} : memref<24x32xf32, #tpu.memory_space<vmem>>, vector<3x16xf32>,
    %cst_62 = arith.constant dense<0.000000e+00> : vector<6x96xf32>
    %345 = tpu.matmul %342, %18, %cst_62 {dimension_numbers = #tpu.dot_dimension_numbers<[1], [0], [0], [1], [0, 0, 1, 1], [], []>} : vector<6x16xf32>, vector<16x96xf32>, vector<6x96xf32> -> vector<6x96xf32>
    %346 = vector.broadcast %23 : vector<1x96xf32> to vector<6x96xf32>
    %347 = arith.addf %345, %346 : vector<6x96xf32>
    %348 = vector.extract_strided_slice %22 {offsets = [15, 0], sizes = [3, 48], strides = [1, 1]} : vector<24x96xf32> to vector<3x48xf32>
    %349 = vector.extract_strided_slice %22 {offsets = [6, 48], sizes = [3, 48], strides = [1, 1]} : vector<24x96xf32> to vector<3x48xf32>
    %350 = vector.extract_strided_slice %347 {offsets = [0, 0], sizes = [3, 48], strides = [1, 1]} : vector<6x96xf32> to vector<3x48xf32>
    %351 = vector.extract_strided_slice %342 {offsets = [0, 0], sizes = [3, 16], strides = [1, 1]} : vector<6x16xf32> to vector<3x16xf32>
    %352 = vector.extract_strided_slice %348 {offsets = [0, 0], sizes = [3, 16], strides = [1, 1]} : vector<3x48xf32> to vector<3x16xf32>
    %353 = vector.extract_strided_slice %350 {offsets = [0, 0], sizes = [3, 16], strides = [1, 1]} : vector<3x48xf32> to vector<3x16xf32>
    %354 = arith.addf %352, %353 : vector<3x16xf32>
    %355 = arith.negf %354 : vector<3x16xf32>
    %356 = math.exp %355 : vector<3x16xf32>
    %cst_63 = arith.constant 1.000000e+00 : f32
    %357 = vector.broadcast %cst_63 : f32 to vector<3x16xf32>
    %358 = arith.addf %357, %356 : vector<3x16xf32>
    %359 = arith.divf %357, %358 : vector<3x16xf32>
    %360 = vector.extract_strided_slice %348 {offsets = [0, 16], sizes = [3, 16], strides = [1, 1]} : vector<3x48xf32> to vector<3x16xf32>
    %361 = vector.extract_strided_slice %350 {offsets = [0, 16], sizes = [3, 16], strides = [1, 1]} : vector<3x48xf32> to vector<3x16xf32>
    %362 = arith.addf %360, %361 : vector<3x16xf32>
    %363 = arith.negf %362 : vector<3x16xf32>
    %364 = math.exp %363 : vector<3x16xf32>
    %cst_64 = arith.constant 1.000000e+00 : f32
    %365 = vector.broadcast %cst_64 : f32 to vector<3x16xf32>
    %366 = arith.addf %365, %364 : vector<3x16xf32>
    %367 = arith.divf %365, %366 : vector<3x16xf32>
    %368 = vector.extract_strided_slice %348 {offsets = [0, 32], sizes = [3, 16], strides = [1, 1]} : vector<3x48xf32> to vector<3x16xf32>
    %369 = vector.extract_strided_slice %350 {offsets = [0, 32], sizes = [3, 16], strides = [1, 1]} : vector<3x48xf32> to vector<3x16xf32>
    %370 = arith.mulf %359, %369 : vector<3x16xf32>
    %371 = arith.addf %368, %370 : vector<3x16xf32>
    %372 = math.tanh %371 : vector<3x16xf32>
    %cst_65 = arith.constant 1.000000e+00 : f32
    %373 = vector.broadcast %cst_65 : f32 to vector<3x16xf32>
    %374 = arith.subf %373, %367 : vector<3x16xf32>
    %375 = arith.mulf %374, %372 : vector<3x16xf32>
    %376 = arith.mulf %367, %351 : vector<3x16xf32>
    %377 = arith.addf %375, %376 : vector<3x16xf32>
    %378 = vector.extract_strided_slice %347 {offsets = [3, 48], sizes = [3, 48], strides = [1, 1]} : vector<6x96xf32> to vector<3x48xf32>
    %379 = vector.extract_strided_slice %342 {offsets = [3, 0], sizes = [3, 16], strides = [1, 1]} : vector<6x16xf32> to vector<3x16xf32>
    %380 = vector.extract_strided_slice %349 {offsets = [0, 0], sizes = [3, 16], strides = [1, 1]} : vector<3x48xf32> to vector<3x16xf32>
    %381 = vector.extract_strided_slice %378 {offsets = [0, 0], sizes = [3, 16], strides = [1, 1]} : vector<3x48xf32> to vector<3x16xf32>
    %382 = arith.addf %380, %381 : vector<3x16xf32>
    %383 = arith.negf %382 : vector<3x16xf32>
    %384 = math.exp %383 : vector<3x16xf32>
    %cst_66 = arith.constant 1.000000e+00 : f32
    %385 = vector.broadcast %cst_66 : f32 to vector<3x16xf32>
    %386 = arith.addf %385, %384 : vector<3x16xf32>
    %387 = arith.divf %385, %386 : vector<3x16xf32>
    %388 = vector.extract_strided_slice %349 {offsets = [0, 16], sizes = [3, 16], strides = [1, 1]} : vector<3x48xf32> to vector<3x16xf32>
    %389 = vector.extract_strided_slice %378 {offsets = [0, 16], sizes = [3, 16], strides = [1, 1]} : vector<3x48xf32> to vector<3x16xf32>
    %390 = arith.addf %388, %389 : vector<3x16xf32>
    %391 = arith.negf %390 : vector<3x16xf32>
    %392 = math.exp %391 : vector<3x16xf32>
    %cst_67 = arith.constant 1.000000e+00 : f32
    %393 = vector.broadcast %cst_67 : f32 to vector<3x16xf32>
    %394 = arith.addf %393, %392 : vector<3x16xf32>
    %395 = arith.divf %393, %394 : vector<3x16xf32>
    %396 = vector.extract_strided_slice %349 {offsets = [0, 32], sizes = [3, 16], strides = [1, 1]} : vector<3x48xf32> to vector<3x16xf32>
    %397 = vector.extract_strided_slice %378 {offsets = [0, 32], sizes = [3, 16], strides = [1, 1]} : vector<3x48xf32> to vector<3x16xf32>
    %398 = arith.mulf %387, %397 : vector<3x16xf32>
    %399 = arith.addf %396, %398 : vector<3x16xf32>
    %400 = math.tanh %399 : vector<3x16xf32>
    %cst_68 = arith.constant 1.000000e+00 : f32
    %401 = vector.broadcast %cst_68 : f32 to vector<3x16xf32>
    %402 = arith.subf %401, %395 : vector<3x16xf32>
    %403 = arith.mulf %402, %400 : vector<3x16xf32>
    %404 = arith.mulf %395, %379 : vector<3x16xf32>
    %405 = arith.addf %403, %404 : vector<3x16xf32>
    %406 = tpu.concatenate %377, %405 in 0 : vector<3x16xf32>, vector<3x16xf32> -> vector<6x16xf32>
    %c15_69 = arith.constant 15 : index
    %c0_70 = arith.constant 0 : index
    %407 = vector.load %arg13[%c15_69, %c0_70] : memref<24x32xf32, #tpu.memory_space<vmem>>, vector<3x16xf32>
    tpu.vector_store %arg13[%c15_69, %c0_70], %377 {strides = array<i32>} : memref<24x32xf32, #tpu.memory_space<vmem>>, vector<3x16xf32>,
    %c6_71 = arith.constant 6 : index
    %c16_72 = arith.constant 16 : index
    %408 = vector.load %arg13[%c6_71, %c16_72] : memref<24x32xf32, #tpu.memory_space<vmem>>, vector<3x16xf32>
    tpu.vector_store %arg13[%c6_71, %c16_72], %405 {strides = array<i32>} : memref<24x32xf32, #tpu.memory_space<vmem>>, vector<3x16xf32>,
    %cst_73 = arith.constant dense<0.000000e+00> : vector<6x96xf32>
    %409 = tpu.matmul %406, %18, %cst_73 {dimension_numbers = #tpu.dot_dimension_numbers<[1], [0], [0], [1], [0, 0, 1, 1], [], []>} : vector<6x16xf32>, vector<16x96xf32>, vector<6x96xf32> -> vector<6x96xf32>
    %410 = vector.broadcast %23 : vector<1x96xf32> to vector<6x96xf32>
    %411 = arith.addf %409, %410 : vector<6x96xf32>
    %412 = vector.extract_strided_slice %22 {offsets = [18, 0], sizes = [3, 48], strides = [1, 1]} : vector<24x96xf32> to vector<3x48xf32>
    %413 = vector.extract_strided_slice %22 {offsets = [3, 48], sizes = [3, 48], strides = [1, 1]} : vector<24x96xf32> to vector<3x48xf32>
    %414 = vector.extract_strided_slice %411 {offsets = [0, 0], sizes = [3, 48], strides = [1, 1]} : vector<6x96xf32> to vector<3x48xf32>
    %415 = vector.extract_strided_slice %406 {offsets = [0, 0], sizes = [3, 16], strides = [1, 1]} : vector<6x16xf32> to vector<3x16xf32>
    %416 = vector.extract_strided_slice %412 {offsets = [0, 0], sizes = [3, 16], strides = [1, 1]} : vector<3x48xf32> to vector<3x16xf32>
    %417 = vector.extract_strided_slice %414 {offsets = [0, 0], sizes = [3, 16], strides = [1, 1]} : vector<3x48xf32> to vector<3x16xf32>
    %418 = arith.addf %416, %417 : vector<3x16xf32>
    %419 = arith.negf %418 : vector<3x16xf32>
    %420 = math.exp %419 : vector<3x16xf32>
    %cst_74 = arith.constant 1.000000e+00 : f32
    %421 = vector.broadcast %cst_74 : f32 to vector<3x16xf32>
    %422 = arith.addf %421, %420 : vector<3x16xf32>
    %423 = arith.divf %421, %422 : vector<3x16xf32>
    %424 = vector.extract_strided_slice %412 {offsets = [0, 16], sizes = [3, 16], strides = [1, 1]} : vector<3x48xf32> to vector<3x16xf32>
    %425 = vector.extract_strided_slice %414 {offsets = [0, 16], sizes = [3, 16], strides = [1, 1]} : vector<3x48xf32> to vector<3x16xf32>
    %426 = arith.addf %424, %425 : vector<3x16xf32>
    %427 = arith.negf %426 : vector<3x16xf32>
    %428 = math.exp %427 : vector<3x16xf32>
    %cst_75 = arith.constant 1.000000e+00 : f32
    %429 = vector.broadcast %cst_75 : f32 to vector<3x16xf32>
    %430 = arith.addf %429, %428 : vector<3x16xf32>
    %431 = arith.divf %429, %430 : vector<3x16xf32>
    %432 = vector.extract_strided_slice %412 {offsets = [0, 32], sizes = [3, 16], strides = [1, 1]} : vector<3x48xf32> to vector<3x16xf32>
    %433 = vector.extract_strided_slice %414 {offsets = [0, 32], sizes = [3, 16], strides = [1, 1]} : vector<3x48xf32> to vector<3x16xf32>
    %434 = arith.mulf %423, %433 : vector<3x16xf32>
    %435 = arith.addf %432, %434 : vector<3x16xf32>
    %436 = math.tanh %435 : vector<3x16xf32>
    %cst_76 = arith.constant 1.000000e+00 : f32
    %437 = vector.broadcast %cst_76 : f32 to vector<3x16xf32>
    %438 = arith.subf %437, %431 : vector<3x16xf32>
    %439 = arith.mulf %438, %436 : vector<3x16xf32>
    %440 = arith.mulf %431, %415 : vector<3x16xf32>
    %441 = arith.addf %439, %440 : vector<3x16xf32>
    %442 = vector.extract_strided_slice %411 {offsets = [3, 48], sizes = [3, 48], strides = [1, 1]} : vector<6x96xf32> to vector<3x48xf32>
    %443 = vector.extract_strided_slice %406 {offsets = [3, 0], sizes = [3, 16], strides = [1, 1]} : vector<6x16xf32> to vector<3x16xf32>
    %444 = vector.extract_strided_slice %413 {offsets = [0, 0], sizes = [3, 16], strides = [1, 1]} : vector<3x48xf32> to vector<3x16xf32>
    %445 = vector.extract_strided_slice %442 {offsets = [0, 0], sizes = [3, 16], strides = [1, 1]} : vector<3x48xf32> to vector<3x16xf32>
    %446 = arith.addf %444, %445 : vector<3x16xf32>
    %447 = arith.negf %446 : vector<3x16xf32>
    %448 = math.exp %447 : vector<3x16xf32>
    %cst_77 = arith.constant 1.000000e+00 : f32
    %449 = vector.broadcast %cst_77 : f32 to vector<3x16xf32>
    %450 = arith.addf %449, %448 : vector<3x16xf32>
    %451 = arith.divf %449, %450 : vector<3x16xf32>
    %452 = vector.extract_strided_slice %413 {offsets = [0, 16], sizes = [3, 16], strides = [1, 1]} : vector<3x48xf32> to vector<3x16xf32>
    %453 = vector.extract_strided_slice %442 {offsets = [0, 16], sizes = [3, 16], strides = [1, 1]} : vector<3x48xf32> to vector<3x16xf32>
    %454 = arith.addf %452, %453 : vector<3x16xf32>
    %455 = arith.negf %454 : vector<3x16xf32>
    %456 = math.exp %455 : vector<3x16xf32>
    %cst_78 = arith.constant 1.000000e+00 : f32
    %457 = vector.broadcast %cst_78 : f32 to vector<3x16xf32>
    %458 = arith.addf %457, %456 : vector<3x16xf32>
    %459 = arith.divf %457, %458 : vector<3x16xf32>
    %460 = vector.extract_strided_slice %413 {offsets = [0, 32], sizes = [3, 16], strides = [1, 1]} : vector<3x48xf32> to vector<3x16xf32>
    %461 = vector.extract_strided_slice %442 {offsets = [0, 32], sizes = [3, 16], strides = [1, 1]} : vector<3x48xf32> to vector<3x16xf32>
    %462 = arith.mulf %451, %461 : vector<3x16xf32>
    %463 = arith.addf %460, %462 : vector<3x16xf32>
    %464 = math.tanh %463 : vector<3x16xf32>
    %cst_79 = arith.constant 1.000000e+00 : f32
    %465 = vector.broadcast %cst_79 : f32 to vector<3x16xf32>
    %466 = arith.subf %465, %459 : vector<3x16xf32>
    %467 = arith.mulf %466, %464 : vector<3x16xf32>
    %468 = arith.mulf %459, %443 : vector<3x16xf32>
    %469 = arith.addf %467, %468 : vector<3x16xf32>
    %470 = tpu.concatenate %441, %469 in 0 : vector<3x16xf32>, vector<3x16xf32> -> vector<6x16xf32>
    %c18_80 = arith.constant 18 : index
    %c0_81 = arith.constant 0 : index
    %471 = vector.load %arg13[%c18_80, %c0_81] : memref<24x32xf32, #tpu.memory_space<vmem>>, vector<3x16xf32>
    tpu.vector_store %arg13[%c18_80, %c0_81], %441 {strides = array<i32>} : memref<24x32xf32, #tpu.memory_space<vmem>>, vector<3x16xf32>,
    %c3_82 = arith.constant 3 : index
    %c16_83 = arith.constant 16 : index
    %472 = vector.load %arg13[%c3_82, %c16_83] : memref<24x32xf32, #tpu.memory_space<vmem>>, vector<3x16xf32>
    tpu.vector_store %arg13[%c3_82, %c16_83], %469 {strides = array<i32>} : memref<24x32xf32, #tpu.memory_space<vmem>>, vector<3x16xf32>,
    %cst_84 = arith.constant dense<0.000000e+00> : vector<6x96xf32>
    %473 = tpu.matmul %470, %18, %cst_84 {dimension_numbers = #tpu.dot_dimension_numbers<[1], [0], [0], [1], [0, 0, 1, 1], [], []>} : vector<6x16xf32>, vector<16x96xf32>, vector<6x96xf32> -> vector<6x96xf32>
    %474 = vector.broadcast %23 : vector<1x96xf32> to vector<6x96xf32>
    %475 = arith.addf %473, %474 : vector<6x96xf32>
    %476 = vector.extract_strided_slice %22 {offsets = [21, 0], sizes = [3, 48], strides = [1, 1]} : vector<24x96xf32> to vector<3x48xf32>
    %477 = vector.extract_strided_slice %22 {offsets = [0, 48], sizes = [3, 48], strides = [1, 1]} : vector<24x96xf32> to vector<3x48xf32>
    %478 = vector.extract_strided_slice %475 {offsets = [0, 0], sizes = [3, 48], strides = [1, 1]} : vector<6x96xf32> to vector<3x48xf32>
    %479 = vector.extract_strided_slice %470 {offsets = [0, 0], sizes = [3, 16], strides = [1, 1]} : vector<6x16xf32> to vector<3x16xf32>
    %480 = vector.extract_strided_slice %476 {offsets = [0, 0], sizes = [3, 16], strides = [1, 1]} : vector<3x48xf32> to vector<3x16xf32>
    %481 = vector.extract_strided_slice %478 {offsets = [0, 0], sizes = [3, 16], strides = [1, 1]} : vector<3x48xf32> to vector<3x16xf32>
    %482 = arith.addf %480, %481 : vector<3x16xf32>
    %483 = arith.negf %482 : vector<3x16xf32>
    %484 = math.exp %483 : vector<3x16xf32>
    %cst_85 = arith.constant 1.000000e+00 : f32
    %485 = vector.broadcast %cst_85 : f32 to vector<3x16xf32>
    %486 = arith.addf %485, %484 : vector<3x16xf32>
    %487 = arith.divf %485, %486 : vector<3x16xf32>
    %488 = vector.extract_strided_slice %476 {offsets = [0, 16], sizes = [3, 16], strides = [1, 1]} : vector<3x48xf32> to vector<3x16xf32>
    %489 = vector.extract_strided_slice %478 {offsets = [0, 16], sizes = [3, 16], strides = [1, 1]} : vector<3x48xf32> to vector<3x16xf32>
    %490 = arith.addf %488, %489 : vector<3x16xf32>
    %491 = arith.negf %490 : vector<3x16xf32>
    %492 = math.exp %491 : vector<3x16xf32>
    %cst_86 = arith.constant 1.000000e+00 : f32
    %493 = vector.broadcast %cst_86 : f32 to vector<3x16xf32>
    %494 = arith.addf %493, %492 : vector<3x16xf32>
    %495 = arith.divf %493, %494 : vector<3x16xf32>
    %496 = vector.extract_strided_slice %476 {offsets = [0, 32], sizes = [3, 16], strides = [1, 1]} : vector<3x48xf32> to vector<3x16xf32>
    %497 = vector.extract_strided_slice %478 {offsets = [0, 32], sizes = [3, 16], strides = [1, 1]} : vector<3x48xf32> to vector<3x16xf32>
    %498 = arith.mulf %487, %497 : vector<3x16xf32>
    %499 = arith.addf %496, %498 : vector<3x16xf32>
    %500 = math.tanh %499 : vector<3x16xf32>
    %cst_87 = arith.constant 1.000000e+00 : f32
    %501 = vector.broadcast %cst_87 : f32 to vector<3x16xf32>
    %502 = arith.subf %501, %495 : vector<3x16xf32>
    %503 = arith.mulf %502, %500 : vector<3x16xf32>
    %504 = arith.mulf %495, %479 : vector<3x16xf32>
    %505 = arith.addf %503, %504 : vector<3x16xf32>
    %506 = vector.extract_strided_slice %475 {offsets = [3, 48], sizes = [3, 48], strides = [1, 1]} : vector<6x96xf32> to vector<3x48xf32>
    %507 = vector.extract_strided_slice %470 {offsets = [3, 0], sizes = [3, 16], strides = [1, 1]} : vector<6x16xf32> to vector<3x16xf32>
    %508 = vector.extract_strided_slice %477 {offsets = [0, 0], sizes = [3, 16], strides = [1, 1]} : vector<3x48xf32> to vector<3x16xf32>
    %509 = vector.extract_strided_slice %506 {offsets = [0, 0], sizes = [3, 16], strides = [1, 1]} : vector<3x48xf32> to vector<3x16xf32>
    %510 = arith.addf %508, %509 : vector<3x16xf32>
    %511 = arith.negf %510 : vector<3x16xf32>
    %512 = math.exp %511 : vector<3x16xf32>
    %cst_88 = arith.constant 1.000000e+00 : f32
    %513 = vector.broadcast %cst_88 : f32 to vector<3x16xf32>
    %514 = arith.addf %513, %512 : vector<3x16xf32>
    %515 = arith.divf %513, %514 : vector<3x16xf32>
    %516 = vector.extract_strided_slice %477 {offsets = [0, 16], sizes = [3, 16], strides = [1, 1]} : vector<3x48xf32> to vector<3x16xf32>
    %517 = vector.extract_strided_slice %506 {offsets = [0, 16], sizes = [3, 16], strides = [1, 1]} : vector<3x48xf32> to vector<3x16xf32>
    %518 = arith.addf %516, %517 : vector<3x16xf32>
    %519 = arith.negf %518 : vector<3x16xf32>
    %520 = math.exp %519 : vector<3x16xf32>
    %cst_89 = arith.constant 1.000000e+00 : f32
    %521 = vector.broadcast %cst_89 : f32 to vector<3x16xf32>
    %522 = arith.addf %521, %520 : vector<3x16xf32>
    %523 = arith.divf %521, %522 : vector<3x16xf32>
    %524 = vector.extract_strided_slice %477 {offsets = [0, 32], sizes = [3, 16], strides = [1, 1]} : vector<3x48xf32> to vector<3x16xf32>
    %525 = vector.extract_strided_slice %506 {offsets = [0, 32], sizes = [3, 16], strides = [1, 1]} : vector<3x48xf32> to vector<3x16xf32>
    %526 = arith.mulf %515, %525 : vector<3x16xf32>
    %527 = arith.addf %524, %526 : vector<3x16xf32>
    %528 = math.tanh %527 : vector<3x16xf32>
    %cst_90 = arith.constant 1.000000e+00 : f32
    %529 = vector.broadcast %cst_90 : f32 to vector<3x16xf32>
    %530 = arith.subf %529, %523 : vector<3x16xf32>
    %531 = arith.mulf %530, %528 : vector<3x16xf32>
    %532 = arith.mulf %523, %507 : vector<3x16xf32>
    %533 = arith.addf %531, %532 : vector<3x16xf32>
    %c21_91 = arith.constant 21 : index
    %c0_92 = arith.constant 0 : index
    %534 = vector.load %arg13[%c21_91, %c0_92] : memref<24x32xf32, #tpu.memory_space<vmem>>, vector<3x16xf32>
    tpu.vector_store %arg13[%c21_91, %c0_92], %505 {strides = array<i32>} : memref<24x32xf32, #tpu.memory_space<vmem>>, vector<3x16xf32>,
    %c0_93 = arith.constant 0 : index
    %c16_94 = arith.constant 16 : index
    %535 = vector.load %arg13[%c0_93, %c16_94] : memref<24x32xf32, #tpu.memory_space<vmem>>, vector<3x16xf32>
    tpu.vector_store %arg13[%c0_93, %c16_94], %533 {strides = array<i32>} : memref<24x32xf32, #tpu.memory_space<vmem>>, vector<3x16xf32>,
    %c12_95 = arith.constant 12 : index
    %c0_96 = arith.constant 0 : index
    %536 = vector.load %arg13[%c12_95, %c0_96] : memref<24x32xf32, #tpu.memory_space<vmem>>, vector<1x32xf32>
    %c7 = arith.constant 7 : index
    %c0_97 = arith.constant 0 : index
    %537 = vector.load %arg13[%c7, %c0_97] : memref<24x32xf32, #tpu.memory_space<vmem>>, vector<1x32xf32>
    %c11 = arith.constant 11 : index
    %c0_98 = arith.constant 0 : index
    %538 = vector.load %arg13[%c11, %c0_98] : memref<24x32xf32, #tpu.memory_space<vmem>>, vector<1x32xf32>
    %539 = tpu.concatenate %536, %537, %538 in 0 : vector<1x32xf32>, vector<1x32xf32>, vector<1x32xf32> -> vector<3x32xf32>
    %c32 = arith.constant 32 : index
    %c0_99 = arith.constant 0 : index
    %540 = vector.load %arg3[%c32, %c0_99] : memref<128x96xf32, #tpu.memory_space<vmem>>, vector<32x96xf32>
    %c64 = arith.constant 64 : index
    %c0_100 = arith.constant 0 : index
    %541 = vector.load %arg3[%c64, %c0_100] : memref<128x96xf32, #tpu.memory_space<vmem>>, vector<16x96xf32>
    %cst_101 = arith.constant dense<0.000000e+00> : vector<3x96xf32>
    %542 = tpu.matmul %539, %540, %cst_101 {dimension_numbers = #tpu.dot_dimension_numbers<[1], [0], [0], [1], [0, 0, 1, 1], [], []>} : vector<3x32xf32>, vector<32x96xf32>, vector<3x96xf32> -> vector<3x96xf32>
    %c2 = arith.constant 2 : index
    %c0_102 = arith.constant 0 : index
    %543 = vector.load %arg5[%c2, %c0_102] : memref<14x96xf32, #tpu.memory_space<vmem>>, vector<1x96xf32>
    %544 = vector.broadcast %543 : vector<1x96xf32> to vector<3x96xf32>
    %545 = arith.addf %542, %544 : vector<3x96xf32>
    %c3_103 = arith.constant 3 : index
    %c0_104 = arith.constant 0 : index
    %546 = vector.load %arg5[%c3_103, %c0_104] : memref<14x96xf32, #tpu.memory_space<vmem>>, vector<1x96xf32>
    %cst_105 = arith.constant 0.000000e+00 : f32
    %547 = vector.broadcast %cst_105 : f32 to vector<2x16xf32>
    %cst_106 = arith.constant dense<0.000000e+00> : vector<2x96xf32>
    %548 = tpu.matmul %547, %541, %cst_106 {dimension_numbers = #tpu.dot_dimension_numbers<[1], [0], [0], [1], [0, 0, 1, 1], [], []>} : vector<2x16xf32>, vector<16x96xf32>, vector<2x96xf32> -> vector<2x96xf32>
    %549 = vector.broadcast %546 : vector<1x96xf32> to vector<2x96xf32>
    %550 = arith.addf %548, %549 : vector<2x96xf32>
    %551 = vector.extract_strided_slice %545 {offsets = [0, 0], sizes = [1, 48], strides = [1, 1]} : vector<3x96xf32> to vector<1x48xf32>
    %552 = vector.extract_strided_slice %550 {offsets = [0, 0], sizes = [1, 48], strides = [1, 1]} : vector<2x96xf32> to vector<1x48xf32>
    %553 = vector.extract_strided_slice %547 {offsets = [0, 0], sizes = [1, 16], strides = [1, 1]} : vector<2x16xf32> to vector<1x16xf32>
    %554 = vector.extract_strided_slice %551 {offsets = [0, 0], sizes = [1, 16], strides = [1, 1]} : vector<1x48xf32> to vector<1x16xf32>
    %555 = vector.extract_strided_slice %552 {offsets = [0, 0], sizes = [1, 16], strides = [1, 1]} : vector<1x48xf32> to vector<1x16xf32>
    %556 = arith.addf %554, %555 : vector<1x16xf32>
    %557 = arith.negf %556 : vector<1x16xf32>
    %558 = math.exp %557 : vector<1x16xf32>
    %cst_107 = arith.constant 1.000000e+00 : f32
    %559 = vector.broadcast %cst_107 : f32 to vector<1x16xf32>
    %560 = arith.addf %559, %558 : vector<1x16xf32>
    %561 = arith.divf %559, %560 : vector<1x16xf32>
    %562 = vector.extract_strided_slice %551 {offsets = [0, 16], sizes = [1, 16], strides = [1, 1]} : vector<1x48xf32> to vector<1x16xf32>
    %563 = vector.extract_strided_slice %552 {offsets = [0, 16], sizes = [1, 16], strides = [1, 1]} : vector<1x48xf32> to vector<1x16xf32>
    %564 = arith.addf %562, %563 : vector<1x16xf32>
    %565 = arith.negf %564 : vector<1x16xf32>
    %566 = math.exp %565 : vector<1x16xf32>
    %cst_108 = arith.constant 1.000000e+00 : f32
    %567 = vector.broadcast %cst_108 : f32 to vector<1x16xf32>
    %568 = arith.addf %567, %566 : vector<1x16xf32>
    %569 = arith.divf %567, %568 : vector<1x16xf32>
    %570 = vector.extract_strided_slice %551 {offsets = [0, 32], sizes = [1, 16], strides = [1, 1]} : vector<1x48xf32> to vector<1x16xf32>
    %571 = vector.extract_strided_slice %552 {offsets = [0, 32], sizes = [1, 16], strides = [1, 1]} : vector<1x48xf32> to vector<1x16xf32>
    %572 = arith.mulf %561, %571 : vector<1x16xf32>
    %573 = arith.addf %570, %572 : vector<1x16xf32>
    %574 = math.tanh %573 : vector<1x16xf32>
    %cst_109 = arith.constant 1.000000e+00 : f32
    %575 = vector.broadcast %cst_109 : f32 to vector<1x16xf32>
    %576 = arith.subf %575, %569 : vector<1x16xf32>
    %577 = arith.mulf %576, %574 : vector<1x16xf32>
    %578 = arith.mulf %569, %553 : vector<1x16xf32>
    %579 = arith.addf %577, %578 : vector<1x16xf32>
    %580 = vector.extract_strided_slice %545 {offsets = [2, 48], sizes = [1, 48], strides = [1, 1]} : vector<3x96xf32> to vector<1x48xf32>
    %581 = vector.extract_strided_slice %550 {offsets = [1, 48], sizes = [1, 48], strides = [1, 1]} : vector<2x96xf32> to vector<1x48xf32>
    %582 = vector.extract_strided_slice %547 {offsets = [1, 0], sizes = [1, 16], strides = [1, 1]} : vector<2x16xf32> to vector<1x16xf32>
    %583 = vector.extract_strided_slice %580 {offsets = [0, 0], sizes = [1, 16], strides = [1, 1]} : vector<1x48xf32> to vector<1x16xf32>
    %584 = vector.extract_strided_slice %581 {offsets = [0, 0], sizes = [1, 16], strides = [1, 1]} : vector<1x48xf32> to vector<1x16xf32>
    %585 = arith.addf %583, %584 : vector<1x16xf32>
    %586 = arith.negf %585 : vector<1x16xf32>
    %587 = math.exp %586 : vector<1x16xf32>
    %cst_110 = arith.constant 1.000000e+00 : f32
    %588 = vector.broadcast %cst_110 : f32 to vector<1x16xf32>
    %589 = arith.addf %588, %587 : vector<1x16xf32>
    %590 = arith.divf %588, %589 : vector<1x16xf32>
    %591 = vector.extract_strided_slice %580 {offsets = [0, 16], sizes = [1, 16], strides = [1, 1]} : vector<1x48xf32> to vector<1x16xf32>
    %592 = vector.extract_strided_slice %581 {offsets = [0, 16], sizes = [1, 16], strides = [1, 1]} : vector<1x48xf32> to vector<1x16xf32>
    %593 = arith.addf %591, %592 : vector<1x16xf32>
    %594 = arith.negf %593 : vector<1x16xf32>
    %595 = math.exp %594 : vector<1x16xf32>
    %cst_111 = arith.constant 1.000000e+00 : f32
    %596 = vector.broadcast %cst_111 : f32 to vector<1x16xf32>
    %597 = arith.addf %596, %595 : vector<1x16xf32>
    %598 = arith.divf %596, %597 : vector<1x16xf32>
    %599 = vector.extract_strided_slice %580 {offsets = [0, 32], sizes = [1, 16], strides = [1, 1]} : vector<1x48xf32> to vector<1x16xf32>
    %600 = vector.extract_strided_slice %581 {offsets = [0, 32], sizes = [1, 16], strides = [1, 1]} : vector<1x48xf32> to vector<1x16xf32>
    %601 = arith.mulf %590, %600 : vector<1x16xf32>
    %602 = arith.addf %599, %601 : vector<1x16xf32>
    %603 = math.tanh %602 : vector<1x16xf32>
    %cst_112 = arith.constant 1.000000e+00 : f32
    %604 = vector.broadcast %cst_112 : f32 to vector<1x16xf32>
    %605 = arith.subf %604, %598 : vector<1x16xf32>
    %606 = arith.mulf %605, %603 : vector<1x16xf32>
    %607 = arith.mulf %598, %582 : vector<1x16xf32>
    %608 = arith.addf %606, %607 : vector<1x16xf32>
    %609 = tpu.concatenate %579, %608 in 0 : vector<1x16xf32>, vector<1x16xf32> -> vector<2x16xf32>
    %c0_113 = arith.constant 0 : index
    %c0_114 = arith.constant 0 : index
    %610 = vector.load %arg12[%c0_113, %c0_114] : memref<3x32xf32, #tpu.memory_space<vmem>>, vector<1x16xf32>
    tpu.vector_store %arg12[%c0_113, %c0_114], %579 {strides = array<i32>} : memref<3x32xf32, #tpu.memory_space<vmem>>, vector<1x16xf32>,
    %c2_115 = arith.constant 2 : index
    %c16_116 = arith.constant 16 : index
    %611 = vector.load %arg12[%c2_115, %c16_116] : memref<3x32xf32, #tpu.memory_space<vmem>>, vector<1x16xf32>
    tpu.vector_store %arg12[%c2_115, %c16_116], %608 {strides = array<i32>} : memref<3x32xf32, #tpu.memory_space<vmem>>, vector<1x16xf32>,
    %cst_117 = arith.constant dense<0.000000e+00> : vector<2x96xf32>
    %612 = tpu.matmul %609, %541, %cst_117 {dimension_numbers = #tpu.dot_dimension_numbers<[1], [0], [0], [1], [0, 0, 1, 1], [], []>} : vector<2x16xf32>, vector<16x96xf32>, vector<2x96xf32> -> vector<2x96xf32>
    %613 = vector.broadcast %546 : vector<1x96xf32> to vector<2x96xf32>
    %614 = arith.addf %612, %613 : vector<2x96xf32>
    %615 = vector.extract_strided_slice %545 {offsets = [1, 0], sizes = [1, 48], strides = [1, 1]} : vector<3x96xf32> to vector<1x48xf32>
    %616 = vector.extract_strided_slice %614 {offsets = [0, 0], sizes = [1, 48], strides = [1, 1]} : vector<2x96xf32> to vector<1x48xf32>
    %617 = vector.extract_strided_slice %609 {offsets = [0, 0], sizes = [1, 16], strides = [1, 1]} : vector<2x16xf32> to vector<1x16xf32>
    %618 = vector.extract_strided_slice %615 {offsets = [0, 0], sizes = [1, 16], strides = [1, 1]} : vector<1x48xf32> to vector<1x16xf32>
    %619 = vector.extract_strided_slice %616 {offsets = [0, 0], sizes = [1, 16], strides = [1, 1]} : vector<1x48xf32> to vector<1x16xf32>
    %620 = arith.addf %618, %619 : vector<1x16xf32>
    %621 = arith.negf %620 : vector<1x16xf32>
    %622 = math.exp %621 : vector<1x16xf32>
    %cst_118 = arith.constant 1.000000e+00 : f32
    %623 = vector.broadcast %cst_118 : f32 to vector<1x16xf32>
    %624 = arith.addf %623, %622 : vector<1x16xf32>
    %625 = arith.divf %623, %624 : vector<1x16xf32>
    %626 = vector.extract_strided_slice %615 {offsets = [0, 16], sizes = [1, 16], strides = [1, 1]} : vector<1x48xf32> to vector<1x16xf32>
    %627 = vector.extract_strided_slice %616 {offsets = [0, 16], sizes = [1, 16], strides = [1, 1]} : vector<1x48xf32> to vector<1x16xf32>
    %628 = arith.addf %626, %627 : vector<1x16xf32>
    %629 = arith.negf %628 : vector<1x16xf32>
    %630 = math.exp %629 : vector<1x16xf32>
    %cst_119 = arith.constant 1.000000e+00 : f32
    %631 = vector.broadcast %cst_119 : f32 to vector<1x16xf32>
    %632 = arith.addf %631, %630 : vector<1x16xf32>
    %633 = arith.divf %631, %632 : vector<1x16xf32>
    %634 = vector.extract_strided_slice %615 {offsets = [0, 32], sizes = [1, 16], strides = [1, 1]} : vector<1x48xf32> to vector<1x16xf32>
    %635 = vector.extract_strided_slice %616 {offsets = [0, 32], sizes = [1, 16], strides = [1, 1]} : vector<1x48xf32> to vector<1x16xf32>
    %636 = arith.mulf %625, %635 : vector<1x16xf32>
    %637 = arith.addf %634, %636 : vector<1x16xf32>
    %638 = math.tanh %637 : vector<1x16xf32>
    %cst_120 = arith.constant 1.000000e+00 : f32
    %639 = vector.broadcast %cst_120 : f32 to vector<1x16xf32>
    %640 = arith.subf %639, %633 : vector<1x16xf32>
    %641 = arith.mulf %640, %638 : vector<1x16xf32>
    %642 = arith.mulf %633, %617 : vector<1x16xf32>
    %643 = arith.addf %641, %642 : vector<1x16xf32>
    %644 = vector.extract_strided_slice %545 {offsets = [1, 48], sizes = [1, 48], strides = [1, 1]} : vector<3x96xf32> to vector<1x48xf32>
    %645 = vector.extract_strided_slice %614 {offsets = [1, 48], sizes = [1, 48], strides = [1, 1]} : vector<2x96xf32> to vector<1x48xf32>
    %646 = vector.extract_strided_slice %609 {offsets = [1, 0], sizes = [1, 16], strides = [1, 1]} : vector<2x16xf32> to vector<1x16xf32>
    %647 = vector.extract_strided_slice %644 {offsets = [0, 0], sizes = [1, 16], strides = [1, 1]} : vector<1x48xf32> to vector<1x16xf32>
    %648 = vector.extract_strided_slice %645 {offsets = [0, 0], sizes = [1, 16], strides = [1, 1]} : vector<1x48xf32> to vector<1x16xf32>
    %649 = arith.addf %647, %648 : vector<1x16xf32>
    %650 = arith.negf %649 : vector<1x16xf32>
    %651 = math.exp %650 : vector<1x16xf32>
    %cst_121 = arith.constant 1.000000e+00 : f32
    %652 = vector.broadcast %cst_121 : f32 to vector<1x16xf32>
    %653 = arith.addf %652, %651 : vector<1x16xf32>
    %654 = arith.divf %652, %653 : vector<1x16xf32>
    %655 = vector.extract_strided_slice %644 {offsets = [0, 16], sizes = [1, 16], strides = [1, 1]} : vector<1x48xf32> to vector<1x16xf32>
    %656 = vector.extract_strided_slice %645 {offsets = [0, 16], sizes = [1, 16], strides = [1, 1]} : vector<1x48xf32> to vector<1x16xf32>
    %657 = arith.addf %655, %656 : vector<1x16xf32>
    %658 = arith.negf %657 : vector<1x16xf32>
    %659 = math.exp %658 : vector<1x16xf32>
    %cst_122 = arith.constant 1.000000e+00 : f32
    %660 = vector.broadcast %cst_122 : f32 to vector<1x16xf32>
    %661 = arith.addf %660, %659 : vector<1x16xf32>
    %662 = arith.divf %660, %661 : vector<1x16xf32>
    %663 = vector.extract_strided_slice %644 {offsets = [0, 32], sizes = [1, 16], strides = [1, 1]} : vector<1x48xf32> to vector<1x16xf32>
    %664 = vector.extract_strided_slice %645 {offsets = [0, 32], sizes = [1, 16], strides = [1, 1]} : vector<1x48xf32> to vector<1x16xf32>
    %665 = arith.mulf %654, %664 : vector<1x16xf32>
    %666 = arith.addf %663, %665 : vector<1x16xf32>
    %667 = math.tanh %666 : vector<1x16xf32>
    %cst_123 = arith.constant 1.000000e+00 : f32
    %668 = vector.broadcast %cst_123 : f32 to vector<1x16xf32>
    %669 = arith.subf %668, %662 : vector<1x16xf32>
    %670 = arith.mulf %669, %667 : vector<1x16xf32>
    %671 = arith.mulf %662, %646 : vector<1x16xf32>
    %672 = arith.addf %670, %671 : vector<1x16xf32>
    %673 = tpu.concatenate %643, %672 in 0 : vector<1x16xf32>, vector<1x16xf32> -> vector<2x16xf32>
    %c1_124 = arith.constant 1 : index
    %c0_125 = arith.constant 0 : index
    %674 = vector.load %arg12[%c1_124, %c0_125] : memref<3x32xf32, #tpu.memory_space<vmem>>, vector<1x16xf32>
    tpu.vector_store %arg12[%c1_124, %c0_125], %643 {strides = array<i32>} : memref<3x32xf32, #tpu.memory_space<vmem>>, vector<1x16xf32>,
    %c1_126 = arith.constant 1 : index
    %c16_127 = arith.constant 16 : index
    %675 = vector.load %arg12[%c1_126, %c16_127] : memref<3x32xf32, #tpu.memory_space<vmem>>, vector<1x16xf32>
    tpu.vector_store %arg12[%c1_126, %c16_127], %672 {strides = array<i32>} : memref<3x32xf32, #tpu.memory_space<vmem>>, vector<1x16xf32>,
    %cst_128 = arith.constant dense<0.000000e+00> : vector<2x96xf32>
    %676 = tpu.matmul %673, %541, %cst_128 {dimension_numbers = #tpu.dot_dimension_numbers<[1], [0], [0], [1], [0, 0, 1, 1], [], []>} : vector<2x16xf32>, vector<16x96xf32>, vector<2x96xf32> -> vector<2x96xf32>
    %677 = vector.broadcast %546 : vector<1x96xf32> to vector<2x96xf32>
    %678 = arith.addf %676, %677 : vector<2x96xf32>
    %679 = vector.extract_strided_slice %545 {offsets = [2, 0], sizes = [1, 48], strides = [1, 1]} : vector<3x96xf32> to vector<1x48xf32>
    %680 = vector.extract_strided_slice %678 {offsets = [0, 0], sizes = [1, 48], strides = [1, 1]} : vector<2x96xf32> to vector<1x48xf32>
    %681 = vector.extract_strided_slice %673 {offsets = [0, 0], sizes = [1, 16], strides = [1, 1]} : vector<2x16xf32> to vector<1x16xf32>
    %682 = vector.extract_strided_slice %679 {offsets = [0, 0], sizes = [1, 16], strides = [1, 1]} : vector<1x48xf32> to vector<1x16xf32>
    %683 = vector.extract_strided_slice %680 {offsets = [0, 0], sizes = [1, 16], strides = [1, 1]} : vector<1x48xf32> to vector<1x16xf32>
    %684 = arith.addf %682, %683 : vector<1x16xf32>
    %685 = arith.negf %684 : vector<1x16xf32>
    %686 = math.exp %685 : vector<1x16xf32>
    %cst_129 = arith.constant 1.000000e+00 : f32
    %687 = vector.broadcast %cst_129 : f32 to vector<1x16xf32>
    %688 = arith.addf %687, %686 : vector<1x16xf32>
    %689 = arith.divf %687, %688 : vector<1x16xf32>
    %690 = vector.extract_strided_slice %679 {offsets = [0, 16], sizes = [1, 16], strides = [1, 1]} : vector<1x48xf32> to vector<1x16xf32>
    %691 = vector.extract_strided_slice %680 {offsets = [0, 16], sizes = [1, 16], strides = [1, 1]} : vector<1x48xf32> to vector<1x16xf32>
    %692 = arith.addf %690, %691 : vector<1x16xf32>
    %693 = arith.negf %692 : vector<1x16xf32>
    %694 = math.exp %693 : vector<1x16xf32>
    %cst_130 = arith.constant 1.000000e+00 : f32
    %695 = vector.broadcast %cst_130 : f32 to vector<1x16xf32>
    %696 = arith.addf %695, %694 : vector<1x16xf32>
    %697 = arith.divf %695, %696 : vector<1x16xf32>
    %698 = vector.extract_strided_slice %679 {offsets = [0, 32], sizes = [1, 16], strides = [1, 1]} : vector<1x48xf32> to vector<1x16xf32>
    %699 = vector.extract_strided_slice %680 {offsets = [0, 32], sizes = [1, 16], strides = [1, 1]} : vector<1x48xf32> to vector<1x16xf32>
    %700 = arith.mulf %689, %699 : vector<1x16xf32>
    %701 = arith.addf %698, %700 : vector<1x16xf32>
    %702 = math.tanh %701 : vector<1x16xf32>
    %cst_131 = arith.constant 1.000000e+00 : f32
    %703 = vector.broadcast %cst_131 : f32 to vector<1x16xf32>
    %704 = arith.subf %703, %697 : vector<1x16xf32>
    %705 = arith.mulf %704, %702 : vector<1x16xf32>
    %706 = arith.mulf %697, %681 : vector<1x16xf32>
    %707 = arith.addf %705, %706 : vector<1x16xf32>
    %708 = vector.extract_strided_slice %545 {offsets = [0, 48], sizes = [1, 48], strides = [1, 1]} : vector<3x96xf32> to vector<1x48xf32>
    %709 = vector.extract_strided_slice %678 {offsets = [1, 48], sizes = [1, 48], strides = [1, 1]} : vector<2x96xf32> to vector<1x48xf32>
    %710 = vector.extract_strided_slice %673 {offsets = [1, 0], sizes = [1, 16], strides = [1, 1]} : vector<2x16xf32> to vector<1x16xf32>
    %711 = vector.extract_strided_slice %708 {offsets = [0, 0], sizes = [1, 16], strides = [1, 1]} : vector<1x48xf32> to vector<1x16xf32>
    %712 = vector.extract_strided_slice %709 {offsets = [0, 0], sizes = [1, 16], strides = [1, 1]} : vector<1x48xf32> to vector<1x16xf32>
    %713 = arith.addf %711, %712 : vector<1x16xf32>
    %714 = arith.negf %713 : vector<1x16xf32>
    %715 = math.exp %714 : vector<1x16xf32>
    %cst_132 = arith.constant 1.000000e+00 : f32
    %716 = vector.broadcast %cst_132 : f32 to vector<1x16xf32>
    %717 = arith.addf %716, %715 : vector<1x16xf32>
    %718 = arith.divf %716, %717 : vector<1x16xf32>
    %719 = vector.extract_strided_slice %708 {offsets = [0, 16], sizes = [1, 16], strides = [1, 1]} : vector<1x48xf32> to vector<1x16xf32>
    %720 = vector.extract_strided_slice %709 {offsets = [0, 16], sizes = [1, 16], strides = [1, 1]} : vector<1x48xf32> to vector<1x16xf32>
    %721 = arith.addf %719, %720 : vector<1x16xf32>
    %722 = arith.negf %721 : vector<1x16xf32>
    %723 = math.exp %722 : vector<1x16xf32>
    %cst_133 = arith.constant 1.000000e+00 : f32
    %724 = vector.broadcast %cst_133 : f32 to vector<1x16xf32>
    %725 = arith.addf %724, %723 : vector<1x16xf32>
    %726 = arith.divf %724, %725 : vector<1x16xf32>
    %727 = vector.extract_strided_slice %708 {offsets = [0, 32], sizes = [1, 16], strides = [1, 1]} : vector<1x48xf32> to vector<1x16xf32>
    %728 = vector.extract_strided_slice %709 {offsets = [0, 32], sizes = [1, 16], strides = [1, 1]} : vector<1x48xf32> to vector<1x16xf32>
    %729 = arith.mulf %718, %728 : vector<1x16xf32>
    %730 = arith.addf %727, %729 : vector<1x16xf32>
    %731 = math.tanh %730 : vector<1x16xf32>
    %cst_134 = arith.constant 1.000000e+00 : f32
    %732 = vector.broadcast %cst_134 : f32 to vector<1x16xf32>
    %733 = arith.subf %732, %726 : vector<1x16xf32>
    %734 = arith.mulf %733, %731 : vector<1x16xf32>
    %735 = arith.mulf %726, %710 : vector<1x16xf32>
    %736 = arith.addf %734, %735 : vector<1x16xf32>
    %c2_135 = arith.constant 2 : index
    %c0_136 = arith.constant 0 : index
    %737 = vector.load %arg12[%c2_135, %c0_136] : memref<3x32xf32, #tpu.memory_space<vmem>>, vector<1x16xf32>
    tpu.vector_store %arg12[%c2_135, %c0_136], %707 {strides = array<i32>} : memref<3x32xf32, #tpu.memory_space<vmem>>, vector<1x16xf32>,
    %c0_137 = arith.constant 0 : index
    %c16_138 = arith.constant 16 : index
    %738 = vector.load %arg12[%c0_137, %c16_138] : memref<3x32xf32, #tpu.memory_space<vmem>>, vector<1x16xf32>
    tpu.vector_store %arg12[%c0_137, %c16_138], %736 {strides = array<i32>} : memref<3x32xf32, #tpu.memory_space<vmem>>, vector<1x16xf32>,
    %c80 = arith.constant 80 : index
    %c0_139 = arith.constant 0 : index
    %739 = vector.load %arg3[%c80, %c0_139] : memref<128x96xf32, #tpu.memory_space<vmem>>, vector<16x96xf32>
    %c96 = arith.constant 96 : index
    %c0_140 = arith.constant 0 : index
    %740 = vector.load %arg3[%c96, %c0_140] : memref<128x96xf32, #tpu.memory_space<vmem>>, vector<32x96xf32>
    %cst_141 = arith.constant dense<0.000000e+00> : vector<6x96xf32>
    %741 = tpu.matmul %16, %739, %cst_141 {dimension_numbers = #tpu.dot_dimension_numbers<[1], [0], [0], [1], [0, 0, 1, 1], [], []>} : vector<6x16xf32>, vector<16x96xf32>, vector<6x96xf32> -> vector<6x96xf32>
    %c4 = arith.constant 4 : index
    %c0_142 = arith.constant 0 : index
    %742 = vector.load %arg5[%c4, %c0_142] : memref<14x96xf32, #tpu.memory_space<vmem>>, vector<1x96xf32>
    %743 = vector.broadcast %742 : vector<1x96xf32> to vector<6x96xf32>
    %744 = arith.addf %741, %743 : vector<6x96xf32>
    %c5 = arith.constant 5 : index
    %c0_143 = arith.constant 0 : index
    %745 = vector.load %arg5[%c5, %c0_143] : memref<14x96xf32, #tpu.memory_space<vmem>>, vector<1x96xf32>
    %c1_144 = arith.constant 1 : index
    %c0_145 = arith.constant 0 : index
    %746 = vector.load %arg12[%c1_144, %c0_145] : memref<3x32xf32, #tpu.memory_space<vmem>>, vector<1x32xf32>
    %cst_146 = arith.constant dense<0.000000e+00> : vector<1x96xf32>
    %747 = tpu.matmul %746, %740, %cst_146 {dimension_numbers = #tpu.dot_dimension_numbers<[1], [0], [0], [1], [0, 0, 1, 1], [], []>} : vector<1x32xf32>, vector<32x96xf32>, vector<1x96xf32> -> vector<1x96xf32>
    %748 = arith.addf %747, %745 : vector<1x96xf32>
    %749 = vector.extract_strided_slice %744 {offsets = [0, 0], sizes = [1, 96], strides = [1, 1]} : vector<6x96xf32> to vector<1x96xf32>
    %750 = vector.extract_strided_slice %749 {offsets = [0, 0], sizes = [1, 32], strides = [1, 1]} : vector<1x96xf32> to vector<1x32xf32>
    %751 = vector.extract_strided_slice %748 {offsets = [0, 0], sizes = [1, 32], strides = [1, 1]} : vector<1x96xf32> to vector<1x32xf32>
    %752 = arith.addf %750, %751 : vector<1x32xf32>
    %753 = arith.negf %752 : vector<1x32xf32>
    %754 = math.exp %753 : vector<1x32xf32>
    %cst_147 = arith.constant 1.000000e+00 : f32
    %755 = vector.broadcast %cst_147 : f32 to vector<1x32xf32>
    %756 = arith.addf %755, %754 : vector<1x32xf32>
    %757 = arith.divf %755, %756 : vector<1x32xf32>
    %758 = vector.extract_strided_slice %749 {offsets = [0, 32], sizes = [1, 32], strides = [1, 1]} : vector<1x96xf32> to vector<1x32xf32>
    %759 = vector.extract_strided_slice %748 {offsets = [0, 32], sizes = [1, 32], strides = [1, 1]} : vector<1x96xf32> to vector<1x32xf32>
    %760 = arith.addf %758, %759 : vector<1x32xf32>
    %761 = arith.negf %760 : vector<1x32xf32>
    %762 = math.exp %761 : vector<1x32xf32>
    %cst_148 = arith.constant 1.000000e+00 : f32
    %763 = vector.broadcast %cst_148 : f32 to vector<1x32xf32>
    %764 = arith.addf %763, %762 : vector<1x32xf32>
    %765 = arith.divf %763, %764 : vector<1x32xf32>
    %766 = vector.extract_strided_slice %749 {offsets = [0, 64], sizes = [1, 32], strides = [1, 1]} : vector<1x96xf32> to vector<1x32xf32>
    %767 = vector.extract_strided_slice %748 {offsets = [0, 64], sizes = [1, 32], strides = [1, 1]} : vector<1x96xf32> to vector<1x32xf32>
    %768 = arith.mulf %757, %767 : vector<1x32xf32>
    %769 = arith.addf %766, %768 : vector<1x32xf32>
    %770 = math.tanh %769 : vector<1x32xf32>
    %cst_149 = arith.constant 1.000000e+00 : f32
    %771 = vector.broadcast %cst_149 : f32 to vector<1x32xf32>
    %772 = arith.subf %771, %765 : vector<1x32xf32>
    %773 = arith.mulf %772, %770 : vector<1x32xf32>
    %774 = arith.mulf %765, %746 : vector<1x32xf32>
    %775 = arith.addf %773, %774 : vector<1x32xf32>
    %c0_150 = arith.constant 0 : index
    %c0_151 = arith.constant 0 : index
    %776 = vector.load %arg14[%c0_150, %c0_151] : memref<6x32xf32, #tpu.memory_space<vmem>>, vector<1x32xf32>
    tpu.vector_store %arg14[%c0_150, %c0_151], %775 {strides = array<i32>} : memref<6x32xf32, #tpu.memory_space<vmem>>, vector<1x32xf32>,
    %cst_152 = arith.constant dense<0.000000e+00> : vector<1x96xf32>
    %777 = tpu.matmul %775, %740, %cst_152 {dimension_numbers = #tpu.dot_dimension_numbers<[1], [0], [0], [1], [0, 0, 1, 1], [], []>} : vector<1x32xf32>, vector<32x96xf32>, vector<1x96xf32> -> vector<1x96xf32>
    %778 = arith.addf %777, %745 : vector<1x96xf32>
    %779 = vector.extract_strided_slice %744 {offsets = [1, 0], sizes = [1, 96], strides = [1, 1]} : vector<6x96xf32> to vector<1x96xf32>
    %780 = vector.extract_strided_slice %779 {offsets = [0, 0], sizes = [1, 32], strides = [1, 1]} : vector<1x96xf32> to vector<1x32xf32>
    %781 = vector.extract_strided_slice %778 {offsets = [0, 0], sizes = [1, 32], strides = [1, 1]} : vector<1x96xf32> to vector<1x32xf32>
    %782 = arith.addf %780, %781 : vector<1x32xf32>
    %783 = arith.negf %782 : vector<1x32xf32>
    %784 = math.exp %783 : vector<1x32xf32>
    %cst_153 = arith.constant 1.000000e+00 : f32
    %785 = vector.broadcast %cst_153 : f32 to vector<1x32xf32>
    %786 = arith.addf %785, %784 : vector<1x32xf32>
    %787 = arith.divf %785, %786 : vector<1x32xf32>
    %788 = vector.extract_strided_slice %779 {offsets = [0, 32], sizes = [1, 32], strides = [1, 1]} : vector<1x96xf32> to vector<1x32xf32>
    %789 = vector.extract_strided_slice %778 {offsets = [0, 32], sizes = [1, 32], strides = [1, 1]} : vector<1x96xf32> to vector<1x32xf32>
    %790 = arith.addf %788, %789 : vector<1x32xf32>
    %791 = arith.negf %790 : vector<1x32xf32>
    %792 = math.exp %791 : vector<1x32xf32>
    %cst_154 = arith.constant 1.000000e+00 : f32
    %793 = vector.broadcast %cst_154 : f32 to vector<1x32xf32>
    %794 = arith.addf %793, %792 : vector<1x32xf32>
    %795 = arith.divf %793, %794 : vector<1x32xf32>
    %796 = vector.extract_strided_slice %779 {offsets = [0, 64], sizes = [1, 32], strides = [1, 1]} : vector<1x96xf32> to vector<1x32xf32>
    %797 = vector.extract_strided_slice %778 {offsets = [0, 64], sizes = [1, 32], strides = [1, 1]} : vector<1x96xf32> to vector<1x32xf32>
    %798 = arith.mulf %787, %797 : vector<1x32xf32>
    %799 = arith.addf %796, %798 : vector<1x32xf32>
    %800 = math.tanh %799 : vector<1x32xf32>
    %cst_155 = arith.constant 1.000000e+00 : f32
    %801 = vector.broadcast %cst_155 : f32 to vector<1x32xf32>
    %802 = arith.subf %801, %795 : vector<1x32xf32>
    %803 = arith.mulf %802, %800 : vector<1x32xf32>
    %804 = arith.mulf %795, %775 : vector<1x32xf32>
    %805 = arith.addf %803, %804 : vector<1x32xf32>
    %c1_156 = arith.constant 1 : index
    %c0_157 = arith.constant 0 : index
    %806 = vector.load %arg14[%c1_156, %c0_157] : memref<6x32xf32, #tpu.memory_space<vmem>>, vector<1x32xf32>
    tpu.vector_store %arg14[%c1_156, %c0_157], %805 {strides = array<i32>} : memref<6x32xf32, #tpu.memory_space<vmem>>, vector<1x32xf32>,
    %cst_158 = arith.constant dense<0.000000e+00> : vector<1x96xf32>
    %807 = tpu.matmul %805, %740, %cst_158 {dimension_numbers = #tpu.dot_dimension_numbers<[1], [0], [0], [1], [0, 0, 1, 1], [], []>} : vector<1x32xf32>, vector<32x96xf32>, vector<1x96xf32> -> vector<1x96xf32>
    %808 = arith.addf %807, %745 : vector<1x96xf32>
    %809 = vector.extract_strided_slice %744 {offsets = [2, 0], sizes = [1, 96], strides = [1, 1]} : vector<6x96xf32> to vector<1x96xf32>
    %810 = vector.extract_strided_slice %809 {offsets = [0, 0], sizes = [1, 32], strides = [1, 1]} : vector<1x96xf32> to vector<1x32xf32>
    %811 = vector.extract_strided_slice %808 {offsets = [0, 0], sizes = [1, 32], strides = [1, 1]} : vector<1x96xf32> to vector<1x32xf32>
    %812 = arith.addf %810, %811 : vector<1x32xf32>
    %813 = arith.negf %812 : vector<1x32xf32>
    %814 = math.exp %813 : vector<1x32xf32>
    %cst_159 = arith.constant 1.000000e+00 : f32
    %815 = vector.broadcast %cst_159 : f32 to vector<1x32xf32>
    %816 = arith.addf %815, %814 : vector<1x32xf32>
    %817 = arith.divf %815, %816 : vector<1x32xf32>
    %818 = vector.extract_strided_slice %809 {offsets = [0, 32], sizes = [1, 32], strides = [1, 1]} : vector<1x96xf32> to vector<1x32xf32>
    %819 = vector.extract_strided_slice %808 {offsets = [0, 32], sizes = [1, 32], strides = [1, 1]} : vector<1x96xf32> to vector<1x32xf32>
    %820 = arith.addf %818, %819 : vector<1x32xf32>
    %821 = arith.negf %820 : vector<1x32xf32>
    %822 = math.exp %821 : vector<1x32xf32>
    %cst_160 = arith.constant 1.000000e+00 : f32
    %823 = vector.broadcast %cst_160 : f32 to vector<1x32xf32>
    %824 = arith.addf %823, %822 : vector<1x32xf32>
    %825 = arith.divf %823, %824 : vector<1x32xf32>
    %826 = vector.extract_strided_slice %809 {offsets = [0, 64], sizes = [1, 32], strides = [1, 1]} : vector<1x96xf32> to vector<1x32xf32>
    %827 = vector.extract_strided_slice %808 {offsets = [0, 64], sizes = [1, 32], strides = [1, 1]} : vector<1x96xf32> to vector<1x32xf32>
    %828 = arith.mulf %817, %827 : vector<1x32xf32>
    %829 = arith.addf %826, %828 : vector<1x32xf32>
    %830 = math.tanh %829 : vector<1x32xf32>
    %cst_161 = arith.constant 1.000000e+00 : f32
    %831 = vector.broadcast %cst_161 : f32 to vector<1x32xf32>
    %832 = arith.subf %831, %825 : vector<1x32xf32>
    %833 = arith.mulf %832, %830 : vector<1x32xf32>
    %834 = arith.mulf %825, %805 : vector<1x32xf32>
    %835 = arith.addf %833, %834 : vector<1x32xf32>
    %c2_162 = arith.constant 2 : index
    %c0_163 = arith.constant 0 : index
    %836 = vector.load %arg14[%c2_162, %c0_163] : memref<6x32xf32, #tpu.memory_space<vmem>>, vector<1x32xf32>
    tpu.vector_store %arg14[%c2_162, %c0_163], %835 {strides = array<i32>} : memref<6x32xf32, #tpu.memory_space<vmem>>, vector<1x32xf32>,
    %cst_164 = arith.constant dense<0.000000e+00> : vector<1x96xf32>
    %837 = tpu.matmul %835, %740, %cst_164 {dimension_numbers = #tpu.dot_dimension_numbers<[1], [0], [0], [1], [0, 0, 1, 1], [], []>} : vector<1x32xf32>, vector<32x96xf32>, vector<1x96xf32> -> vector<1x96xf32>
    %838 = arith.addf %837, %745 : vector<1x96xf32>
    %839 = vector.extract_strided_slice %744 {offsets = [3, 0], sizes = [1, 96], strides = [1, 1]} : vector<6x96xf32> to vector<1x96xf32>
    %840 = vector.extract_strided_slice %839 {offsets = [0, 0], sizes = [1, 32], strides = [1, 1]} : vector<1x96xf32> to vector<1x32xf32>
    %841 = vector.extract_strided_slice %838 {offsets = [0, 0], sizes = [1, 32], strides = [1, 1]} : vector<1x96xf32> to vector<1x32xf32>
    %842 = arith.addf %840, %841 : vector<1x32xf32>
    %843 = arith.negf %842 : vector<1x32xf32>
    %844 = math.exp %843 : vector<1x32xf32>
    %cst_165 = arith.constant 1.000000e+00 : f32
    %845 = vector.broadcast %cst_165 : f32 to vector<1x32xf32>
    %846 = arith.addf %845, %844 : vector<1x32xf32>
    %847 = arith.divf %845, %846 : vector<1x32xf32>
    %848 = vector.extract_strided_slice %839 {offsets = [0, 32], sizes = [1, 32], strides = [1, 1]} : vector<1x96xf32> to vector<1x32xf32>
    %849 = vector.extract_strided_slice %838 {offsets = [0, 32], sizes = [1, 32], strides = [1, 1]} : vector<1x96xf32> to vector<1x32xf32>
    %850 = arith.addf %848, %849 : vector<1x32xf32>
    %851 = arith.negf %850 : vector<1x32xf32>
    %852 = math.exp %851 : vector<1x32xf32>
    %cst_166 = arith.constant 1.000000e+00 : f32
    %853 = vector.broadcast %cst_166 : f32 to vector<1x32xf32>
    %854 = arith.addf %853, %852 : vector<1x32xf32>
    %855 = arith.divf %853, %854 : vector<1x32xf32>
    %856 = vector.extract_strided_slice %839 {offsets = [0, 64], sizes = [1, 32], strides = [1, 1]} : vector<1x96xf32> to vector<1x32xf32>
    %857 = vector.extract_strided_slice %838 {offsets = [0, 64], sizes = [1, 32], strides = [1, 1]} : vector<1x96xf32> to vector<1x32xf32>
    %858 = arith.mulf %847, %857 : vector<1x32xf32>
    %859 = arith.addf %856, %858 : vector<1x32xf32>
    %860 = math.tanh %859 : vector<1x32xf32>
    %cst_167 = arith.constant 1.000000e+00 : f32
    %861 = vector.broadcast %cst_167 : f32 to vector<1x32xf32>
    %862 = arith.subf %861, %855 : vector<1x32xf32>
    %863 = arith.mulf %862, %860 : vector<1x32xf32>
    %864 = arith.mulf %855, %835 : vector<1x32xf32>
    %865 = arith.addf %863, %864 : vector<1x32xf32>
    %c3_168 = arith.constant 3 : index
    %c0_169 = arith.constant 0 : index
    %866 = vector.load %arg14[%c3_168, %c0_169] : memref<6x32xf32, #tpu.memory_space<vmem>>, vector<1x32xf32>
    tpu.vector_store %arg14[%c3_168, %c0_169], %865 {strides = array<i32>} : memref<6x32xf32, #tpu.memory_space<vmem>>, vector<1x32xf32>,
    %cst_170 = arith.constant dense<0.000000e+00> : vector<1x96xf32>
    %867 = tpu.matmul %865, %740, %cst_170 {dimension_numbers = #tpu.dot_dimension_numbers<[1], [0], [0], [1], [0, 0, 1, 1], [], []>} : vector<1x32xf32>, vector<32x96xf32>, vector<1x96xf32> -> vector<1x96xf32>
    %868 = arith.addf %867, %745 : vector<1x96xf32>
    %869 = vector.extract_strided_slice %744 {offsets = [4, 0], sizes = [1, 96], strides = [1, 1]} : vector<6x96xf32> to vector<1x96xf32>
    %870 = vector.extract_strided_slice %869 {offsets = [0, 0], sizes = [1, 32], strides = [1, 1]} : vector<1x96xf32> to vector<1x32xf32>
    %871 = vector.extract_strided_slice %868 {offsets = [0, 0], sizes = [1, 32], strides = [1, 1]} : vector<1x96xf32> to vector<1x32xf32>
    %872 = arith.addf %870, %871 : vector<1x32xf32>
    %873 = arith.negf %872 : vector<1x32xf32>
    %874 = math.exp %873 : vector<1x32xf32>
    %cst_171 = arith.constant 1.000000e+00 : f32
    %875 = vector.broadcast %cst_171 : f32 to vector<1x32xf32>
    %876 = arith.addf %875, %874 : vector<1x32xf32>
    %877 = arith.divf %875, %876 : vector<1x32xf32>
    %878 = vector.extract_strided_slice %869 {offsets = [0, 32], sizes = [1, 32], strides = [1, 1]} : vector<1x96xf32> to vector<1x32xf32>
    %879 = vector.extract_strided_slice %868 {offsets = [0, 32], sizes = [1, 32], strides = [1, 1]} : vector<1x96xf32> to vector<1x32xf32>
    %880 = arith.addf %878, %879 : vector<1x32xf32>
    %881 = arith.negf %880 : vector<1x32xf32>
    %882 = math.exp %881 : vector<1x32xf32>
    %cst_172 = arith.constant 1.000000e+00 : f32
    %883 = vector.broadcast %cst_172 : f32 to vector<1x32xf32>
    %884 = arith.addf %883, %882 : vector<1x32xf32>
    %885 = arith.divf %883, %884 : vector<1x32xf32>
    %886 = vector.extract_strided_slice %869 {offsets = [0, 64], sizes = [1, 32], strides = [1, 1]} : vector<1x96xf32> to vector<1x32xf32>
    %887 = vector.extract_strided_slice %868 {offsets = [0, 64], sizes = [1, 32], strides = [1, 1]} : vector<1x96xf32> to vector<1x32xf32>
    %888 = arith.mulf %877, %887 : vector<1x32xf32>
    %889 = arith.addf %886, %888 : vector<1x32xf32>
    %890 = math.tanh %889 : vector<1x32xf32>
    %cst_173 = arith.constant 1.000000e+00 : f32
    %891 = vector.broadcast %cst_173 : f32 to vector<1x32xf32>
    %892 = arith.subf %891, %885 : vector<1x32xf32>
    %893 = arith.mulf %892, %890 : vector<1x32xf32>
    %894 = arith.mulf %885, %865 : vector<1x32xf32>
    %895 = arith.addf %893, %894 : vector<1x32xf32>
    %c4_174 = arith.constant 4 : index
    %c0_175 = arith.constant 0 : index
    %896 = vector.load %arg14[%c4_174, %c0_175] : memref<6x32xf32, #tpu.memory_space<vmem>>, vector<1x32xf32>
    tpu.vector_store %arg14[%c4_174, %c0_175], %895 {strides = array<i32>} : memref<6x32xf32, #tpu.memory_space<vmem>>, vector<1x32xf32>,
    %cst_176 = arith.constant dense<0.000000e+00> : vector<1x96xf32>
    %897 = tpu.matmul %895, %740, %cst_176 {dimension_numbers = #tpu.dot_dimension_numbers<[1], [0], [0], [1], [0, 0, 1, 1], [], []>} : vector<1x32xf32>, vector<32x96xf32>, vector<1x96xf32> -> vector<1x96xf32>
    %898 = arith.addf %897, %745 : vector<1x96xf32>
    %899 = vector.extract_strided_slice %744 {offsets = [5, 0], sizes = [1, 96], strides = [1, 1]} : vector<6x96xf32> to vector<1x96xf32>
    %900 = vector.extract_strided_slice %899 {offsets = [0, 0], sizes = [1, 32], strides = [1, 1]} : vector<1x96xf32> to vector<1x32xf32>
    %901 = vector.extract_strided_slice %898 {offsets = [0, 0], sizes = [1, 32], strides = [1, 1]} : vector<1x96xf32> to vector<1x32xf32>
    %902 = arith.addf %900, %901 : vector<1x32xf32>
    %903 = arith.negf %902 : vector<1x32xf32>
    %904 = math.exp %903 : vector<1x32xf32>
    %cst_177 = arith.constant 1.000000e+00 : f32
    %905 = vector.broadcast %cst_177 : f32 to vector<1x32xf32>
    %906 = arith.addf %905, %904 : vector<1x32xf32>
    %907 = arith.divf %905, %906 : vector<1x32xf32>
    %908 = vector.extract_strided_slice %899 {offsets = [0, 32], sizes = [1, 32], strides = [1, 1]} : vector<1x96xf32> to vector<1x32xf32>
    %909 = vector.extract_strided_slice %898 {offsets = [0, 32], sizes = [1, 32], strides = [1, 1]} : vector<1x96xf32> to vector<1x32xf32>
    %910 = arith.addf %908, %909 : vector<1x32xf32>
    %911 = arith.negf %910 : vector<1x32xf32>
    %912 = math.exp %911 : vector<1x32xf32>
    %cst_178 = arith.constant 1.000000e+00 : f32
    %913 = vector.broadcast %cst_178 : f32 to vector<1x32xf32>
    %914 = arith.addf %913, %912 : vector<1x32xf32>
    %915 = arith.divf %913, %914 : vector<1x32xf32>
    %916 = vector.extract_strided_slice %899 {offsets = [0, 64], sizes = [1, 32], strides = [1, 1]} : vector<1x96xf32> to vector<1x32xf32>
    %917 = vector.extract_strided_slice %898 {offsets = [0, 64], sizes = [1, 32], strides = [1, 1]} : vector<1x96xf32> to vector<1x32xf32>
    %918 = arith.mulf %907, %917 : vector<1x32xf32>
    %919 = arith.addf %916, %918 : vector<1x32xf32>
    %920 = math.tanh %919 : vector<1x32xf32>
    %cst_179 = arith.constant 1.000000e+00 : f32
    %921 = vector.broadcast %cst_179 : f32 to vector<1x32xf32>
    %922 = arith.subf %921, %915 : vector<1x32xf32>
    %923 = arith.mulf %922, %920 : vector<1x32xf32>
    %924 = arith.mulf %915, %895 : vector<1x32xf32>
    %925 = arith.addf %923, %924 : vector<1x32xf32>
    %c5_180 = arith.constant 5 : index
    %c0_181 = arith.constant 0 : index
    %926 = vector.load %arg14[%c5_180, %c0_181] : memref<6x32xf32, #tpu.memory_space<vmem>>, vector<1x32xf32>
    tpu.vector_store %arg14[%c5_180, %c0_181], %925 {strides = array<i32>} : memref<6x32xf32, #tpu.memory_space<vmem>>, vector<1x32xf32>,
    %c0_182 = arith.constant 0 : index
    %c0_183 = arith.constant 0 : index
    %927 = vector.load %arg14[%c0_182, %c0_183] : memref<6x32xf32, #tpu.memory_space<vmem>>, vector<6x32xf32>
    %c0_184 = arith.constant 0 : index
    %c0_185 = arith.constant 0 : index
    %928 = vector.load %arg12[%c0_184, %c0_185] : memref<3x32xf32, #tpu.memory_space<vmem>>, vector<3x32xf32>
    %c0_186 = arith.constant 0 : index
    %c0_187 = arith.constant 0 : index
    %929 = vector.load %arg13[%c0_186, %c0_187] : memref<24x32xf32, #tpu.memory_space<vmem>>, vector<24x32xf32>
    %c0_188 = arith.constant 0 : index
    %c0_189 = arith.constant 0 : index
    %930 = vector.load %arg4[%c0_188, %c0_189] : memref<32x128xf32, #tpu.memory_space<vmem>>, vector<32x32xf32>
    %c0_190 = arith.constant 0 : index
    %c32_191 = arith.constant 32 : index
    %931 = vector.load %arg4[%c0_190, %c32_191] : memref<32x128xf32, #tpu.memory_space<vmem>>, vector<32x32xf32>
    %c0_192 = arith.constant 0 : index
    %c64_193 = arith.constant 64 : index
    %932 = vector.load %arg4[%c0_192, %c64_193] : memref<32x128xf32, #tpu.memory_space<vmem>>, vector<32x32xf32>
    %c0_194 = arith.constant 0 : index
    %c96_195 = arith.constant 96 : index
    %933 = vector.load %arg4[%c0_194, %c96_195] : memref<32x128xf32, #tpu.memory_space<vmem>>, vector<32x32xf32>
    %c6_196 = arith.constant 6 : index
    %c0_197 = arith.constant 0 : index
    %934 = vector.load %arg5[%c6_196, %c0_197] : memref<14x96xf32, #tpu.memory_space<vmem>>, vector<1x32xf32>
    %c7_198 = arith.constant 7 : index
    %c0_199 = arith.constant 0 : index
    %935 = vector.load %arg5[%c7_198, %c0_199] : memref<14x96xf32, #tpu.memory_space<vmem>>, vector<1x32xf32>
    %c8 = arith.constant 8 : index
    %c0_200 = arith.constant 0 : index
    %936 = vector.load %arg5[%c8, %c0_200] : memref<14x96xf32, #tpu.memory_space<vmem>>, vector<1x32xf32>
    %c9_201 = arith.constant 9 : index
    %c0_202 = arith.constant 0 : index
    %937 = vector.load %arg5[%c9_201, %c0_202] : memref<14x96xf32, #tpu.memory_space<vmem>>, vector<1x16xf32>
    %c10 = arith.constant 10 : index
    %c0_203 = arith.constant 0 : index
    %938 = vector.load %arg5[%c10, %c0_203] : memref<14x96xf32, #tpu.memory_space<vmem>>, vector<1x32xf32>
    %c11_204 = arith.constant 11 : index
    %c0_205 = arith.constant 0 : index
    %939 = vector.load %arg5[%c11_204, %c0_205] : memref<14x96xf32, #tpu.memory_space<vmem>>, vector<1x1xf32>
    %c12_206 = arith.constant 12 : index
    %c0_207 = arith.constant 0 : index
    %940 = vector.load %arg5[%c12_206, %c0_207] : memref<14x96xf32, #tpu.memory_space<vmem>>, vector<1x32xf32>
    %c13 = arith.constant 13 : index
    %c0_208 = arith.constant 0 : index
    %941 = vector.load %arg5[%c13, %c0_208] : memref<14x96xf32, #tpu.memory_space<vmem>>, vector<1x3xf32>
    %cst_209 = arith.constant dense<0.000000e+00> : vector<3x32xf32>
    %942 = tpu.matmul %928, %930, %cst_209 {dimension_numbers = #tpu.dot_dimension_numbers<[1], [0], [0], [1], [0, 0, 1, 1], [], []>} : vector<3x32xf32>, vector<32x32xf32>, vector<3x32xf32> -> vector<3x32xf32>
    %943 = vector.broadcast %934 : vector<1x32xf32> to vector<3x32xf32>
    %944 = arith.addf %942, %943 : vector<3x32xf32>
    %cst_210 = arith.constant dense<0.000000e+00> : vector<24x32xf32>
    %945 = tpu.matmul %929, %931, %cst_210 {dimension_numbers = #tpu.dot_dimension_numbers<[1], [0], [0], [1], [0, 0, 1, 1], [], []>} : vector<24x32xf32>, vector<32x32xf32>, vector<24x32xf32> -> vector<24x32xf32>
    %946 = vector.broadcast %935 : vector<1x32xf32> to vector<24x32xf32>
    %947 = arith.addf %945, %946 : vector<24x32xf32>
    %cst_211 = arith.constant dense<0.000000e+00> : vector<6x3xf32>
    %948 = tpu.matmul %927, %944, %cst_211 {dimension_numbers = #tpu.dot_dimension_numbers<[1], [1], [0], [0], [0, 0, 1, 0], [], []>} : vector<6x32xf32>, vector<3x32xf32>, vector<6x3xf32> -> vector<6x3xf32>
    %cst_212 = arith.constant 5.000000e-01 : f32
    %949 = vector.broadcast %cst_212 : f32 to vector<1x3xf32>
    %950 = arith.cmpf ogt, %941, %949 : vector<1x3xf32>
    %cst_213 = arith.constant 0xFF800000 : f32
    %951 = vector.shape_cast %950 : vector<1x3xi1> to vector<1x3xi1>
    %952 = vector.broadcast %951 : vector<1x3xi1> to vector<6x3xi1>
    %953 = vector.broadcast %cst_213 : f32 to vector<6x3xf32>
    %954 = arith.select %952, %948, %953 : vector<6x3xi1>, vector<6x3xf32>
    %cst_214 = arith.constant dense<0xFF800000> : vector<6xf32>
    %955 = vector.multi_reduction <maximumf>, %954, %cst_214 [1] : vector<6x3xf32> to vector<6xf32>
    %956 = vector.shape_cast %955 : vector<6xf32> to vector<6x1xf32>
    %957 = vector.broadcast %956 : vector<6x1xf32> to vector<6x3xf32>
    %958 = arith.subf %954, %957 : vector<6x3xf32>
    %959 = math.exp %958 : vector<6x3xf32>
    %cst_215 = arith.constant dense<0.000000e+00> : vector<6xf32>
    %960 = vector.multi_reduction <add>, %959, %cst_215 [1] : vector<6x3xf32> to vector<6xf32>
    %961 = vector.shape_cast %960 : vector<6xf32> to vector<6x1xf32>
    %962 = vector.broadcast %961 : vector<6x1xf32> to vector<6x3xf32>
    %963 = arith.divf %959, %962 : vector<6x3xf32>
    %cst_216 = arith.constant dense<0.000000e+00> : vector<6x24xf32>
    %964 = tpu.matmul %927, %947, %cst_216 {dimension_numbers = #tpu.dot_dimension_numbers<[1], [1], [0], [0], [0, 0, 1, 0], [], []>} : vector<6x32xf32>, vector<24x32xf32>, vector<6x24xf32> -> vector<6x24xf32>
    %cst_217 = arith.constant dense<0xFF800000> : vector<6xf32>
    %965 = vector.multi_reduction <maximumf>, %964, %cst_217 [1] : vector<6x24xf32> to vector<6xf32>
    %966 = vector.shape_cast %965 : vector<6xf32> to vector<6x1xf32>
    %967 = vector.broadcast %966 : vector<6x1xf32> to vector<6x24xf32>
    %968 = arith.subf %964, %967 : vector<6x24xf32>
    %969 = math.exp %968 : vector<6x24xf32>
    %c0_218 = arith.constant 0 : index
    %c0_219 = arith.constant 0 : index
    %970 = vector.load %arg6[%c0_218, %c0_219] : memref<2x24xf32, #tpu.memory_space<vmem>>, vector<2x24xf32>
    %cst_220 = arith.constant dense<0.000000e+00> : vector<6x2xf32>
    %971 = tpu.matmul %969, %970, %cst_220 {dimension_numbers = #tpu.dot_dimension_numbers<[1], [1], [0], [0], [0, 0, 1, 0], [], []>} : vector<6x24xf32>, vector<2x24xf32>, vector<6x2xf32> -> vector<6x2xf32>
    %972 = vector.broadcast %937 : vector<1x16xf32> to vector<6x16xf32>
    %973 = arith.mulf %16, %972 : vector<6x16xf32>
    %cst_221 = arith.constant dense<0.000000e+00> : vector<6xf32>
    %974 = vector.multi_reduction <add>, %973, %cst_221 [1] : vector<6x16xf32> to vector<6xf32>
    %975 = vector.shape_cast %974 : vector<6xf32> to vector<6x1xf32>
    %976 = vector.broadcast %938 : vector<1x32xf32> to vector<6x32xf32>
    %977 = arith.mulf %927, %976 : vector<6x32xf32>
    %cst_222 = arith.constant dense<0.000000e+00> : vector<6xf32>
    %978 = vector.multi_reduction <add>, %977, %cst_222 [1] : vector<6x32xf32> to vector<6xf32>
    %979 = vector.shape_cast %978 : vector<6xf32> to vector<6x1xf32>
    %980 = arith.addf %975, %979 : vector<6x1xf32>
    %981 = vector.broadcast %939 : vector<1x1xf32> to vector<6x1xf32>
    %982 = arith.addf %980, %981 : vector<6x1xf32>
    %cst_223 = arith.constant dense<0.000000e+00> : vector<6x32xf32>
    %983 = tpu.matmul %927, %933, %cst_223 {dimension_numbers = #tpu.dot_dimension_numbers<[1], [0], [0], [1], [0, 0, 1, 1], [], []>} : vector<6x32xf32>, vector<32x32xf32>, vector<6x32xf32> -> vector<6x32xf32>
    %984 = vector.broadcast %940 : vector<1x32xf32> to vector<6x32xf32>
    %985 = arith.addf %983, %984 : vector<6x32xf32>
    %c0_224 = arith.constant 0 : index
    %c0_225 = arith.constant 0 : index
    %986 = vector.load %arg7[%c0_224, %c0_225] : memref<24x8xf32, #tpu.memory_space<vmem>>, vector<24x8xf32>
    %cst_226 = arith.constant 0.000000e+00 : f32
    %987 = vector.broadcast %cst_226 : f32 to vector<1x3xf32>
    %cst_227 = arith.constant 0.000000e+00 : f32
    %988 = vector.broadcast %cst_227 : f32 to vector<1x1xf32>
    %cst_228 = arith.constant 0.000000e+00 : f32
    %989 = vector.broadcast %cst_228 : f32 to vector<1x8xf32>
    %990 = vector.extract_strided_slice %982 {offsets = [0, 0], sizes = [1, 1], strides = [1, 1]} : vector<6x1xf32> to vector<1x1xf32>
    %991 = arith.addf %988, %990 : vector<1x1xf32>
    %992 = arith.negf %991 : vector<1x1xf32>
    %993 = math.exp %992 : vector<1x1xf32>
    %cst_229 = arith.constant 1.000000e+00 : f32
    %994 = vector.broadcast %cst_229 : f32 to vector<1x1xf32>
    %995 = arith.addf %994, %993 : vector<1x1xf32>
    %996 = arith.divf %994, %995 : vector<1x1xf32>
    %cst_230 = arith.constant 1.000000e+00 : f32
    %997 = vector.broadcast %cst_230 : f32 to vector<1x1xf32>
    %998 = arith.subf %997, %996 : vector<1x1xf32>
    %999 = vector.extract_strided_slice %963 {offsets = [0, 0], sizes = [1, 3], strides = [1, 1]} : vector<6x3xf32> to vector<1x3xf32>
    %1000 = vector.broadcast %998 : vector<1x1xf32> to vector<1x3xf32>
    %1001 = arith.mulf %1000, %999 : vector<1x3xf32>
    %1002 = vector.broadcast %996 : vector<1x1xf32> to vector<1x3xf32>
    %1003 = arith.mulf %1002, %987 : vector<1x3xf32>
    %1004 = arith.addf %1001, %1003 : vector<1x3xf32>
    %cst_231 = arith.constant dense<0.000000e+00> : vector<1xf32>
    %1005 = vector.multi_reduction <add>, %1004, %cst_231 [1] : vector<1x3xf32> to vector<1xf32>
    %1006 = vector.shape_cast %1005 : vector<1xf32> to vector<1x1xf32>
    %1007 = vector.broadcast %1006 : vector<1x1xf32> to vector<1x3xf32>
    %1008 = arith.divf %1004, %1007 : vector<1x3xf32>
    %1009 = vector.extract_strided_slice %1008 {offsets = [0, 0], sizes = [1, 2], strides = [1, 1]} : vector<1x3xf32> to vector<1x2xf32>
    %1010 = vector.extract_strided_slice %971 {offsets = [0, 0], sizes = [1, 2], strides = [1, 1]} : vector<6x2xf32> to vector<1x2xf32>
    %1011 = arith.divf %1009, %1010 : vector<1x2xf32>
    %1012 = vector.extract_strided_slice %969 {offsets = [0, 0], sizes = [1, 24], strides = [1, 1]} : vector<6x24xf32> to vector<1x24xf32>
    %cst_232 = arith.constant dense<0.000000e+00> : vector<1x24xf32>
    %1013 = tpu.matmul %1011, %970, %cst_232 {dimension_numbers = #tpu.dot_dimension_numbers<[1], [0], [0], [1], [0, 0, 1, 1], [], []>} : vector<1x2xf32>, vector<2x24xf32>, vector<1x24xf32> -> vector<1x24xf32>
    %1014 = arith.mulf %1012, %1013 : vector<1x24xf32>
    %cst_233 = arith.constant dense<0.000000e+00> : vector<1x32xf32>
    %1015 = tpu.matmul %1014, %929, %cst_233 {dimension_numbers = #tpu.dot_dimension_numbers<[1], [0], [0], [1], [0, 0, 1, 1], [], []>} : vector<1x24xf32>, vector<24x32xf32>, vector<1x32xf32> -> vector<1x32xf32>
    %cst_234 = arith.constant dense<0.000000e+00> : vector<1x32xf32>
    %1016 = tpu.matmul %1015, %932, %cst_234 {dimension_numbers = #tpu.dot_dimension_numbers<[1], [0], [0], [1], [0, 0, 1, 1], [], []>} : vector<1x32xf32>, vector<32x32xf32>, vector<1x32xf32> -> vector<1x32xf32>
    %1017 = vector.extract_strided_slice %985 {offsets = [0, 0], sizes = [1, 32], strides = [1, 1]} : vector<6x32xf32> to vector<1x32xf32>
    %1018 = arith.addf %1016, %1017 : vector<1x32xf32>
    %cst_235 = arith.constant dense<0xFF800000> : vector<1xf32>
    %1019 = vector.multi_reduction <maximumf>, %1018, %cst_235 [1] : vector<1x32xf32> to vector<1xf32>
    %1020 = vector.shape_cast %1019 : vector<1xf32> to vector<1x1xf32>
    %1021 = vector.broadcast %1020 : vector<1x1xf32> to vector<1x32xf32>
    %1022 = arith.subf %1018, %1021 : vector<1x32xf32>
    %1023 = math.exp %1022 : vector<1x32xf32>
    %cst_236 = arith.constant dense<0.000000e+00> : vector<1xf32>
    %1024 = vector.multi_reduction <add>, %1023, %cst_236 [1] : vector<1x32xf32> to vector<1xf32>
    %1025 = vector.shape_cast %1024 : vector<1xf32> to vector<1x1xf32>
    %1026 = math.log %1025 : vector<1x1xf32>
    %1027 = vector.broadcast %1026 : vector<1x1xf32> to vector<1x32xf32>
    %1028 = arith.subf %1022, %1027 : vector<1x32xf32>
    %1029 = arith.mulf %1028, %936 : vector<1x32xf32>
    %cst_237 = arith.constant dense<0.000000e+00> : vector<1xf32>
    %1030 = vector.multi_reduction <add>, %1029, %cst_237 [1] : vector<1x32xf32> to vector<1xf32>
    %1031 = vector.shape_cast %1030 : vector<1xf32> to vector<1x1xf32>
    %cst_238 = arith.constant dense<0.000000e+00> : vector<1x8xf32>
    %1032 = tpu.matmul %1014, %986, %cst_238 {dimension_numbers = #tpu.dot_dimension_numbers<[1], [0], [0], [1], [0, 0, 1, 1], [], []>} : vector<1x24xf32>, vector<24x8xf32>, vector<1x8xf32> -> vector<1x8xf32>
    %c0_239 = arith.constant 0 : index
    %c0_240 = arith.constant 0 : index
    %1033 = vector.load %arg8[%c0_239, %c0_240] : memref<6x32xf32, #tpu.memory_space<vmem>>, vector<1x32xf32>
    tpu.vector_store %arg8[%c0_239, %c0_240], %1028 {strides = array<i32>} : memref<6x32xf32, #tpu.memory_space<vmem>>, vector<1x32xf32>,
    %c0_241 = arith.constant 0 : index
    %c0_242 = arith.constant 0 : index
    %1034 = vector.load %arg10[%c0_241, %c0_242] : memref<6x3xf32, #tpu.memory_space<vmem>>, vector<1x3xf32>
    tpu.vector_store %arg10[%c0_241, %c0_242], %1008 {strides = array<i32>} : memref<6x3xf32, #tpu.memory_space<vmem>>, vector<1x3xf32>,
    %c0_243 = arith.constant 0 : index
    %c0_244 = arith.constant 0 : index
    %1035 = vector.load %arg9[%c0_243, %c0_244] : memref<6x8xf32, #tpu.memory_space<vmem>>, vector<1x8xf32>
    tpu.vector_store %arg9[%c0_243, %c0_244], %1032 {strides = array<i32>} : memref<6x8xf32, #tpu.memory_space<vmem>>, vector<1x8xf32>,
    %c0_245 = arith.constant 0 : index
    %c0_246 = arith.constant 0 : index
    %1036 = vector.load %arg11[%c0_245, %c0_246] : memref<6x8xf32, #tpu.memory_space<vmem>>, vector<1x8xf32>
    tpu.vector_store %arg11[%c0_245, %c0_246], %989 {strides = array<i32>} : memref<6x8xf32, #tpu.memory_space<vmem>>, vector<1x8xf32>,
    %1037 = arith.addf %989, %1032 : vector<1x8xf32>
    %1038 = vector.extract_strided_slice %982 {offsets = [1, 0], sizes = [1, 1], strides = [1, 1]} : vector<6x1xf32> to vector<1x1xf32>
    %1039 = arith.addf %1031, %1038 : vector<1x1xf32>
    %1040 = arith.negf %1039 : vector<1x1xf32>
    %1041 = math.exp %1040 : vector<1x1xf32>
    %cst_247 = arith.constant 1.000000e+00 : f32
    %1042 = vector.broadcast %cst_247 : f32 to vector<1x1xf32>
    %1043 = arith.addf %1042, %1041 : vector<1x1xf32>
    %1044 = arith.divf %1042, %1043 : vector<1x1xf32>
    %cst_248 = arith.constant 1.000000e+00 : f32
    %1045 = vector.broadcast %cst_248 : f32 to vector<1x1xf32>
    %1046 = arith.subf %1045, %1044 : vector<1x1xf32>
    %1047 = vector.extract_strided_slice %963 {offsets = [1, 0], sizes = [1, 3], strides = [1, 1]} : vector<6x3xf32> to vector<1x3xf32>
    %1048 = vector.broadcast %1046 : vector<1x1xf32> to vector<1x3xf32>
    %1049 = arith.mulf %1048, %1047 : vector<1x3xf32>
    %1050 = vector.broadcast %1044 : vector<1x1xf32> to vector<1x3xf32>
    %1051 = arith.mulf %1050, %1008 : vector<1x3xf32>
    %1052 = arith.addf %1049, %1051 : vector<1x3xf32>
    %cst_249 = arith.constant dense<0.000000e+00> : vector<1xf32>
    %1053 = vector.multi_reduction <add>, %1052, %cst_249 [1] : vector<1x3xf32> to vector<1xf32>
    %1054 = vector.shape_cast %1053 : vector<1xf32> to vector<1x1xf32>
    %1055 = vector.broadcast %1054 : vector<1x1xf32> to vector<1x3xf32>
    %1056 = arith.divf %1052, %1055 : vector<1x3xf32>
    %1057 = vector.extract_strided_slice %1056 {offsets = [0, 0], sizes = [1, 2], strides = [1, 1]} : vector<1x3xf32> to vector<1x2xf32>
    %1058 = vector.extract_strided_slice %971 {offsets = [1, 0], sizes = [1, 2], strides = [1, 1]} : vector<6x2xf32> to vector<1x2xf32>
    %1059 = arith.divf %1057, %1058 : vector<1x2xf32>
    %1060 = vector.extract_strided_slice %969 {offsets = [1, 0], sizes = [1, 24], strides = [1, 1]} : vector<6x24xf32> to vector<1x24xf32>
    %cst_250 = arith.constant dense<0.000000e+00> : vector<1x24xf32>
    %1061 = tpu.matmul %1059, %970, %cst_250 {dimension_numbers = #tpu.dot_dimension_numbers<[1], [0], [0], [1], [0, 0, 1, 1], [], []>} : vector<1x2xf32>, vector<2x24xf32>, vector<1x24xf32> -> vector<1x24xf32>
    %1062 = arith.mulf %1060, %1061 : vector<1x24xf32>
    %cst_251 = arith.constant dense<0.000000e+00> : vector<1x32xf32>
    %1063 = tpu.matmul %1062, %929, %cst_251 {dimension_numbers = #tpu.dot_dimension_numbers<[1], [0], [0], [1], [0, 0, 1, 1], [], []>} : vector<1x24xf32>, vector<24x32xf32>, vector<1x32xf32> -> vector<1x32xf32>
    %cst_252 = arith.constant dense<0.000000e+00> : vector<1x32xf32>
    %1064 = tpu.matmul %1063, %932, %cst_252 {dimension_numbers = #tpu.dot_dimension_numbers<[1], [0], [0], [1], [0, 0, 1, 1], [], []>} : vector<1x32xf32>, vector<32x32xf32>, vector<1x32xf32> -> vector<1x32xf32>
    %1065 = vector.extract_strided_slice %985 {offsets = [1, 0], sizes = [1, 32], strides = [1, 1]} : vector<6x32xf32> to vector<1x32xf32>
    %1066 = arith.addf %1064, %1065 : vector<1x32xf32>
    %cst_253 = arith.constant dense<0xFF800000> : vector<1xf32>
    %1067 = vector.multi_reduction <maximumf>, %1066, %cst_253 [1] : vector<1x32xf32> to vector<1xf32>
    %1068 = vector.shape_cast %1067 : vector<1xf32> to vector<1x1xf32>
    %1069 = vector.broadcast %1068 : vector<1x1xf32> to vector<1x32xf32>
    %1070 = arith.subf %1066, %1069 : vector<1x32xf32>
    %1071 = math.exp %1070 : vector<1x32xf32>
    %cst_254 = arith.constant dense<0.000000e+00> : vector<1xf32>
    %1072 = vector.multi_reduction <add>, %1071, %cst_254 [1] : vector<1x32xf32> to vector<1xf32>
    %1073 = vector.shape_cast %1072 : vector<1xf32> to vector<1x1xf32>
    %1074 = math.log %1073 : vector<1x1xf32>
    %1075 = vector.broadcast %1074 : vector<1x1xf32> to vector<1x32xf32>
    %1076 = arith.subf %1070, %1075 : vector<1x32xf32>
    %1077 = arith.mulf %1076, %936 : vector<1x32xf32>
    %cst_255 = arith.constant dense<0.000000e+00> : vector<1xf32>
    %1078 = vector.multi_reduction <add>, %1077, %cst_255 [1] : vector<1x32xf32> to vector<1xf32>
    %1079 = vector.shape_cast %1078 : vector<1xf32> to vector<1x1xf32>
    %cst_256 = arith.constant dense<0.000000e+00> : vector<1x8xf32>
    %1080 = tpu.matmul %1062, %986, %cst_256 {dimension_numbers = #tpu.dot_dimension_numbers<[1], [0], [0], [1], [0, 0, 1, 1], [], []>} : vector<1x24xf32>, vector<24x8xf32>, vector<1x8xf32> -> vector<1x8xf32>
    %c1_257 = arith.constant 1 : index
    %c0_258 = arith.constant 0 : index
    %1081 = vector.load %arg8[%c1_257, %c0_258] : memref<6x32xf32, #tpu.memory_space<vmem>>, vector<1x32xf32>
    tpu.vector_store %arg8[%c1_257, %c0_258], %1076 {strides = array<i32>} : memref<6x32xf32, #tpu.memory_space<vmem>>, vector<1x32xf32>,
    %c1_259 = arith.constant 1 : index
    %c0_260 = arith.constant 0 : index
    %1082 = vector.load %arg10[%c1_259, %c0_260] : memref<6x3xf32, #tpu.memory_space<vmem>>, vector<1x3xf32>
    tpu.vector_store %arg10[%c1_259, %c0_260], %1056 {strides = array<i32>} : memref<6x3xf32, #tpu.memory_space<vmem>>, vector<1x3xf32>,
    %c1_261 = arith.constant 1 : index
    %c0_262 = arith.constant 0 : index
    %1083 = vector.load %arg9[%c1_261, %c0_262] : memref<6x8xf32, #tpu.memory_space<vmem>>, vector<1x8xf32>
    tpu.vector_store %arg9[%c1_261, %c0_262], %1080 {strides = array<i32>} : memref<6x8xf32, #tpu.memory_space<vmem>>, vector<1x8xf32>,
    %c1_263 = arith.constant 1 : index
    %c0_264 = arith.constant 0 : index
    %1084 = vector.load %arg11[%c1_263, %c0_264] : memref<6x8xf32, #tpu.memory_space<vmem>>, vector<1x8xf32>
    tpu.vector_store %arg11[%c1_263, %c0_264], %1037 {strides = array<i32>} : memref<6x8xf32, #tpu.memory_space<vmem>>, vector<1x8xf32>,
    %1085 = arith.addf %1037, %1080 : vector<1x8xf32>
    %1086 = vector.extract_strided_slice %982 {offsets = [2, 0], sizes = [1, 1], strides = [1, 1]} : vector<6x1xf32> to vector<1x1xf32>
    %1087 = arith.addf %1079, %1086 : vector<1x1xf32>
    %1088 = arith.negf %1087 : vector<1x1xf32>
    %1089 = math.exp %1088 : vector<1x1xf32>
    %cst_265 = arith.constant 1.000000e+00 : f32
    %1090 = vector.broadcast %cst_265 : f32 to vector<1x1xf32>
    %1091 = arith.addf %1090, %1089 : vector<1x1xf32>
    %1092 = arith.divf %1090, %1091 : vector<1x1xf32>
    %cst_266 = arith.constant 1.000000e+00 : f32
    %1093 = vector.broadcast %cst_266 : f32 to vector<1x1xf32>
    %1094 = arith.subf %1093, %1092 : vector<1x1xf32>
    %1095 = vector.extract_strided_slice %963 {offsets = [2, 0], sizes = [1, 3], strides = [1, 1]} : vector<6x3xf32> to vector<1x3xf32>
    %1096 = vector.broadcast %1094 : vector<1x1xf32> to vector<1x3xf32>
    %1097 = arith.mulf %1096, %1095 : vector<1x3xf32>
    %1098 = vector.broadcast %1092 : vector<1x1xf32> to vector<1x3xf32>
    %1099 = arith.mulf %1098, %1056 : vector<1x3xf32>
    %1100 = arith.addf %1097, %1099 : vector<1x3xf32>
    %cst_267 = arith.constant dense<0.000000e+00> : vector<1xf32>
    %1101 = vector.multi_reduction <add>, %1100, %cst_267 [1] : vector<1x3xf32> to vector<1xf32>
    %1102 = vector.shape_cast %1101 : vector<1xf32> to vector<1x1xf32>
    %1103 = vector.broadcast %1102 : vector<1x1xf32> to vector<1x3xf32>
    %1104 = arith.divf %1100, %1103 : vector<1x3xf32>
    %1105 = vector.extract_strided_slice %1104 {offsets = [0, 0], sizes = [1, 2], strides = [1, 1]} : vector<1x3xf32> to vector<1x2xf32>
    %1106 = vector.extract_strided_slice %971 {offsets = [2, 0], sizes = [1, 2], strides = [1, 1]} : vector<6x2xf32> to vector<1x2xf32>
    %1107 = arith.divf %1105, %1106 : vector<1x2xf32>
    %1108 = vector.extract_strided_slice %969 {offsets = [2, 0], sizes = [1, 24], strides = [1, 1]} : vector<6x24xf32> to vector<1x24xf32>
    %cst_268 = arith.constant dense<0.000000e+00> : vector<1x24xf32>
    %1109 = tpu.matmul %1107, %970, %cst_268 {dimension_numbers = #tpu.dot_dimension_numbers<[1], [0], [0], [1], [0, 0, 1, 1], [], []>} : vector<1x2xf32>, vector<2x24xf32>, vector<1x24xf32> -> vector<1x24xf32>
    %1110 = arith.mulf %1108, %1109 : vector<1x24xf32>
    %cst_269 = arith.constant dense<0.000000e+00> : vector<1x32xf32>
    %1111 = tpu.matmul %1110, %929, %cst_269 {dimension_numbers = #tpu.dot_dimension_numbers<[1], [0], [0], [1], [0, 0, 1, 1], [], []>} : vector<1x24xf32>, vector<24x32xf32>, vector<1x32xf32> -> vector<1x32xf32>
    %cst_270 = arith.constant dense<0.000000e+00> : vector<1x32xf32>
    %1112 = tpu.matmul %1111, %932, %cst_270 {dimension_numbers = #tpu.dot_dimension_numbers<[1], [0], [0], [1], [0, 0, 1, 1], [], []>} : vector<1x32xf32>, vector<32x32xf32>, vector<1x32xf32> -> vector<1x32xf32>
    %1113 = vector.extract_strided_slice %985 {offsets = [2, 0], sizes = [1, 32], strides = [1, 1]} : vector<6x32xf32> to vector<1x32xf32>
    %1114 = arith.addf %1112, %1113 : vector<1x32xf32>
    %cst_271 = arith.constant dense<0xFF800000> : vector<1xf32>
    %1115 = vector.multi_reduction <maximumf>, %1114, %cst_271 [1] : vector<1x32xf32> to vector<1xf32>
    %1116 = vector.shape_cast %1115 : vector<1xf32> to vector<1x1xf32>
    %1117 = vector.broadcast %1116 : vector<1x1xf32> to vector<1x32xf32>
    %1118 = arith.subf %1114, %1117 : vector<1x32xf32>
    %1119 = math.exp %1118 : vector<1x32xf32>
    %cst_272 = arith.constant dense<0.000000e+00> : vector<1xf32>
    %1120 = vector.multi_reduction <add>, %1119, %cst_272 [1] : vector<1x32xf32> to vector<1xf32>
    %1121 = vector.shape_cast %1120 : vector<1xf32> to vector<1x1xf32>
    %1122 = math.log %1121 : vector<1x1xf32>
    %1123 = vector.broadcast %1122 : vector<1x1xf32> to vector<1x32xf32>
    %1124 = arith.subf %1118, %1123 : vector<1x32xf32>
    %1125 = arith.mulf %1124, %936 : vector<1x32xf32>
    %cst_273 = arith.constant dense<0.000000e+00> : vector<1xf32>
    %1126 = vector.multi_reduction <add>, %1125, %cst_273 [1] : vector<1x32xf32> to vector<1xf32>
    %1127 = vector.shape_cast %1126 : vector<1xf32> to vector<1x1xf32>
    %cst_274 = arith.constant dense<0.000000e+00> : vector<1x8xf32>
    %1128 = tpu.matmul %1110, %986, %cst_274 {dimension_numbers = #tpu.dot_dimension_numbers<[1], [0], [0], [1], [0, 0, 1, 1], [], []>} : vector<1x24xf32>, vector<24x8xf32>, vector<1x8xf32> -> vector<1x8xf32>
    %c2_275 = arith.constant 2 : index
    %c0_276 = arith.constant 0 : index
    %1129 = vector.load %arg8[%c2_275, %c0_276] : memref<6x32xf32, #tpu.memory_space<vmem>>, vector<1x32xf32>
    tpu.vector_store %arg8[%c2_275, %c0_276], %1124 {strides = array<i32>} : memref<6x32xf32, #tpu.memory_space<vmem>>, vector<1x32xf32>,
    %c2_277 = arith.constant 2 : index
    %c0_278 = arith.constant 0 : index
    %1130 = vector.load %arg10[%c2_277, %c0_278] : memref<6x3xf32, #tpu.memory_space<vmem>>, vector<1x3xf32>
    tpu.vector_store %arg10[%c2_277, %c0_278], %1104 {strides = array<i32>} : memref<6x3xf32, #tpu.memory_space<vmem>>, vector<1x3xf32>,
    %c2_279 = arith.constant 2 : index
    %c0_280 = arith.constant 0 : index
    %1131 = vector.load %arg9[%c2_279, %c0_280] : memref<6x8xf32, #tpu.memory_space<vmem>>, vector<1x8xf32>
    tpu.vector_store %arg9[%c2_279, %c0_280], %1128 {strides = array<i32>} : memref<6x8xf32, #tpu.memory_space<vmem>>, vector<1x8xf32>,
    %c2_281 = arith.constant 2 : index
    %c0_282 = arith.constant 0 : index
    %1132 = vector.load %arg11[%c2_281, %c0_282] : memref<6x8xf32, #tpu.memory_space<vmem>>, vector<1x8xf32>
    tpu.vector_store %arg11[%c2_281, %c0_282], %1085 {strides = array<i32>} : memref<6x8xf32, #tpu.memory_space<vmem>>, vector<1x8xf32>,
    %1133 = arith.addf %1085, %1128 : vector<1x8xf32>
    %1134 = vector.extract_strided_slice %982 {offsets = [3, 0], sizes = [1, 1], strides = [1, 1]} : vector<6x1xf32> to vector<1x1xf32>
    %1135 = arith.addf %1127, %1134 : vector<1x1xf32>
    %1136 = arith.negf %1135 : vector<1x1xf32>
    %1137 = math.exp %1136 : vector<1x1xf32>
    %cst_283 = arith.constant 1.000000e+00 : f32
    %1138 = vector.broadcast %cst_283 : f32 to vector<1x1xf32>
    %1139 = arith.addf %1138, %1137 : vector<1x1xf32>
    %1140 = arith.divf %1138, %1139 : vector<1x1xf32>
    %cst_284 = arith.constant 1.000000e+00 : f32
    %1141 = vector.broadcast %cst_284 : f32 to vector<1x1xf32>
    %1142 = arith.subf %1141, %1140 : vector<1x1xf32>
    %1143 = vector.extract_strided_slice %963 {offsets = [3, 0], sizes = [1, 3], strides = [1, 1]} : vector<6x3xf32> to vector<1x3xf32>
    %1144 = vector.broadcast %1142 : vector<1x1xf32> to vector<1x3xf32>
    %1145 = arith.mulf %1144, %1143 : vector<1x3xf32>
    %1146 = vector.broadcast %1140 : vector<1x1xf32> to vector<1x3xf32>
    %1147 = arith.mulf %1146, %1104 : vector<1x3xf32>
    %1148 = arith.addf %1145, %1147 : vector<1x3xf32>
    %cst_285 = arith.constant dense<0.000000e+00> : vector<1xf32>
    %1149 = vector.multi_reduction <add>, %1148, %cst_285 [1] : vector<1x3xf32> to vector<1xf32>
    %1150 = vector.shape_cast %1149 : vector<1xf32> to vector<1x1xf32>
    %1151 = vector.broadcast %1150 : vector<1x1xf32> to vector<1x3xf32>
    %1152 = arith.divf %1148, %1151 : vector<1x3xf32>
    %1153 = vector.extract_strided_slice %1152 {offsets = [0, 0], sizes = [1, 2], strides = [1, 1]} : vector<1x3xf32> to vector<1x2xf32>
    %1154 = vector.extract_strided_slice %971 {offsets = [3, 0], sizes = [1, 2], strides = [1, 1]} : vector<6x2xf32> to vector<1x2xf32>
    %1155 = arith.divf %1153, %1154 : vector<1x2xf32>
    %1156 = vector.extract_strided_slice %969 {offsets = [3, 0], sizes = [1, 24], strides = [1, 1]} : vector<6x24xf32> to vector<1x24xf32>
    %cst_286 = arith.constant dense<0.000000e+00> : vector<1x24xf32>
    %1157 = tpu.matmul %1155, %970, %cst_286 {dimension_numbers = #tpu.dot_dimension_numbers<[1], [0], [0], [1], [0, 0, 1, 1], [], []>} : vector<1x2xf32>, vector<2x24xf32>, vector<1x24xf32> -> vector<1x24xf32>
    %1158 = arith.mulf %1156, %1157 : vector<1x24xf32>
    %cst_287 = arith.constant dense<0.000000e+00> : vector<1x32xf32>
    %1159 = tpu.matmul %1158, %929, %cst_287 {dimension_numbers = #tpu.dot_dimension_numbers<[1], [0], [0], [1], [0, 0, 1, 1], [], []>} : vector<1x24xf32>, vector<24x32xf32>, vector<1x32xf32> -> vector<1x32xf32>
    %cst_288 = arith.constant dense<0.000000e+00> : vector<1x32xf32>
    %1160 = tpu.matmul %1159, %932, %cst_288 {dimension_numbers = #tpu.dot_dimension_numbers<[1], [0], [0], [1], [0, 0, 1, 1], [], []>} : vector<1x32xf32>, vector<32x32xf32>, vector<1x32xf32> -> vector<1x32xf32>
    %1161 = vector.extract_strided_slice %985 {offsets = [3, 0], sizes = [1, 32], strides = [1, 1]} : vector<6x32xf32> to vector<1x32xf32>
    %1162 = arith.addf %1160, %1161 : vector<1x32xf32>
    %cst_289 = arith.constant dense<0xFF800000> : vector<1xf32>
    %1163 = vector.multi_reduction <maximumf>, %1162, %cst_289 [1] : vector<1x32xf32> to vector<1xf32>
    %1164 = vector.shape_cast %1163 : vector<1xf32> to vector<1x1xf32>
    %1165 = vector.broadcast %1164 : vector<1x1xf32> to vector<1x32xf32>
    %1166 = arith.subf %1162, %1165 : vector<1x32xf32>
    %1167 = math.exp %1166 : vector<1x32xf32>
    %cst_290 = arith.constant dense<0.000000e+00> : vector<1xf32>
    %1168 = vector.multi_reduction <add>, %1167, %cst_290 [1] : vector<1x32xf32> to vector<1xf32>
    %1169 = vector.shape_cast %1168 : vector<1xf32> to vector<1x1xf32>
    %1170 = math.log %1169 : vector<1x1xf32>
    %1171 = vector.broadcast %1170 : vector<1x1xf32> to vector<1x32xf32>
    %1172 = arith.subf %1166, %1171 : vector<1x32xf32>
    %1173 = arith.mulf %1172, %936 : vector<1x32xf32>
    %cst_291 = arith.constant dense<0.000000e+00> : vector<1xf32>
    %1174 = vector.multi_reduction <add>, %1173, %cst_291 [1] : vector<1x32xf32> to vector<1xf32>
    %1175 = vector.shape_cast %1174 : vector<1xf32> to vector<1x1xf32>
    %cst_292 = arith.constant dense<0.000000e+00> : vector<1x8xf32>
    %1176 = tpu.matmul %1158, %986, %cst_292 {dimension_numbers = #tpu.dot_dimension_numbers<[1], [0], [0], [1], [0, 0, 1, 1], [], []>} : vector<1x24xf32>, vector<24x8xf32>, vector<1x8xf32> -> vector<1x8xf32>
    %c3_293 = arith.constant 3 : index
    %c0_294 = arith.constant 0 : index
    %1177 = vector.load %arg8[%c3_293, %c0_294] : memref<6x32xf32, #tpu.memory_space<vmem>>, vector<1x32xf32>
    tpu.vector_store %arg8[%c3_293, %c0_294], %1172 {strides = array<i32>} : memref<6x32xf32, #tpu.memory_space<vmem>>, vector<1x32xf32>,
    %c3_295 = arith.constant 3 : index
    %c0_296 = arith.constant 0 : index
    %1178 = vector.load %arg10[%c3_295, %c0_296] : memref<6x3xf32, #tpu.memory_space<vmem>>, vector<1x3xf32>
    tpu.vector_store %arg10[%c3_295, %c0_296], %1152 {strides = array<i32>} : memref<6x3xf32, #tpu.memory_space<vmem>>, vector<1x3xf32>,
    %c3_297 = arith.constant 3 : index
    %c0_298 = arith.constant 0 : index
    %1179 = vector.load %arg9[%c3_297, %c0_298] : memref<6x8xf32, #tpu.memory_space<vmem>>, vector<1x8xf32>
    tpu.vector_store %arg9[%c3_297, %c0_298], %1176 {strides = array<i32>} : memref<6x8xf32, #tpu.memory_space<vmem>>, vector<1x8xf32>,
    %c3_299 = arith.constant 3 : index
    %c0_300 = arith.constant 0 : index
    %1180 = vector.load %arg11[%c3_299, %c0_300] : memref<6x8xf32, #tpu.memory_space<vmem>>, vector<1x8xf32>
    tpu.vector_store %arg11[%c3_299, %c0_300], %1133 {strides = array<i32>} : memref<6x8xf32, #tpu.memory_space<vmem>>, vector<1x8xf32>,
    %1181 = arith.addf %1133, %1176 : vector<1x8xf32>
    %1182 = vector.extract_strided_slice %982 {offsets = [4, 0], sizes = [1, 1], strides = [1, 1]} : vector<6x1xf32> to vector<1x1xf32>
    %1183 = arith.addf %1175, %1182 : vector<1x1xf32>
    %1184 = arith.negf %1183 : vector<1x1xf32>
    %1185 = math.exp %1184 : vector<1x1xf32>
    %cst_301 = arith.constant 1.000000e+00 : f32
    %1186 = vector.broadcast %cst_301 : f32 to vector<1x1xf32>
    %1187 = arith.addf %1186, %1185 : vector<1x1xf32>
    %1188 = arith.divf %1186, %1187 : vector<1x1xf32>
    %cst_302 = arith.constant 1.000000e+00 : f32
    %1189 = vector.broadcast %cst_302 : f32 to vector<1x1xf32>
    %1190 = arith.subf %1189, %1188 : vector<1x1xf32>
    %1191 = vector.extract_strided_slice %963 {offsets = [4, 0], sizes = [1, 3], strides = [1, 1]} : vector<6x3xf32> to vector<1x3xf32>
    %1192 = vector.broadcast %1190 : vector<1x1xf32> to vector<1x3xf32>
    %1193 = arith.mulf %1192, %1191 : vector<1x3xf32>
    %1194 = vector.broadcast %1188 : vector<1x1xf32> to vector<1x3xf32>
    %1195 = arith.mulf %1194, %1152 : vector<1x3xf32>
    %1196 = arith.addf %1193, %1195 : vector<1x3xf32>
    %cst_303 = arith.constant dense<0.000000e+00> : vector<1xf32>
    %1197 = vector.multi_reduction <add>, %1196, %cst_303 [1] : vector<1x3xf32> to vector<1xf32>
    %1198 = vector.shape_cast %1197 : vector<1xf32> to vector<1x1xf32>
    %1199 = vector.broadcast %1198 : vector<1x1xf32> to vector<1x3xf32>
    %1200 = arith.divf %1196, %1199 : vector<1x3xf32>
    %1201 = vector.extract_strided_slice %1200 {offsets = [0, 0], sizes = [1, 2], strides = [1, 1]} : vector<1x3xf32> to vector<1x2xf32>
    %1202 = vector.extract_strided_slice %971 {offsets = [4, 0], sizes = [1, 2], strides = [1, 1]} : vector<6x2xf32> to vector<1x2xf32>
    %1203 = arith.divf %1201, %1202 : vector<1x2xf32>
    %1204 = vector.extract_strided_slice %969 {offsets = [4, 0], sizes = [1, 24], strides = [1, 1]} : vector<6x24xf32> to vector<1x24xf32>
    %cst_304 = arith.constant dense<0.000000e+00> : vector<1x24xf32>
    %1205 = tpu.matmul %1203, %970, %cst_304 {dimension_numbers = #tpu.dot_dimension_numbers<[1], [0], [0], [1], [0, 0, 1, 1], [], []>} : vector<1x2xf32>, vector<2x24xf32>, vector<1x24xf32> -> vector<1x24xf32>
    %1206 = arith.mulf %1204, %1205 : vector<1x24xf32>
    %cst_305 = arith.constant dense<0.000000e+00> : vector<1x32xf32>
    %1207 = tpu.matmul %1206, %929, %cst_305 {dimension_numbers = #tpu.dot_dimension_numbers<[1], [0], [0], [1], [0, 0, 1, 1], [], []>} : vector<1x24xf32>, vector<24x32xf32>, vector<1x32xf32> -> vector<1x32xf32>
    %cst_306 = arith.constant dense<0.000000e+00> : vector<1x32xf32>
    %1208 = tpu.matmul %1207, %932, %cst_306 {dimension_numbers = #tpu.dot_dimension_numbers<[1], [0], [0], [1], [0, 0, 1, 1], [], []>} : vector<1x32xf32>, vector<32x32xf32>, vector<1x32xf32> -> vector<1x32xf32>
    %1209 = vector.extract_strided_slice %985 {offsets = [4, 0], sizes = [1, 32], strides = [1, 1]} : vector<6x32xf32> to vector<1x32xf32>
    %1210 = arith.addf %1208, %1209 : vector<1x32xf32>
    %cst_307 = arith.constant dense<0xFF800000> : vector<1xf32>
    %1211 = vector.multi_reduction <maximumf>, %1210, %cst_307 [1] : vector<1x32xf32> to vector<1xf32>
    %1212 = vector.shape_cast %1211 : vector<1xf32> to vector<1x1xf32>
    %1213 = vector.broadcast %1212 : vector<1x1xf32> to vector<1x32xf32>
    %1214 = arith.subf %1210, %1213 : vector<1x32xf32>
    %1215 = math.exp %1214 : vector<1x32xf32>
    %cst_308 = arith.constant dense<0.000000e+00> : vector<1xf32>
    %1216 = vector.multi_reduction <add>, %1215, %cst_308 [1] : vector<1x32xf32> to vector<1xf32>
    %1217 = vector.shape_cast %1216 : vector<1xf32> to vector<1x1xf32>
    %1218 = math.log %1217 : vector<1x1xf32>
    %1219 = vector.broadcast %1218 : vector<1x1xf32> to vector<1x32xf32>
    %1220 = arith.subf %1214, %1219 : vector<1x32xf32>
    %1221 = arith.mulf %1220, %936 : vector<1x32xf32>
    %cst_309 = arith.constant dense<0.000000e+00> : vector<1xf32>
    %1222 = vector.multi_reduction <add>, %1221, %cst_309 [1] : vector<1x32xf32> to vector<1xf32>
    %1223 = vector.shape_cast %1222 : vector<1xf32> to vector<1x1xf32>
    %cst_310 = arith.constant dense<0.000000e+00> : vector<1x8xf32>
    %1224 = tpu.matmul %1206, %986, %cst_310 {dimension_numbers = #tpu.dot_dimension_numbers<[1], [0], [0], [1], [0, 0, 1, 1], [], []>} : vector<1x24xf32>, vector<24x8xf32>, vector<1x8xf32> -> vector<1x8xf32>
    %c4_311 = arith.constant 4 : index
    %c0_312 = arith.constant 0 : index
    %1225 = vector.load %arg8[%c4_311, %c0_312] : memref<6x32xf32, #tpu.memory_space<vmem>>, vector<1x32xf32>
    tpu.vector_store %arg8[%c4_311, %c0_312], %1220 {strides = array<i32>} : memref<6x32xf32, #tpu.memory_space<vmem>>, vector<1x32xf32>,
    %c4_313 = arith.constant 4 : index
    %c0_314 = arith.constant 0 : index
    %1226 = vector.load %arg10[%c4_313, %c0_314] : memref<6x3xf32, #tpu.memory_space<vmem>>, vector<1x3xf32>
    tpu.vector_store %arg10[%c4_313, %c0_314], %1200 {strides = array<i32>} : memref<6x3xf32, #tpu.memory_space<vmem>>, vector<1x3xf32>,
    %c4_315 = arith.constant 4 : index
    %c0_316 = arith.constant 0 : index
    %1227 = vector.load %arg9[%c4_315, %c0_316] : memref<6x8xf32, #tpu.memory_space<vmem>>, vector<1x8xf32>
    tpu.vector_store %arg9[%c4_315, %c0_316], %1224 {strides = array<i32>} : memref<6x8xf32, #tpu.memory_space<vmem>>, vector<1x8xf32>,
    %c4_317 = arith.constant 4 : index
    %c0_318 = arith.constant 0 : index
    %1228 = vector.load %arg11[%c4_317, %c0_318] : memref<6x8xf32, #tpu.memory_space<vmem>>, vector<1x8xf32>
    tpu.vector_store %arg11[%c4_317, %c0_318], %1181 {strides = array<i32>} : memref<6x8xf32, #tpu.memory_space<vmem>>, vector<1x8xf32>,
    %1229 = arith.addf %1181, %1224 : vector<1x8xf32>
    %1230 = vector.extract_strided_slice %982 {offsets = [5, 0], sizes = [1, 1], strides = [1, 1]} : vector<6x1xf32> to vector<1x1xf32>
    %1231 = arith.addf %1223, %1230 : vector<1x1xf32>
    %1232 = arith.negf %1231 : vector<1x1xf32>
    %1233 = math.exp %1232 : vector<1x1xf32>
    %cst_319 = arith.constant 1.000000e+00 : f32
    %1234 = vector.broadcast %cst_319 : f32 to vector<1x1xf32>
    %1235 = arith.addf %1234, %1233 : vector<1x1xf32>
    %1236 = arith.divf %1234, %1235 : vector<1x1xf32>
    %cst_320 = arith.constant 1.000000e+00 : f32
    %1237 = vector.broadcast %cst_320 : f32 to vector<1x1xf32>
    %1238 = arith.subf %1237, %1236 : vector<1x1xf32>
    %1239 = vector.extract_strided_slice %963 {offsets = [5, 0], sizes = [1, 3], strides = [1, 1]} : vector<6x3xf32> to vector<1x3xf32>
    %1240 = vector.broadcast %1238 : vector<1x1xf32> to vector<1x3xf32>
    %1241 = arith.mulf %1240, %1239 : vector<1x3xf32>
    %1242 = vector.broadcast %1236 : vector<1x1xf32> to vector<1x3xf32>
    %1243 = arith.mulf %1242, %1200 : vector<1x3xf32>
    %1244 = arith.addf %1241, %1243 : vector<1x3xf32>
    %cst_321 = arith.constant dense<0.000000e+00> : vector<1xf32>
    %1245 = vector.multi_reduction <add>, %1244, %cst_321 [1] : vector<1x3xf32> to vector<1xf32>
    %1246 = vector.shape_cast %1245 : vector<1xf32> to vector<1x1xf32>
    %1247 = vector.broadcast %1246 : vector<1x1xf32> to vector<1x3xf32>
    %1248 = arith.divf %1244, %1247 : vector<1x3xf32>
    %1249 = vector.extract_strided_slice %1248 {offsets = [0, 0], sizes = [1, 2], strides = [1, 1]} : vector<1x3xf32> to vector<1x2xf32>
    %1250 = vector.extract_strided_slice %971 {offsets = [5, 0], sizes = [1, 2], strides = [1, 1]} : vector<6x2xf32> to vector<1x2xf32>
    %1251 = arith.divf %1249, %1250 : vector<1x2xf32>
    %1252 = vector.extract_strided_slice %969 {offsets = [5, 0], sizes = [1, 24], strides = [1, 1]} : vector<6x24xf32> to vector<1x24xf32>
    %cst_322 = arith.constant dense<0.000000e+00> : vector<1x24xf32>
    %1253 = tpu.matmul %1251, %970, %cst_322 {dimension_numbers = #tpu.dot_dimension_numbers<[1], [0], [0], [1], [0, 0, 1, 1], [], []>} : vector<1x2xf32>, vector<2x24xf32>, vector<1x24xf32> -> vector<1x24xf32>
    %1254 = arith.mulf %1252, %1253 : vector<1x24xf32>
    %cst_323 = arith.constant dense<0.000000e+00> : vector<1x32xf32>
    %1255 = tpu.matmul %1254, %929, %cst_323 {dimension_numbers = #tpu.dot_dimension_numbers<[1], [0], [0], [1], [0, 0, 1, 1], [], []>} : vector<1x24xf32>, vector<24x32xf32>, vector<1x32xf32> -> vector<1x32xf32>
    %cst_324 = arith.constant dense<0.000000e+00> : vector<1x32xf32>
    %1256 = tpu.matmul %1255, %932, %cst_324 {dimension_numbers = #tpu.dot_dimension_numbers<[1], [0], [0], [1], [0, 0, 1, 1], [], []>} : vector<1x32xf32>, vector<32x32xf32>, vector<1x32xf32> -> vector<1x32xf32>
    %1257 = vector.extract_strided_slice %985 {offsets = [5, 0], sizes = [1, 32], strides = [1, 1]} : vector<6x32xf32> to vector<1x32xf32>
    %1258 = arith.addf %1256, %1257 : vector<1x32xf32>
    %cst_325 = arith.constant dense<0xFF800000> : vector<1xf32>
    %1259 = vector.multi_reduction <maximumf>, %1258, %cst_325 [1] : vector<1x32xf32> to vector<1xf32>
    %1260 = vector.shape_cast %1259 : vector<1xf32> to vector<1x1xf32>
    %1261 = vector.broadcast %1260 : vector<1x1xf32> to vector<1x32xf32>
    %1262 = arith.subf %1258, %1261 : vector<1x32xf32>
    %1263 = math.exp %1262 : vector<1x32xf32>
    %cst_326 = arith.constant dense<0.000000e+00> : vector<1xf32>
    %1264 = vector.multi_reduction <add>, %1263, %cst_326 [1] : vector<1x32xf32> to vector<1xf32>
    %1265 = vector.shape_cast %1264 : vector<1xf32> to vector<1x1xf32>
    %1266 = math.log %1265 : vector<1x1xf32>
    %1267 = vector.broadcast %1266 : vector<1x1xf32> to vector<1x32xf32>
    %1268 = arith.subf %1262, %1267 : vector<1x32xf32>
    %cst_327 = arith.constant dense<0.000000e+00> : vector<1x8xf32>
    %1269 = tpu.matmul %1254, %986, %cst_327 {dimension_numbers = #tpu.dot_dimension_numbers<[1], [0], [0], [1], [0, 0, 1, 1], [], []>} : vector<1x24xf32>, vector<24x8xf32>, vector<1x8xf32> -> vector<1x8xf32>
    %c5_328 = arith.constant 5 : index
    %c0_329 = arith.constant 0 : index
    %1270 = vector.load %arg8[%c5_328, %c0_329] : memref<6x32xf32, #tpu.memory_space<vmem>>, vector<1x32xf32>
    tpu.vector_store %arg8[%c5_328, %c0_329], %1268 {strides = array<i32>} : memref<6x32xf32, #tpu.memory_space<vmem>>, vector<1x32xf32>,
    %c5_330 = arith.constant 5 : index
    %c0_331 = arith.constant 0 : index
    %1271 = vector.load %arg10[%c5_330, %c0_331] : memref<6x3xf32, #tpu.memory_space<vmem>>, vector<1x3xf32>
    tpu.vector_store %arg10[%c5_330, %c0_331], %1248 {strides = array<i32>} : memref<6x3xf32, #tpu.memory_space<vmem>>, vector<1x3xf32>,
    %c5_332 = arith.constant 5 : index
    %c0_333 = arith.constant 0 : index
    %1272 = vector.load %arg9[%c5_332, %c0_333] : memref<6x8xf32, #tpu.memory_space<vmem>>, vector<1x8xf32>
    tpu.vector_store %arg9[%c5_332, %c0_333], %1269 {strides = array<i32>} : memref<6x8xf32, #tpu.memory_space<vmem>>, vector<1x8xf32>,
    %c5_334 = arith.constant 5 : index
    %c0_335 = arith.constant 0 : index
    %1273 = vector.load %arg11[%c5_334, %c0_335] : memref<6x8xf32, #tpu.memory_space<vmem>>, vector<1x8xf32>
    tpu.vector_store %arg11[%c5_334, %c0_335], %1229 {strides = array<i32>} : memref<6x8xf32, #tpu.memory_space<vmem>>, vector<1x8xf32>,
    return
  }
}

</mosaic_0001>

<bundles_post_ra>
// kernel: forward.1
= control target key start
LH: loop header
LB: loop body
LE: loop exit
PB: predicated region body
PF: predicated region fallthrough
CT: control target
= control target key end

     0   :  { %18 = vsyncpa [#allocation5], 0  ;;  %s8129_s0 = inlined_call_operand.vmem [shape: s32[24,1], index: 0, kind: input, shape index: {}]   ;;  %s8130_s1 = inlined_call_operand.vmem [shape: s32[6,1], index: 1, kind: input, shape index: {}]   ;;  %s8131_s2 = inlined_call_operand.vmem [shape: f32[32,32], index: 2, kind: input, shape index: {}]   ;;  %s8132_s3 = inlined_call_operand.hbm [shape: f32[128,96], index: 3, kind: input, shape index: {}]   ;;  %s8133_s4 = inlined_call_operand.vmem [shape: f32[32,128], index: 4, kind: input, shape index: {}]   ;;  %s8134_s5 = inlined_call_operand.hbm [shape: f32[14,96], index: 5, kind: input, shape index: {}]   ;;  %s8135_s6 = inlined_call_operand.vmem [shape: f32[2,24], index: 6, kind: input, shape index: {}]   ;;  %s8136_s7 = inlined_call_operand.hbm [shape: f32[24,8], index: 7, kind: input, shape index: {}]   ;;  %s8137_s8 = inlined_call_operand.vmem [shape: f32[6,32], index: 8, kind: output, shape index: {0}]   ;;  %s8138_s9 = inlined_call_operand.vmem [shape: f32[6,8], index: 9, kind: output, shape index: {1}]   ;;  %s8139_s10 = inlined_call_operand.vmem [shape: f32[6,3], index: 10, kind: output, shape index: {2}]   ;;  %s8140_s11 = inlined_call_operand.vmem [shape: f32[6,8], index: 11, kind: output, shape index: {3}]   ;;  %s8141_s12 = inlined_call_operand.vmem [shape: f32[3,32], index: 12, kind: output, shape index: {4}]  }
   0x1   :  { %19 = vsyncpa [#allocation7], 0  ;;  %s6821_s21 = smov [#allocation6]   ;;  %s6822_s23 = smov [#allocation4]  }
   0x2   :  { %s45_s22 = sshll.u32 %s6821_s21, 4  ;;  %s31_s24 = sshll.u32 %s6822_s23, 4  ;;  %s46_s22 = int_to_ptr.vmem [resolvable:$true] %s45_s22  ;;  %s32_s24 = int_to_ptr.vmem [resolvable:$true] %s31_s24 }
   0x3   :  { %s6765_s25 = scalar_lea.vmem %s46_s22, 256  ;;  %p6770_p1 = scmp.lt.s32.totalorder %s46_s22, %s46_s22 }
   0x4   :  { %p6766_p0 = scmp.ne.s32.totalorder %s46_s22, %s6765_s25  ;;  %p6771_p2 = scmp.lt.s32.totalorder %s6765_s25, %s6765_s25 }
   0x6   :  { %p6772_p3 = por %p6771_p2, %p6770_p1 }
   0x8   :  { %p6773_p4 = pnand %p6772_p3, %p6766_p0 }
   0xa   :  { %6776 = shalt.err (!%p6773_p4)
}
   0xb   :  { %s6823_s26 = smov 128   ;;  %s6824_s27 = smov 8  }
   0xc   :  { %51 = dma.hbm_to_vmem [thread:$0]  %s8134_s5, 256, %s46_s22, [#allocation7], %s6823_s26, %s6823_s26, %s6824_s27  }
   0xd   :  { %s6785_s30 = scalar_lea.vmem %s32_s24, 2048  ;;  %p6790_p6 = scmp.lt.s32.totalorder %s32_s24, %s32_s24 }
   0xe   :  { %p6786_p5 = scmp.ne.s32.totalorder %s32_s24, %s6785_s30  ;;  %p6791_p7 = scmp.lt.s32.totalorder %s6785_s30, %s6785_s30 }
  0x10   :  { %p6792_p8 = por %p6791_p7, %p6790_p6 }
  0x12   :  { %p6793_p9 = pnand %p6792_p8, %p6786_p5 }
  0x14   :  { %6796 = shalt.err (!%p6793_p9)
}
  0x15   :  { %37 = dma.hbm_to_vmem [thread:$0]  %s8132_s3, 2048, %s32_s24, [#allocation5], %s6823_s26, %s6823_s26, %s6824_s27  }
  0x16   :  { %s6825_s15 = smov [#allocation8]  }
  0x17   :  { %s59_s16 = sshll.u32 %s6825_s15, 4  ;;  %s60_s16 = int_to_ptr.vmem [resolvable:$true] %s59_s16 }
  0x18   :  { %s6805_s17 = scalar_lea.vmem %s60_s16, 384  ;;  %p6810_p11 = scmp.lt.s32.totalorder %s60_s16, %s60_s16 }
  0x19   :  { %p6806_p10 = scmp.ne.s32.totalorder %s60_s16, %s6805_s17  ;;  %p6811_p12 = scmp.lt.s32.totalorder %s6805_s17, %s6805_s17 }
  0x1b   :  { %p6812_p13 = por %p6811_p12, %p6810_p11 }
  0x1d   :  { %p6813_p0 = pnand %p6812_p13, %p6806_p10 }
  0x1f   :  { %6816 = shalt.err (!%p6813_p0)
}
  0x20   :  { %65 = dma.hbm_to_vmem [thread:$0]  %s8136_s7, 384, %s60_s16, [#allocation7], %s6823_s26, %s6823_s26, %s6824_s27  }
  0x21   :  { %6817 = dma.done.wait [#allocation5], 2048  }
  0x22   :  { %6818 = vsyncadd [#allocation5], 4294965248 }
  0x23   :  { %6819 = dma.done.wait [#allocation7], 640  }
  0x24   :  { %6820 = vsyncadd [#allocation7], 4294966656  ;;  %v6826_v0 = vmov 0   ;;  %v6827_v1 = vmov 0.0   ;;  %vm6828_vm0 = vmmov 0   ;;  %v81_v2 = vld [vmem:[%s8129_s0] sm:$0xff]  ;;  %v79_v10 = vlaneseq }
  0x25   :  { %6487 = vset.pattern.permute.xlu0 %v6826_v0  ;;  %6488 = vset.pattern.permute.xlu1 %v6826_v0  ;;  %v83_v3 = vld [vmem:[%s8129_s0 + $0x10] sm:$0xff]  ;;  %v78_v4 = vld [vmem:[%s8131_s2 + $0x18] sm:$0xff]  ;;  %v82_v5 = vld [vmem:[%s8129_s0 + $0x8] sm:$0xff]  ;;  %s6829_s0 = smov 112   ;;  %vm102_vm1 = vcmask 261120   ;;  %vm297_vm6 = vcmask 130048  }
  0x26   :  { %6009 = vmatprep.subr.mxu0 %v6827_v1  ;;  %6026 = vmatprep.subr.mxu1 %v6827_v1  ;;  %v192_v6 = vld [vmem:[%s8130_s1] sm:$0x3f]  ;;  %v77_v7 = vld [vmem:[%s8131_s2 + $0x10] sm:$0xff]  ;;  %v76_v8 = vld [vmem:[%s8131_s2 + $0x8] sm:$0xff]  ;;  %v80_v11 = vand.u32 127, %v79_v10  ;;  %s6831_s14 = smov 32  }
  0x27   :  { %6017 = vmatprep.mubr.msk.f32.mxu0 %vm6828_vm0, %v6827_v1  ;;  %6034 = vmatprep.mubr.msk.f32.mxu1 %vm6828_vm0, %v6827_v1  ;;  %v75_v9 = vld [vmem:[%s8131_s2] sm:$0xff]  ;;  %v6950_v14 = vld [vmem:[#allocation4 + $0x18] sm:$0xff]  ;;  %v6954_v16 = vld [vmem:[#allocation4 + $0x10] sm:$0xff]  ;;  %s6830_s2 = smov 96   ;;  %s6832_s15 = smov 80   ;;  %vm523_vm7 = vcmask 1042432  }
  0x28   :  { %85 = vperm.xlu0 %6487, %v81_v2   ;;  %91 = vperm.xlu1 %6488, %v83_v3   ;;  %v289_v25 = vld [vmem:[#allocation4 + $0x8] sm:$0xff]  ;;  %v288_v27 = vld [vmem:[#allocation4] sm:$0xff]  ;;  %s6833_s16 = smov 48   ;;  %vm880_vm8 = vcmask 1043456   ;;  %vm873_vm9 = vcmask 1041408   ;;  %vm1381_vm10 = vcmask 1044480  }
  0x29   :  { %6010 = vmatpush3.msra.mxu0 %v78_v4  ;;  %v6998_v34 = vld [vmem:[#allocation6 + $0x1] ss:$0 sm:$0xff]  ;;  %v5695_v41 = vld [vmem:[#allocation6] ss:$0 sm:$0xff]  ;;  %vm1374_vm11 = vcmask 1040384   ;;  %vm894_vm12 = vcmask 130054  }
  0x2a   :  { %6011 = vmatprep.subr.mxu0 %v6827_v1  ;;  %vm1405_vm13 = vcmask 261254   ;;  %vm1030_vm14 = vcmask 125953   ;;  %vm1190_vm15 = vcmask 257153   ;;  %s6834_s20 = smov 64  }
  0x2b   :  { %6012 = vmatpush3.msra.mxu0 %v77_v7 }
  0x2c   :  { %88 = vperm.xlu0 %6487, %v82_v5   ;;  %194 = vperm.xlu1 %6488, %v192_v6  }
  0x2d   :  { %6013 = vmatprep.subr.mxu0 %v6827_v1 }
  0x2e   :  { %6014 = vmatpush3.msra.mxu0 %v76_v8 }
  0x2f   :  { %6015 = vmatprep.subr.mxu0 %v6827_v1 }
  0x30   :  { %209 = vrot.lane.b32.xlu0 %v78_v4, %s6829_s0  ;;  %207 = vrot.lane.b32.xlu1 %v77_v7, %s6829_s0 }
  0x31   :  { %6016 = vmatpush3.msra.mxu0 %v75_v9 }
  0x32   :  { %6050 = vmatprep.subr.mxu0 %v6827_v1 }
  0x34   :  { %205 = vrot.lane.b32.xlu0 %v76_v8, %s6829_s0  ;;  %203 = vrot.lane.b32.xlu1 %v75_v9, %s6829_s0 }
  0xa3   :  { %v86_v12 = vpop.permute.xlu0 %85  ;;  %v92_v13 = vpop.permute.xlu1 %91 }
  0xa4   :  { %vm93_vm2 = vcmp.eq.s32.totalorder %v86_v12, %v80_v11  ;;  %vm95_vm3 = vcmp.eq.s32.totalorder %v92_v13, %v80_v11 }
  0xa5   :  { %v5687_v15 = vsel %vm93_vm2, 1.0, %v6827_v1  ;;  %v5689_v20 = vsel %vm95_vm3, 1.0, %v6827_v1  ;;  %vm1035_vm2 = vcmask 260228   ;;  %vm1185_vm3 = vcmask 129028  }
  0xa6   :  { %6018 = vmatmul.mubr.msk.f32.vlgmr.msra.gmra.mxu0 %vm102_vm1, %v5687_v15 }
  0xa7   :  { %v89_v17 = vpop.permute.xlu0 %88  ;;  %v195_v18 = vpop.permute.xlu1 %194  ;;  %6020 = vmatprep.mubr.msk.f32.mxu0 %vm6828_vm0, %v6827_v1  ;;  %6051 = vmatpush3.msra.mxu0 %v6950_v14 }
  0xa8   :  { %vm94_vm4 = vcmp.eq.s32.totalorder %v89_v17, %v80_v11  ;;  %6052 = vmatprep.subr.mxu0 %v6827_v1  ;;  %vm196_vm5 = vcmp.eq.s32.totalorder %v195_v18, %v80_v11 }
  0xa9   :  { %v5688_v19 = vsel %vm94_vm4, 1.0, %v6827_v1  ;;  %6053 = vmatpush3.msra.mxu0 %v6954_v16  ;;  %v5693_v26 = vsel %vm196_vm5, 1.0, %v6827_v1  ;;  %vm2082_vm4 = vcmask 123905   ;;  %vm2084_vm5 = vcmask 255105  }
  0xaa   :  { %6021 = vmatmul.mubr.msk.f32.gmra.mxu0 %vm102_vm1, %v5688_v19  ;;  %6057 = vmatprep.subr.mxu0 %v6827_v1 }
  0xab   :  { %v210_v21 = vpop.permute.xlu0 %209  ;;  %v208_v22 = vpop.permute.xlu1 %207  ;;  %6023 = vmatprep.mubr.msk.f32.mxu0 %vm6828_vm0, %v6827_v1 }
  0xac   :  { %6027 = vmatpush3.msra.mxu1 %v210_v21 }
  0xad   :  { %6028 = vmatprep.subr.mxu1 %v6827_v1 }
  0xae   :  { %6024 = vmatmul.mubr.msk.f32.gmra.mxu0 %vm102_vm1, %v5689_v20  ;;  %6029 = vmatpush3.msra.mxu1 %v208_v22 }
  0xaf   :  { %6030 = vmatprep.subr.mxu1 %v6827_v1  ;;  %v206_v23 = vpop.permute.xlu0 %205  ;;  %v204_v24 = vpop.permute.xlu1 %203  ;;  %6054 = vmatprep.mubr.msk.f32.mxu0 %vm6828_vm0, %v6827_v1 }
  0xb0   :  { %6031 = vmatpush3.msra.mxu1 %v206_v23 }
  0xb1   :  { %6032 = vmatprep.subr.mxu1 %v6827_v1 }
  0xb2   :  { %6033 = vmatpush3.msra.mxu1 %v204_v24  ;;  %6055 = vmatmul.mubr.f32.vlgmr.msra.gmra.mxu0 %v6827_v1 }
  0xb3   :  { %6035 = vmatmul.mubr.msk.f32.vlgmr.msra.gmra.mxu1 %vm102_vm1, %v5693_v26  ;;  %6037 = vmatprep.subr.mxu1 %v6827_v1 }
  0xb4   :  { %6038 = vmatpush3.msra.mxu1 %v289_v25  ;;  %6041 = vmatprep.mubr.msk.f32.mxu1 %vm6828_vm0, %v6827_v1 }
  0xb5   :  { %6039 = vmatprep.subr.mxu1 %v6827_v1  ;;  %6058 = vmatpush3.msra.mxu0 %v6950_v14 }
  0xb6   :  { %6040 = vmatpush3.msra.mxu1 %v288_v27  ;;  %6059 = vmatprep.subr.mxu0 %v6827_v1 }
  0xb7   :  { %6060 = vmatpush3.msra.mxu0 %v6954_v16  ;;  %6061 = vmatprep.mubr.msk.f32.mxu0 %vm6828_vm0, %v6827_v1 }
  0xb8   :  { %6064 = vmatprep.subr.mxu1 %v6827_v1  ;;  %6071 = vmatprep.subr.mxu0 %v6827_v1 }
 0x166   :  { %v178_v28 = vpop.f32.mrf.mxu0 }
 0x167   :  { %6042 = vmatmul.mubr.msk.f32.vlgmr.msra.gmra.mxu1 %vm297_vm6, %v178_v28 }
 0x168   :  { %v6019_v29 = vpop.f32.mrf.mxu0  ;;  %6044 = vmatprep.mubr.msk.f32.mxu1 %vm6828_vm0, %v6827_v1  ;;  %6065 = vmatpush3.msra.mxu1 %v6950_v14 }
 0x169   :  { %6066 = vmatprep.subr.mxu1 %v6827_v1 }
 0x16a   :  { %v183_v30 = vpop.f32.mrf.mxu0  ;;  %6067 = vmatpush3.msra.mxu1 %v6954_v16 }
 0x16b   :  { %6045 = vmatmul.mubr.msk.f32.gmra.mxu1 %vm297_vm6, %v183_v30  ;;  %6078 = vmatprep.subr.mxu1 %v6827_v1 }
 0x16c   :  { %v6022_v31 = vpop.f32.mrf.mxu0  ;;  %6047 = vmatprep.mubr.msk.f32.mxu1 %vm6828_vm0, %v6827_v1 }
 0x16e   :  { %v188_v32 = vpop.f32.mrf.mxu0 }
 0x16f   :  { %6048 = vmatmul.mubr.msk.f32.gmra.mxu1 %vm297_vm6, %v188_v32 }
 0x170   :  { %v6025_v33 = vpop.f32.mrf.mxu0  ;;  %6068 = vmatprep.mubr.msk.f32.mxu1 %vm6828_vm0, %v6827_v1 }
 0x172   :  { %v461_v35 = vpop.f32.mrf.mxu0 }
 0x173   :  { %v7002_v36 = vpop.f32.mrf.mxu1  ;;  %v462_v37 = vadd.f32 %v6998_v34, %v461_v35 }
 0x174   :  { %v6056_v38 = vpop.f32.mrf.mxu0 }
 0x175   :  { %v6036_v39 = vpop.f32.mrf.mxu1  ;;  %473 = vrot.lane.b32.xlu1 %v462_v37, %s6830_s2  ;;  %v491_v40 = vrot.slane %v462_v37, 6 }
 0x177   :  { %500 = vrot.lane.b32.xlu0 %v491_v40, %s6830_s2 }
 0x1e7   :  { %v474_v59 = vpop.permute.xlu1 %473 }
 0x1e9   :  { %v501_v62 = vpop.permute.xlu0 %500 }
 0x227   :  { %v373_v42 = vpop.f32.mrf.mxu1 }
 0x228   :  { %v7007_v43 = vadd.f32 %v5695_v41, %v373_v42 }
 0x229   :  { %v6043_v44 = vpop.f32.mrf.mxu1 }
 0x22a   :  { %v465_v45 = vadd.f32 %v462_v37, %v7007_v43 }
 0x22b   :  { %v378_v46 = vpop.f32.mrf.mxu1 }
 0x22c   :  { %v7010_v47 = vadd.f32 %v5695_v41, %v378_v46  ;;  %v5700_v48 = vmul.f32 -1.442695, %v465_v45 }
 0x22d   :  { %v6046_v49 = vpop.f32.mrf.mxu1 }
 0x22e   :  { %6489 = vpow2.f32 %v5700_v48 }
 0x22f   :  { %v383_v50 = vpop.f32.mrf.mxu1 }
 0x230   :  { %v7012_v51 = vadd.f32 %v5695_v41, %v383_v50 }
 0x231   :  { %v6049_v52 = vpop.f32.mrf.mxu1 }
 0x232   :  { %v493_v53 = vadd.f32 %v491_v40, %v7012_v51 }
 0x234   :  { %v5701_v54 = vmul.f32 -1.442695, %v493_v53 }
 0x236   :  { %6491 = vpow2.f32 %v5701_v54 }
 0x23b   :  { %v6490_v55 = vpop.eup %6489 }
 0x23c   :  { %v469_v56 = vadd.f32 1.0, %v6490_v55 }
 0x23e   :  { %6493 = vrcp.f32 %v469_v56 }
 0x243   :  { %v6492_v57 = vpop.eup %6491 }
 0x244   :  { %v497_v58 = vadd.f32 1.0, %v6492_v57 }
 0x246   :  { %6495 = vrcp.f32 %v497_v58 }
 0x24b   :  { %v6494_v60 = vpop.eup %6493 }
 0x24c   :  { %v476_v61 = vmul.f32 %v6494_v60, %v474_v59  ;;  %v483_v19 = vsub.f32 1.0, %v6494_v60  ;;  %v489_v21 = vmul.f32 0.0, %v6494_v60 }
 0x24e   :  { %478 = vrot.lane.b32.xlu1 %v476_v61, %s6831_s14 }
 0x253   :  { %v6496_v63 = vpop.eup %6495 }
 0x254   :  { %v503_v2 = vmul.f32 %v6496_v63, %v501_v62  ;;  %v510_v9 = vsub.f32 1.0, %v6496_v63  ;;  %v516_v12 = vmul.f32 0.0, %v6496_v63 }
 0x256   :  { %505 = vrot.lane.b32.xlu0 %v503_v2, %s6831_s14 }
 0x2c0   :  { %v479_v3 = vpop.permute.xlu1 %478 }
 0x2c1   :  { %v481_v4 = vadd.f32 %v479_v3, %v7007_v43 }
 0x2c3   :  { %6497 = vtanh.f32 %v481_v4 }
 0x2c8   :  { %v506_v5 = vpop.permute.xlu0 %505 }
 0x2c9   :  { %v508_v6 = vadd.f32 %v506_v5, %v7012_v51 }
 0x2cb   :  { %6499 = vtanh.f32 %v508_v6 }
 0x2d0   :  { %v6498_v7 = vpop.eup %6497 }
 0x2d1   :  { %485 = vrot.lane.b32.xlu1 %v6498_v7, %s6829_s0 }
 0x2d8   :  { %v6500_v8 = vpop.eup %6499 }
 0x2d9   :  { %512 = vrot.lane.b32.xlu0 %v6500_v8, %s6829_s0 }
 0x343   :  { %v486_v18 = vpop.permute.xlu1 %485 }
 0x344   :  { %v488_v20 = vmul.f32 %v486_v18, %v483_v19 }
 0x346   :  { %v7025_v22 = vadd.f32 %v489_v21, %v488_v20 }
 0x34b   :  { %v513_v11 = vpop.permute.xlu0 %512 }
 0x34c   :  { %v515_v13 = vmul.f32 %v513_v11, %v510_v9 }
 0x34e   :  { %v7021_v15 = vadd.f32 %v516_v12, %v515_v13 }
 0x350   :  { %v519_v17 = vrot.slane %v7021_v15, 2 }
 0x352   :  { %520 = vrot.lane.b32.xlu0 %v519_v17, %s6832_s15 }
 0x3c4   :  { %v521_v23 = vpop.permute.xlu0 %520 }
 0x3c5   :  { %v524_v24 = vsel %vm523_vm7, %v7025_v22, %v521_v23 }
 0x3c6   :  { %537 = vrot.lane.b32.xlu1 %v524_v24, %s6829_s0  ;;  %v666_v49 = vrot.slane %v524_v24, 1  ;;  %v637_v4 = vrot.slane %v524_v24, 5 }
 0x438   :  { %v538_v25 = vpop.permute.xlu1 %537 }
 0x439   :  { %6062 = vmatmul.mubr.msk.f32.vlgmr.msra.gmra.mxu0 %vm297_vm6, %v538_v25 }
 0x43a   :  { %6072 = vmatpush3.msra.mxu0 %v6950_v14  ;;  %6075 = vmatprep.mubr.msk.f32.mxu0 %vm6828_vm0, %v6827_v1 }
 0x43b   :  { %6073 = vmatprep.subr.mxu0 %v6827_v1 }
 0x43c   :  { %6074 = vmatpush3.msra.mxu0 %v6954_v16 }
 0x43d   :  { %6085 = vmatprep.subr.mxu0 %v6827_v1 }
 0x4f9   :  { %v607_v26 = vpop.f32.mrf.mxu0 }
 0x4fa   :  { %v608_v27 = vadd.f32 %v6998_v34, %v607_v26 }
 0x4fb   :  { %v6063_v28 = vpop.f32.mrf.mxu0 }
 0x4fc   :  { %v612_v29 = vrot.slane %v608_v27, 5  ;;  %v641_v30 = vrot.slane %v608_v27, 1 }
 0x4fe   :  { %650 = vrot.lane.b32.xlu0 %v641_v30, %s6830_s2  ;;  %621 = vrot.lane.b32.xlu1 %v612_v29, %s6830_s2  ;;  %v614_v31 = vadd.f32 %v612_v29, %v7007_v43  ;;  %v643_v32 = vadd.f32 %v641_v30, %v7012_v51 }
 0x500   :  { %v5703_v33 = vmul.f32 -1.442695, %v614_v31  ;;  %v5704_v35 = vmul.f32 -1.442695, %v643_v32 }
 0x502   :  { %6501 = vpow2.f32 %v5703_v33 }
 0x503   :  { %6503 = vpow2.f32 %v5704_v35 }
 0x50f   :  { %v6502_v37 = vpop.eup %6501 }
 0x510   :  { %v6504_v38 = vpop.eup %6503  ;;  %v618_v39 = vadd.f32 1.0, %v6502_v37 }
 0x511   :  { %v647_v40 = vadd.f32 1.0, %v6504_v38 }
 0x512   :  { %6505 = vrcp.f32 %v618_v39 }
 0x513   :  { %6507 = vrcp.f32 %v647_v40 }
 0x51f   :  { %v6506_v41 = vpop.eup %6505 }
 0x520   :  { %v6508_v42 = vpop.eup %6507  ;;  %v631_v3 = vsub.f32 1.0, %v6506_v41  ;;  %v639_v6 = vmul.f32 %v6506_v41, %v637_v4 }
 0x521   :  { %v660_v58 = vsub.f32 1.0, %v6508_v42 }
 0x570   :  { %v651_v44 = vpop.permute.xlu0 %650  ;;  %v622_v45 = vpop.permute.xlu1 %621 }
 0x571   :  { %v653_v46 = vmul.f32 %v6508_v42, %v651_v44  ;;  %v624_v48 = vmul.f32 %v6506_v41, %v622_v45 }
 0x573   :  { %655 = vrot.lane.b32.xlu0 %v653_v46, %s6831_s14  ;;  %626 = vrot.lane.b32.xlu1 %v624_v48, %s6831_s14 }
 0x577   :  { %667 = vrot.lane.b32.xlu1 %v666_v49, %s6833_s16 }
 0x5e5   :  { %v656_v50 = vpop.permute.xlu0 %655  ;;  %v627_v52 = vpop.permute.xlu1 %626 }
 0x5e6   :  { %v658_v53 = vadd.f32 %v656_v50, %v7012_v51  ;;  %v629_v54 = vadd.f32 %v627_v52, %v7007_v43 }
 0x5e8   :  { %6509 = vtanh.f32 %v658_v53 }
 0x5e9   :  { %6511 = vtanh.f32 %v629_v54  ;;  %v668_v57 = vpop.permute.xlu1 %667 }
 0x5ea   :  { %v670_v60 = vmul.f32 %v6508_v42, %v668_v57 }
 0x5f5   :  { %v6510_v55 = vpop.eup %6509 }
 0x5f6   :  { %662 = vrot.lane.b32.xlu0 %v6510_v55, %s6829_s0  ;;  %v6512_v56 = vpop.eup %6511 }
 0x5fa   :  { %633 = vrot.lane.b32.xlu0 %v6512_v56, %s6829_s0 }
 0x668   :  { %v663_v59 = vpop.permute.xlu0 %662 }
 0x669   :  { %v665_v61 = vmul.f32 %v663_v59, %v660_v58 }
 0x66b   :  { %v7049_v62 = vadd.f32 %v670_v60, %v665_v61 }
 0x66c   :  { %v634_v2 = vpop.permute.xlu0 %633 }
 0x66d   :  { %v676_v63 = vrot.slane %v7049_v62, 7  ;;  %v636_v5 = vmul.f32 %v634_v2, %v631_v3 }
 0x66f   :  { %677 = vrot.lane.b32.xlu1 %v676_v63, %s6832_s15  ;;  %v7053_v7 = vadd.f32 %v639_v6, %v636_v5 }
 0x671   :  { %v673_v8 = vrot.slane %v7053_v7, 3 }
 0x6e1   :  { %v678_v9 = vpop.permute.xlu1 %677 }
 0x6e2   :  { %v7057_v11 = vsel %vm523_vm7, %v673_v8, %v678_v9 }
 0x6e3   :  { %692 = vrot.lane.b32.xlu0 %v7057_v11, %s6829_s0  ;;  %v863_v2 = vrot.slane %v7057_v11, 4 }
 0x755   :  { %v693_v12 = vpop.permute.xlu0 %692 }
 0x756   :  { %6069 = vmatmul.mubr.msk.f32.vlgmr.msra.gmra.mxu1 %vm297_vm6, %v693_v12 }
 0x757   :  { %6079 = vmatpush3.msra.mxu1 %v6950_v14  ;;  %6082 = vmatprep.mubr.msk.f32.mxu1 %vm6828_vm0, %v6827_v1 }
 0x758   :  { %6080 = vmatprep.subr.mxu1 %v6827_v1 }
 0x759   :  { %6081 = vmatpush3.msra.mxu1 %v6954_v16 }
 0x75a   :  { %6092 = vmatprep.subr.mxu1 %v6827_v1 }
 0x816   :  { %v762_v13 = vpop.f32.mrf.mxu1 }
 0x817   :  { %v763_v17 = vadd.f32 %v6998_v34, %v762_v13 }
 0x818   :  { %v6070_v18 = vpop.f32.mrf.mxu1 }
 0x819   :  { %v767_v19 = vrot.slane %v763_v17, 2  ;;  %v818_v20 = vrot.slane %v763_v17, 4 }
 0x81b   :  { %834 = vrot.lane.b32.xlu1 %v818_v20, %s6830_s2  ;;  %783 = vrot.lane.b32.xlu0 %v767_v19, %s6830_s2  ;;  %v820_v21 = vadd.f32 %v818_v20, %v7010_v47  ;;  %v821_v23 = vadd.f32 %v818_v20, %v7012_v51  ;;  %v769_v24 = vadd.f32 %v767_v19, %v7007_v43 }
 0x81c   :  { %v770_v26 = vadd.f32 %v767_v19, %v7010_v47 }
 0x81d   :  { %v5708_v25 = vmul.f32 -1.442695, %v820_v21  ;;  %v5709_v27 = vmul.f32 -1.442695, %v821_v23  ;;  %v5706_v28 = vmul.f32 -1.442695, %v769_v24 }
 0x81e   :  { %v5707_v29 = vmul.f32 -1.442695, %v770_v26 }
 0x81f   :  { %6513 = vpow2.f32 %v5708_v25 }
 0x820   :  { %6515 = vpow2.f32 %v5709_v27 }
 0x821   :  { %6517 = vpow2.f32 %v5706_v28 }
 0x822   :  { %6519 = vpow2.f32 %v5707_v29  ;;  %v812_v29 = vrot.slane %v7057_v11, 2 }
 0x82c   :  { %v6514_v30 = vpop.eup %6513 }
 0x82d   :  { %v6516_v31 = vpop.eup %6515  ;;  %v828_v32 = vadd.f32 1.0, %v6514_v30 }
 0x82e   :  { %v6518_v33 = vpop.eup %6517  ;;  %v829_v35 = vadd.f32 1.0, %v6516_v31 }
 0x82f   :  { %v6520_v37 = vpop.eup %6519  ;;  %v777_v38 = vadd.f32 1.0, %v6518_v33  ;;  %6521 = vrcp.f32 %v828_v32 }
 0x830   :  { %v778_v39 = vadd.f32 1.0, %v6520_v37  ;;  %6523 = vrcp.f32 %v829_v35 }
 0x831   :  { %6525 = vrcp.f32 %v777_v38 }
 0x832   :  { %6527 = vrcp.f32 %v778_v39 }
 0x83c   :  { %v6522_v40 = vpop.eup %6521 }
 0x83d   :  { %v6524_v41 = vpop.eup %6523  ;;  %v851_v9 = vsub.f32 1.0, %v6522_v40 }
 0x83e   :  { %v6526_v48 = vpop.eup %6525  ;;  %v852_v8 = vsub.f32 1.0, %v6524_v41 }
 0x83f   :  { %v6528_v49 = vpop.eup %6527  ;;  %v800_v30 = vsub.f32 1.0, %v6526_v48  ;;  %v814_v35 = vmul.f32 %v6526_v48, %v812_v29 }
 0x840   :  { %v801_v27 = vsub.f32 1.0, %v6528_v49  ;;  %v815_v33 = vmul.f32 %v6528_v49, %v812_v29 }
 0x88d   :  { %v835_v42 = vpop.permute.xlu1 %834  ;;  %v784_v46 = vpop.permute.xlu0 %783 }
 0x88e   :  { %v837_v44 = vmul.f32 %v6522_v40, %v835_v42  ;;  %v838_v45 = vmul.f32 %v6524_v41, %v835_v42  ;;  %v786_v50 = vmul.f32 %v6526_v48, %v784_v46  ;;  %v787_v52 = vmul.f32 %v6528_v49, %v784_v46 }
 0x890   :  { %841 = vrot.lane.b32.xlu1 %v837_v44, %s6831_s14  ;;  %843 = vrot.lane.b32.xlu0 %v838_v45, %s6831_s14 }
 0x894   :  { %792 = vrot.lane.b32.xlu0 %v787_v52, %s6831_s14  ;;  %790 = vrot.lane.b32.xlu1 %v786_v50, %s6831_s14 }
 0x902   :  { %v842_v53 = vpop.permute.xlu1 %841  ;;  %v844_v54 = vpop.permute.xlu0 %843 }
 0x903   :  { %v847_v55 = vadd.f32 %v842_v53, %v7010_v47  ;;  %v848_v56 = vadd.f32 %v844_v54, %v7012_v51 }
 0x905   :  { %6529 = vtanh.f32 %v847_v55 }
 0x906   :  { %6531 = vtanh.f32 %v848_v56  ;;  %v793_v57 = vpop.permute.xlu0 %792  ;;  %v791_v58 = vpop.permute.xlu1 %790 }
 0x907   :  { %v796_v59 = vadd.f32 %v791_v58, %v7007_v43  ;;  %v797_v60 = vadd.f32 %v793_v57, %v7010_v47 }
 0x909   :  { %6533 = vtanh.f32 %v796_v59 }
 0x90a   :  { %6535 = vtanh.f32 %v797_v60 }
 0x912   :  { %v6530_v61 = vpop.eup %6529 }
 0x913   :  { %v6532_v63 = vpop.eup %6531  ;;  %855 = vrot.lane.b32.xlu1 %v6530_v61, %s6829_s0 }
 0x914   :  { %857 = vrot.lane.b32.xlu0 %v6532_v63, %s6829_s0 }
 0x916   :  { %v6534_v3 = vpop.eup %6533 }
 0x917   :  { %864 = vrot.lane.b32.xlu1 %v863_v2, %s6833_s16  ;;  %v6536_v4 = vpop.eup %6535 }
 0x918   :  { %804 = vrot.lane.b32.xlu0 %v6534_v3, %s6829_s0 }
 0x91b   :  { %806 = vrot.lane.b32.xlu1 %v6536_v4, %s6829_s0 }
 0x985   :  { %v856_v5 = vpop.permute.xlu1 %855 }
 0x986   :  { %v858_v6 = vpop.permute.xlu0 %857  ;;  %v861_v17 = vmul.f32 %v856_v5, %v851_v9 }
 0x987   :  { %v862_v13 = vmul.f32 %v858_v6, %v852_v8 }
 0x989   :  { %v865_v12 = vpop.permute.xlu1 %864 }
 0x98a   :  { %v867_v18 = vmul.f32 %v6522_v40, %v865_v12  ;;  %v868_v19 = vmul.f32 %v6524_v41, %v865_v12  ;;  %v805_v28 = vpop.permute.xlu0 %804 }
 0x98b   :  { %v810_v32 = vmul.f32 %v805_v28, %v800_v30 }
 0x98c   :  { %v7089_v20 = vadd.f32 %v867_v18, %v861_v17  ;;  %v7091_v21 = vadd.f32 %v868_v19, %v862_v13 }
 0x98d   :  { %v807_v26 = vpop.permute.xlu1 %806  ;;  %v7099_v38 = vadd.f32 %v814_v35, %v810_v32 }
 0x98e   :  { %v881_v23 = vrot.slane %v7089_v20, 4  ;;  %v882_v24 = vrot.slane %v7091_v21, 4  ;;  %v811_v31 = vmul.f32 %v807_v26, %v801_v27 }
 0x98f   :  { %v874_v40 = vrot.slane %v7099_v38, 6 }
 0x990   :  { %v883_v25 = vsel %vm880_vm8, %v881_v23, %v882_v24  ;;  %v7097_v37 = vadd.f32 %v815_v33, %v811_v31  ;;  %vm1697_vm8 = vcmask 256128  }
 0x991   :  { %884 = vrot.lane.b32.xlu0 %v883_v25, %s6832_s15 }
 0x992   :  { %v875_v39 = vrot.slane %v7097_v37, 6 }
 0x994   :  { %v876_v42 = vsel %vm873_vm9, %v874_v40, %v875_v39 }
 0xa03   :  { %v885_v41 = vpop.permute.xlu0 %884 }
 0xa04   :  { %v887_v44 = vsel %vm523_vm7, %v876_v42, %v885_v41 }
 0xa05   :  { %909 = vrot.lane.b32.xlu1 %v887_v44, %s6829_s0  ;;  %v1009_v58 = vrot.slane %v887_v44, 7 }
 0xa77   :  { %v910_v11 = vpop.permute.xlu1 %909 }
 0xa78   :  { %6076 = vmatmul.mubr.msk.f32.vlgmr.msra.gmra.mxu0 %vm297_vm6, %v910_v11 }
 0xa79   :  { %6086 = vmatpush3.msra.mxu0 %v6950_v14  ;;  %6089 = vmatprep.mubr.msk.f32.mxu0 %vm6828_vm0, %v6827_v1 }
 0xa7a   :  { %6087 = vmatprep.subr.mxu0 %v6827_v1 }
 0xa7b   :  { %6088 = vmatpush3.msra.mxu0 %v6954_v16 }
 0xa7c   :  { %6099 = vmatprep.subr.mxu0 %v6827_v1 }
 0xb38   :  { %v979_v45 = vpop.f32.mrf.mxu0 }
 0xb39   :  { %v980_v46 = vadd.f32 %v6998_v34, %v979_v45 }
 0xb3a   :  { %v6077_v48 = vpop.f32.mrf.mxu0 }
 0xb3b   :  { %v984_v49 = vrot.slane %v980_v46, 7 }
 0xb3d   :  { %993 = vrot.lane.b32.xlu0 %v984_v49, %s6830_s2  ;;  %v986_v50 = vadd.f32 %v984_v49, %v7010_v47 }
 0xb3f   :  { %v5711_v52 = vmul.f32 -1.442695, %v986_v50 }
 0xb41   :  { %6537 = vpow2.f32 %v5711_v52 }
 0xb4e   :  { %v6538_v53 = vpop.eup %6537 }
 0xb4f   :  { %v990_v54 = vadd.f32 1.0, %v6538_v53 }
 0xb51   :  { %6539 = vrcp.f32 %v990_v54 }
 0xb5e   :  { %v6540_v55 = vpop.eup %6539 }
 0xb5f   :  { %v1003_v2 = vsub.f32 1.0, %v6540_v55  ;;  %v1011_v9 = vmul.f32 %v6540_v55, %v1009_v58 }
 0xbaf   :  { %v994_v56 = vpop.permute.xlu0 %993 }
 0xbb0   :  { %v996_v57 = vmul.f32 %v6540_v55, %v994_v56 }
 0xbb2   :  { %998 = vrot.lane.b32.xlu1 %v996_v57, %s6831_s14 }
 0xbb6   :  { %1013 = vrot.lane.b32.xlu1 %v1009_v58, %s6833_s16 }
 0xc24   :  { %v999_v59 = vpop.permute.xlu1 %998 }
 0xc25   :  { %v1001_v60 = vadd.f32 %v999_v59, %v7010_v47 }
 0xc27   :  { %6541 = vtanh.f32 %v1001_v60 }
 0xc28   :  { %v1014_v63 = vpop.permute.xlu1 %1013 }
 0xc29   :  { %v1016_v4 = vmul.f32 %v6540_v55, %v1014_v63 }
 0xc34   :  { %v6542_v61 = vpop.eup %6541 }
 0xc35   :  { %1005 = vrot.lane.b32.xlu0 %v6542_v61, %s6829_s0 }
 0xca7   :  { %v1006_v3 = vpop.permute.xlu0 %1005 }
 0xca8   :  { %v1008_v5 = vmul.f32 %v1006_v3, %v1003_v2 }
 0xcaa   :  { %v7120_v6 = vadd.f32 %v1016_v4, %v1008_v5  ;;  %v7124_v12 = vadd.f32 %v1011_v9, %v1008_v5 }
 0xcac   :  { %v1022_v8 = vrot.slane %v7120_v6, 1  ;;  %v1019_v13 = vrot.slane %v7124_v12, 1 }
 0xcae   :  { %1023 = vrot.lane.b32.xlu0 %v1022_v8, %s6832_s15 }
 0xd20   :  { %v1024_v17 = vpop.permute.xlu0 %1023 }
 0xd21   :  { %v1026_v18 = vsel %vm523_vm7, %v1019_v13, %v1024_v17 }
 0xd22   :  { %1038 = vrot.lane.b32.xlu1 %v1026_v18, %s6829_s0  ;;  %v1167_v46 = vrot.slane %v1026_v18, 2  ;;  %v1138_v3 = vrot.slane %v1026_v18, 4 }
 0xd94   :  { %v1039_v19 = vpop.permute.xlu1 %1038 }
 0xd95   :  { %6083 = vmatmul.mubr.msk.f32.vlgmr.msra.gmra.mxu1 %vm297_vm6, %v1039_v19 }
 0xd96   :  { %6093 = vmatpush3.msra.mxu1 %v6950_v14  ;;  %6096 = vmatprep.mubr.msk.f32.mxu1 %vm6828_vm0, %v6827_v1 }
 0xd97   :  { %6094 = vmatprep.subr.mxu1 %v6827_v1 }
 0xd98   :  { %6095 = vmatpush3.msra.mxu1 %v6954_v16 }
 0xd99   :  { %6106 = vmatprep.subr.mxu1 %v6827_v1 }
 0xe55   :  { %v1108_v23 = vpop.f32.mrf.mxu1 }
 0xe56   :  { %v1109_v24 = vadd.f32 %v6998_v34, %v1108_v23 }
 0xe57   :  { %v6084_v25 = vpop.f32.mrf.mxu1 }
 0xe58   :  { %v1113_v26 = vrot.slane %v1109_v24, 4  ;;  %v1142_v27 = vrot.slane %v1109_v24, 2 }
 0xe5a   :  { %1151 = vrot.lane.b32.xlu0 %v1142_v27, %s6830_s2  ;;  %1122 = vrot.lane.b32.xlu1 %v1113_v26, %s6830_s2  ;;  %v1115_v28 = vadd.f32 %v1113_v26, %v7010_v47  ;;  %v1144_v29 = vadd.f32 %v1142_v27, %v7010_v47 }
 0xe5c   :  { %v5713_v30 = vmul.f32 -1.442695, %v1115_v28  ;;  %v5714_v31 = vmul.f32 -1.442695, %v1144_v29 }
 0xe5e   :  { %6543 = vpow2.f32 %v5713_v30 }
 0xe5f   :  { %6545 = vpow2.f32 %v5714_v31 }
 0xe6b   :  { %v6544_v32 = vpop.eup %6543 }
 0xe6c   :  { %v6546_v33 = vpop.eup %6545  ;;  %v1119_v35 = vadd.f32 1.0, %v6544_v32 }
 0xe6d   :  { %v1148_v39 = vadd.f32 1.0, %v6546_v33 }
 0xe6e   :  { %6547 = vrcp.f32 %v1119_v35 }
 0xe6f   :  { %6549 = vrcp.f32 %v1148_v39 }
 0xe7b   :  { %v6548_v40 = vpop.eup %6547 }
 0xe7c   :  { %v6550_v41 = vpop.eup %6549  ;;  %v1132_v2 = vsub.f32 1.0, %v6548_v40  ;;  %v1140_v5 = vmul.f32 %v6548_v40, %v1138_v3 }
 0xe7d   :  { %v1161_v56 = vsub.f32 1.0, %v6550_v41 }
 0xecc   :  { %v1152_v42 = vpop.permute.xlu0 %1151  ;;  %v1123_v44 = vpop.permute.xlu1 %1122 }
 0xecd   :  { %v1154_v11 = vmul.f32 %v6550_v41, %v1152_v42  ;;  %v1125_v45 = vmul.f32 %v6548_v40, %v1123_v44 }
 0xecf   :  { %1156 = vrot.lane.b32.xlu0 %v1154_v11, %s6831_s14  ;;  %1127 = vrot.lane.b32.xlu1 %v1125_v45, %s6831_s14 }
 0xed3   :  { %1168 = vrot.lane.b32.xlu1 %v1167_v46, %s6833_s16 }
 0xf41   :  { %v1157_v48 = vpop.permute.xlu0 %1156  ;;  %v1128_v49 = vpop.permute.xlu1 %1127 }
 0xf42   :  { %v1159_v50 = vadd.f32 %v1157_v48, %v7010_v47  ;;  %v1130_v52 = vadd.f32 %v1128_v49, %v7010_v47 }
 0xf44   :  { %6551 = vtanh.f32 %v1159_v50 }
 0xf45   :  { %6553 = vtanh.f32 %v1130_v52  ;;  %v1169_v55 = vpop.permute.xlu1 %1168 }
 0xf46   :  { %v1171_v58 = vmul.f32 %v6550_v41, %v1169_v55 }
 0xf51   :  { %v6552_v53 = vpop.eup %6551 }
 0xf52   :  { %1163 = vrot.lane.b32.xlu0 %v6552_v53, %s6829_s0  ;;  %v6554_v54 = vpop.eup %6553 }
 0xf56   :  { %1134 = vrot.lane.b32.xlu0 %v6554_v54, %s6829_s0 }
 0xfc4   :  { %v1164_v57 = vpop.permute.xlu0 %1163 }
 0xfc5   :  { %v1166_v59 = vmul.f32 %v1164_v57, %v1161_v56 }
 0xfc7   :  { %v7148_v60 = vadd.f32 %v1171_v58, %v1166_v59 }
 0xfc8   :  { %v1135_v63 = vpop.permute.xlu0 %1134 }
 0xfc9   :  { %v1177_v61 = vrot.slane %v7148_v60, 6  ;;  %v1137_v4 = vmul.f32 %v1135_v63, %v1132_v2 }
 0xfcb   :  { %1178 = vrot.lane.b32.xlu1 %v1177_v61, %s6832_s15  ;;  %v7152_v8 = vadd.f32 %v1140_v5, %v1137_v4 }
 0xfcd   :  { %v1174_v9 = vrot.slane %v7152_v8, 4 }
0x103d   :  { %v1179_v13 = vpop.permute.xlu1 %1178 }
0x103e   :  { %v7156_v17 = vsel %vm523_vm7, %v1174_v9, %v1179_v13 }
0x103f   :  { %1193 = vrot.lane.b32.xlu0 %v7156_v17, %s6829_s0  ;;  %v1364_v13 = vrot.slane %v7156_v17, 5 }
0x10b1   :  { %v1194_v19 = vpop.permute.xlu0 %1193 }
0x10b2   :  { %6090 = vmatmul.mubr.msk.f32.vlgmr.msra.gmra.mxu0 %vm297_vm6, %v1194_v19 }
0x10b3   :  { %6100 = vmatpush3.msra.mxu0 %v6950_v14  ;;  %6103 = vmatprep.mubr.msk.f32.mxu0 %vm6828_vm0, %v6827_v1 }
0x10b4   :  { %6101 = vmatprep.subr.mxu0 %v6827_v1 }
0x10b5   :  { %6102 = vmatpush3.msra.mxu0 %v6954_v16 }
0x10b6   :  { %6117 = vmatprep.subr.mxu0 %v6827_v1 }
0x1172   :  { %v1263_v18 = vpop.f32.mrf.mxu0 }
0x1173   :  { %v1264_v23 = vadd.f32 %v6998_v34, %v1263_v18 }
0x1174   :  { %v6091_v24 = vpop.f32.mrf.mxu0 }
0x1175   :  { %v1268_v25 = vrot.slane %v1264_v23, 1  ;;  %v1319_v26 = vrot.slane %v1264_v23, 5 }
0x1177   :  { %1335 = vrot.lane.b32.xlu1 %v1319_v26, %s6830_s2  ;;  %1284 = vrot.lane.b32.xlu0 %v1268_v25, %s6830_s2  ;;  %v1321_v14 = vadd.f32 %v1319_v26, %v7007_v43  ;;  %v1322_v27 = vadd.f32 %v1319_v26, %v7010_v47  ;;  %v1270_v28 = vadd.f32 %v1268_v25, %v7010_v47 }
0x1178   :  { %v1271_v16 = vadd.f32 %v1268_v25, %v7012_v51 }
0x1179   :  { %v5718_v29 = vmul.f32 -1.442695, %v1321_v14  ;;  %v5719_v30 = vmul.f32 -1.442695, %v1322_v27  ;;  %v5716_v31 = vmul.f32 -1.442695, %v1270_v28 }
0x117a   :  { %v5717_v32 = vmul.f32 -1.442695, %v1271_v16 }
0x117b   :  { %6555 = vpow2.f32 %v5718_v29 }
0x117c   :  { %6557 = vpow2.f32 %v5719_v30 }
0x117d   :  { %6559 = vpow2.f32 %v5716_v31 }
0x117e   :  { %6561 = vpow2.f32 %v5717_v32 }
0x1188   :  { %v6556_v33 = vpop.eup %6555 }
0x1189   :  { %v6558_v35 = vpop.eup %6557  ;;  %v1329_v39 = vadd.f32 1.0, %v6556_v33 }
0x118a   :  { %v6560_v40 = vpop.eup %6559  ;;  %v1330_v41 = vadd.f32 1.0, %v6558_v35 }
0x118b   :  { %v6562_v42 = vpop.eup %6561  ;;  %v1278_v44 = vadd.f32 1.0, %v6560_v40  ;;  %6563 = vrcp.f32 %v1329_v39 }
0x118c   :  { %v1279_v11 = vadd.f32 1.0, %v6562_v42  ;;  %6565 = vrcp.f32 %v1330_v41  ;;  %v1313_v41 = vrot.slane %v7156_v17, 1 }
0x118d   :  { %6567 = vrcp.f32 %v1278_v44 }
0x118e   :  { %6569 = vrcp.f32 %v1279_v11 }
0x1198   :  { %v6564_v45 = vpop.eup %6563 }
0x1199   :  { %v6566_v46 = vpop.eup %6565  ;;  %v1352_v25 = vsub.f32 1.0, %v6564_v45 }
0x119a   :  { %v6568_v53 = vpop.eup %6567  ;;  %v1353_v24 = vsub.f32 1.0, %v6566_v46 }
0x119b   :  { %v6570_v54 = vpop.eup %6569  ;;  %v1301_v42 = vsub.f32 1.0, %v6568_v53 }
0x119c   :  { %v1302_v39 = vsub.f32 1.0, %v6570_v54 }
0x11e9   :  { %v1336_v48 = vpop.permute.xlu1 %1335  ;;  %v1285_v52 = vpop.permute.xlu0 %1284 }
0x11ea   :  { %v1338_v49 = vmul.f32 %v6564_v45, %v1336_v48  ;;  %v1339_v50 = vmul.f32 %v6566_v46, %v1336_v48  ;;  %v1287_v55 = vmul.f32 %v6568_v53, %v1285_v52  ;;  %v1288_v56 = vmul.f32 %v6570_v54, %v1285_v52 }
0x11ec   :  { %1342 = vrot.lane.b32.xlu1 %v1338_v49, %s6831_s14  ;;  %1344 = vrot.lane.b32.xlu0 %v1339_v50, %s6831_s14 }
0x11f0   :  { %1293 = vrot.lane.b32.xlu0 %v1288_v56, %s6831_s14  ;;  %1291 = vrot.lane.b32.xlu1 %v1287_v55, %s6831_s14 }
0x125e   :  { %v1343_v57 = vpop.permute.xlu1 %1342  ;;  %v1345_v58 = vpop.permute.xlu0 %1344 }
0x125f   :  { %v1348_v59 = vadd.f32 %v1343_v57, %v7007_v43  ;;  %v1349_v61 = vadd.f32 %v1345_v58, %v7010_v47 }
0x1261   :  { %6571 = vtanh.f32 %v1348_v59 }
0x1262   :  { %6573 = vtanh.f32 %v1349_v61  ;;  %v1294_v63 = vpop.permute.xlu0 %1293  ;;  %v1292_v2 = vpop.permute.xlu1 %1291 }
0x1263   :  { %v1297_v3 = vadd.f32 %v1292_v2, %v7010_v47  ;;  %v1298_v4 = vadd.f32 %v1294_v63, %v7012_v51 }
0x1265   :  { %6575 = vtanh.f32 %v1297_v3 }
0x1266   :  { %6577 = vtanh.f32 %v1298_v4 }
0x126e   :  { %v6572_v5 = vpop.eup %6571 }
0x126f   :  { %v6574_v9 = vpop.eup %6573  ;;  %1356 = vrot.lane.b32.xlu1 %v6572_v5, %s6829_s0 }
0x1270   :  { %1358 = vrot.lane.b32.xlu0 %v6574_v9, %s6829_s0 }
0x1272   :  { %v6576_v19 = vpop.eup %6575 }
0x1273   :  { %1365 = vrot.lane.b32.xlu1 %v1364_v13, %s6833_s16  ;;  %v6578_v18 = vpop.eup %6577 }
0x1274   :  { %1305 = vrot.lane.b32.xlu0 %v6576_v19, %s6829_s0 }
0x1277   :  { %1307 = vrot.lane.b32.xlu1 %v6578_v18, %s6829_s0 }
0x12e1   :  { %v1357_v47 = vpop.permute.xlu1 %1356 }
0x12e2   :  { %v1359_v23 = vpop.permute.xlu0 %1358  ;;  %v1362_v27 = vmul.f32 %v1357_v47, %v1352_v25 }
0x12e3   :  { %v1363_v14 = vmul.f32 %v1359_v23, %v1353_v24 }
0x12e5   :  { %v1366_v26 = vpop.permute.xlu1 %1365 }
0x12e6   :  { %v1368_v28 = vmul.f32 %v6564_v45, %v1366_v26  ;;  %v1369_v29 = vmul.f32 %v6566_v46, %v1366_v26  ;;  %v1306_v40 = vpop.permute.xlu0 %1305  ;;  %v1316_v45 = vmul.f32 %v6570_v54, %v1313_v41  ;;  %v1315_v46 = vmul.f32 %v6568_v53, %v1313_v41 }
0x12e7   :  { %v1311_v11 = vmul.f32 %v1306_v40, %v1301_v42 }
0x12e8   :  { %v7188_v16 = vadd.f32 %v1368_v28, %v1362_v27  ;;  %v7190_v30 = vadd.f32 %v1369_v29, %v1363_v14 }
0x12e9   :  { %v1308_v35 = vpop.permute.xlu1 %1307  ;;  %v7198_v49 = vadd.f32 %v1315_v46, %v1311_v11 }
0x12ea   :  { %v1382_v31 = vrot.slane %v7188_v16, 3  ;;  %v1383_v32 = vrot.slane %v7190_v30, 3  ;;  %v1312_v44 = vmul.f32 %v1308_v35, %v1302_v39 }
0x12eb   :  { %v1375_v52 = vrot.slane %v7198_v49, 7 }
0x12ec   :  { %v1384_v33 = vsel %vm1381_vm10, %v1382_v31, %v1383_v32  ;;  %v7196_v48 = vadd.f32 %v1316_v45, %v1312_v44  ;;  %vm684_vm10 = vcmask 128003  }
0x12ed   :  { %1385 = vrot.lane.b32.xlu0 %v1384_v33, %s6832_s15 }
0x12ee   :  { %v1376_v50 = vrot.slane %v7196_v48, 7 }
0x12f0   :  { %v1377_v56 = vsel %vm1374_vm11, %v1375_v52, %v1376_v50 }
0x135f   :  { %v1386_v55 = vpop.permute.xlu0 %1385 }
0x1360   :  { %v1388_v57 = vsel %vm523_vm7, %v1377_v56, %v1386_v55  ;;  %v1713_v55 = vld [vmem:[#allocation4 + $0x38] sm:$0xff] }
0x1361   :  { %1410 = vrot.lane.b32.xlu1 %v1388_v57, %s6829_s0  ;;  %v1510_v44 = vrot.slane %v1388_v57, 6 }
0x13d3   :  { %v1411_v17 = vpop.permute.xlu1 %1410 }
0x13d4   :  { %6097 = vmatmul.mubr.msk.f32.vlgmr.msra.gmra.mxu1 %vm297_vm6, %v1411_v17 }
0x13d5   :  { %6114 = vmatprep.mubr.msk.f32.mxu1 %vm6828_vm0, %v6827_v1  ;;  %6107 = vmatpush3.msra.mxu1 %v1713_v55 }
0x13d6   :  { %6108 = vmatprep.subr.mxu1 %v6827_v1 }
0x1494   :  { %v1480_v53 = vpop.f32.mrf.mxu1 }
0x1495   :  { %v1481_v54 = vadd.f32 %v6998_v34, %v1480_v53  ;;  %v1715_v53 = vld [vmem:[#allocation4 + $0x48] sm:$0xff] }
0x1496   :  { %v6098_v58 = vpop.f32.mrf.mxu1 }
0x1497   :  { %1521 = vrot.lane.b32.xlu0 %v1481_v54, %s6830_s2  ;;  %v1485_v59 = vrot.slane %v1481_v54, 6  ;;  %v1514_v61 = vadd.f32 %v1481_v54, %v7007_v43 }
0x1499   :  { %1494 = vrot.lane.b32.xlu1 %v1485_v59, %s6830_s2  ;;  %v1487_v63 = vadd.f32 %v1485_v59, %v7012_v51  ;;  %v5722_v2 = vmul.f32 -1.442695, %v1514_v61 }
0x149b   :  { %v5721_v3 = vmul.f32 -1.442695, %v1487_v63  ;;  %6579 = vpow2.f32 %v5722_v2 }
0x149d   :  { %6581 = vpow2.f32 %v5721_v3 }
0x14a8   :  { %v6580_v4 = vpop.eup %6579 }
0x14a9   :  { %v1518_v9 = vadd.f32 1.0, %v6580_v4 }
0x14aa   :  { %v6582_v5 = vpop.eup %6581 }
0x14ab   :  { %v1491_v13 = vadd.f32 1.0, %v6582_v5  ;;  %6583 = vrcp.f32 %v1518_v9 }
0x14ad   :  { %6585 = vrcp.f32 %v1491_v13 }
0x14b8   :  { %v6584_v34 = vpop.eup %6583 }
0x14b9   :  { %v1531_v32 = vsub.f32 1.0, %v6584_v34 }
0x14ba   :  { %v6586_v47 = vpop.eup %6585 }
0x14bb   :  { %v1504_v42 = vsub.f32 1.0, %v6586_v47  ;;  %v1512_v45 = vmul.f32 %v6586_v47, %v1510_v44 }
0x1509   :  { %v1522_v19 = vpop.permute.xlu0 %1521 }
0x150a   :  { %v1524_v18 = vmul.f32 %v6584_v34, %v1522_v19  ;;  %v7267_v19 = vld [vmem:[#allocation6 + $0x3] ss:$0 sm:$0xff] }
0x150b   :  { %v1495_v23 = vpop.permute.xlu1 %1494 }
0x150c   :  { %v1497_v24 = vmul.f32 %v6586_v47, %v1495_v23  ;;  %1526 = vrot.lane.b32.xlu0 %v1524_v18, %s6831_s14 }
0x150e   :  { %1499 = vrot.lane.b32.xlu1 %v1497_v24, %s6831_s14 }
0x1512   :  { %1537 = vrot.lane.b32.xlu1 %v1388_v57, %s6833_s16  ;;  %v1710_v57 = vld [vmem:[#allocation4 + $0x20] sm:$0xff] }
0x157e   :  { %v1527_v25 = vpop.permute.xlu0 %1526 }
0x157f   :  { %v1529_v26 = vadd.f32 %v1527_v25, %v7007_v43 }
0x1580   :  { %v1500_v14 = vpop.permute.xlu1 %1499 }
0x1581   :  { %6587 = vtanh.f32 %v1529_v26  ;;  %v1502_v27 = vadd.f32 %v1500_v14, %v7012_v51  ;;  %v5726_v14 = vld [vmem:[#allocation6 + $0x2] ss:$0 sm:$0xff] }
0x1583   :  { %6589 = vtanh.f32 %v1502_v27 }
0x1584   :  { %v1538_v31 = vpop.permute.xlu1 %1537 }
0x1585   :  { %v1540_v35 = vmul.f32 %v6584_v34, %v1538_v31 }
0x158e   :  { %v6588_v28 = vpop.eup %6587 }
0x158f   :  { %1533 = vrot.lane.b32.xlu0 %v6588_v28, %s6829_s0 }
0x1590   :  { %v6590_v29 = vpop.eup %6589 }
0x1593   :  { %1506 = vrot.lane.b32.xlu0 %v6590_v29, %s6829_s0 }
0x1601   :  { %v1534_v33 = vpop.permute.xlu0 %1533 }
0x1602   :  { %v1536_v39 = vmul.f32 %v1534_v33, %v1531_v32 }
0x1604   :  { %v1541_v40 = vadd.f32 %v1540_v35, %v1536_v39 }
0x1605   :  { %v1507_v41 = vpop.permute.xlu0 %1506 }
0x1606   :  { %1546 = vrot.lane.b32.xlu1 %v1541_v40, %s6832_s15  ;;  %v1509_v11 = vmul.f32 %v1507_v41, %v1504_v42 }
0x1608   :  { %v7227_v46 = vadd.f32 %v1512_v45, %v1509_v11 }
0x160a   :  { %888 = vrot.lane.b32.xlu1 %v7099_v38, %s6829_s0  ;;  %v1543_v50 = vrot.slane %v7227_v46, 2 }
0x160e   :  { %1399 = vrot.lane.b32.xlu1 %v7188_v16, %s6832_s15  ;;  %v1712_v16 = vld [vmem:[#allocation4 + $0x30] sm:$0xff] }
0x160f   :  { %6109 = vmatpush3.msra.mxu1 %v1712_v16 }
0x1610   :  { %6110 = vmatprep.subr.mxu1 %v6827_v1 }
0x1612   :  { %1187 = vrot.lane.b32.xlu1 %v7148_v60, %s6832_s15  ;;  %v1711_v60 = vld [vmem:[#allocation4 + $0x28] sm:$0xff] }
0x1613   :  { %6111 = vmatpush3.msra.mxu1 %v1711_v60 }
0x1614   :  { %6112 = vmatprep.subr.mxu1 %v6827_v1 }
0x1615   :  { %6113 = vmatpush3.msra.mxu1 %v1710_v57 }
0x1616   :  { %6131 = vmatprep.subr.mxu1 %v6827_v1 }
0x1678   :  { %v7230_v52 = vpop.permute.xlu1 %1546 }
0x1679   :  { %v7234_v38 = vsel %vm523_vm7, %v1543_v50, %v7230_v52  ;;  %vm529_vm7 = vcmask 124928  }
0x167a   :  { %1558 = vrot.lane.b32.xlu0 %v7234_v38, %s6829_s0 }
0x167c   :  { %v889_v56 = vpop.permute.xlu1 %888 }
0x167d   :  { %895 = vst.msk [vmem:[#allocation2] sm:$0xc0] %vm894_vm12, %v889_v56  ;;  %vm896_vm12 = vcmask 122880  }
0x167e   :  { %1027 = vrot.lane.b32.xlu0 %v7124_v12, %s6829_s0  ;;  %v1714_v12 = vld [vmem:[#allocation4 + $0x40] sm:$0xff] }
0x1680   :  { %v1400_v17 = vpop.permute.xlu1 %1399 }
0x1681   :  { %1406 = vst.msk [vmem:[#allocation2] sm:$0xc0] %vm1405_vm13, %v1400_v17  ;;  %vm904_vm13 = vcmask 261255  }
0x1682   :  { %1032 = vrot.lane.b32.xlu0 %v7120_v6, %s6832_s15 }
0x1684   :  { %v1188_v59 = vpop.permute.xlu1 %1187 }
0x1686   :  { %1182 = vrot.lane.b32.xlu0 %v7152_v8, %s6829_s0 }
0x1688   :  { %v1700_v61 = vld [vmem:[#allocation2 + $0x7] sm:$0x1] }
0x1689   :  { %v1703_v2 = vrot.slane %v1700_v61, 7 }
0x16ec   :  { %v1559_v54 = vpop.permute.xlu0 %1558 }
0x16ed   :  { %6104 = vmatmul.mubr.msk.f32.vlgmr.msra.gmra.mxu0 %vm297_vm6, %v1559_v54 }
0x16ee   :  { %6118 = vmatpush3.msra.mxu0 %v1715_v53  ;;  %6121 = vmatprep.mubr.msk.f32.mxu0 %vm6828_vm0, %v6827_v1 }
0x16ef   :  { %6119 = vmatprep.subr.mxu0 %v6827_v1 }
0x16f0   :  { %6120 = vmatpush3.msra.mxu0 %v1714_v12  ;;  %v1028_v58 = vpop.permute.xlu0 %1027 }
0x16f1   :  { %1031 = vst.msk [vmem:[#allocation2 + $0x8] sm:$0xe] %vm1030_vm14, %v1028_v58  ;;  %6122 = vmatmul.mubr.f32.vlgmr.msra.gmra.mxu0 %v6827_v1  ;;  %6124 = vmatprep.subr.mxu0 %v6827_v1  ;;  %vm1407_vm14 = vcmask 254080  }
0x16f2   :  { %1191 = vst.msk [vmem:[#allocation2 + $0x8] sm:$0xe] %vm1190_vm15, %v1188_v59  ;;  %6125 = vmatpush3.msra.mxu0 %v1715_v53  ;;  %6128 = vmatprep.mubr.msk.f32.mxu0 %vm6828_vm0, %v6827_v1  ;;  %vm1395_vm15 = vcmask 130055  }
0x16f3   :  { %6126 = vmatprep.subr.mxu0 %v6827_v1 }
0x16f4   :  { %v1033_v6 = vpop.permute.xlu0 %1032  ;;  %6127 = vmatpush3.msra.mxu0 %v1714_v12 }
0x16f5   :  { %1036 = vst.msk [vmem:[#allocation2 + $0x8] sm:$0x70] %vm1035_vm2, %v1033_v6  ;;  %6138 = vmatprep.subr.mxu0 %v6827_v1  ;;  %vm534_vm2 = vcmask 261253  }
0x16f8   :  { %v1183_v8 = vpop.permute.xlu0 %1182 }
0x16f9   :  { %1186 = vst.msk [vmem:[#allocation2 + $0x8] sm:$0x70] %vm1185_vm3, %v1183_v8  ;;  %v1701_v63 = vld [vmem:[#allocation2 + $0xb] sm:$0x1]  ;;  %vm906_vm3 = vcmask 255104  }
0x16fa   :  { %v1706_v4 = vrot.slane %v1701_v63, 6 }
0x1700   :  { %v1699_v3 = vld [vmem:[#allocation2 + $0xc] sm:$0x1] }
0x1701   :  { %v1708_v5 = vsel %vm1374_vm11, %v1699_v3, %v1703_v2 }
0x1702   :  { %v1709_v9 = vsel %vm873_vm9, %v1708_v5, %v1706_v4 }
0x1703   :  { %6115 = vmatmul.mubr.msk.f32.vlgmr.msra.gmra.mxu1 %vm102_vm1, %v1709_v9  ;;  %v2234_v9 = vld [vmem:[#allocation4 + $0x58] sm:$0xff] }
0x1704   :  { %6132 = vmatpush3.msra.mxu1 %v1715_v53  ;;  %6135 = vmatprep.mubr.msk.f32.mxu1 %vm6828_vm0, %v6827_v1 }
0x1705   :  { %6133 = vmatprep.subr.mxu1 %v6827_v1 }
0x1706   :  { %6134 = vmatpush3.msra.mxu1 %v1714_v12 }
0x1707   :  { %6145 = vmatprep.subr.mxu1 %v6827_v1 }
0x17ad   :  { %v7265_v13 = vpop.f32.mrf.mxu0 }
0x17af   :  { %v6105_v34 = vpop.f32.mrf.mxu0 }
0x17b1   :  { %v1865_v18 = vpop.f32.mrf.mxu0 }
0x17b2   :  { %v1866_v47 = vadd.f32 %v7267_v19, %v1865_v18  ;;  %v2233_v18 = vld [vmem:[#allocation4 + $0x50] sm:$0xff] }
0x17b3   :  { %v6123_v23 = vpop.f32.mrf.mxu0 }
0x17b4   :  { %1877 = vrot.lane.b32.xlu0 %v1866_v47, %s6830_s2  ;;  %v1895_v24 = vrot.slane %v1866_v47, 7 }
0x17b6   :  { %1904 = vrot.lane.b32.xlu1 %v1895_v24, %s6830_s2 }
0x17c3   :  { %v1790_v25 = vpop.f32.mrf.mxu1 }
0x17c4   :  { %v7272_v27 = vadd.f32 %v5726_v14, %v1790_v25 }
0x17c5   :  { %v6116_v26 = vpop.f32.mrf.mxu1 }
0x17c6   :  { %v1869_v28 = vadd.f32 %v1866_v47, %v7272_v27  ;;  %v1897_v29 = vadd.f32 %v1895_v24, %v7272_v27 }
0x17c8   :  { %v5729_v31 = vmul.f32 -1.442695, %v1869_v28  ;;  %v5730_v32 = vmul.f32 -1.442695, %v1897_v29 }
0x17ca   :  { %6591 = vpow2.f32 %v5729_v31 }
0x17cb   :  { %6593 = vpow2.f32 %v5730_v32 }
0x17d7   :  { %v6592_v33 = vpop.eup %6591 }
0x17d8   :  { %v6594_v35 = vpop.eup %6593  ;;  %v1873_v39 = vadd.f32 1.0, %v6592_v33 }
0x17d9   :  { %v1901_v40 = vadd.f32 1.0, %v6594_v35 }
0x17da   :  { %6595 = vrcp.f32 %v1873_v39 }
0x17db   :  { %6597 = vrcp.f32 %v1901_v40 }
0x17e7   :  { %v6596_v41 = vpop.eup %6595 }
0x17e8   :  { %v6598_v11 = vpop.eup %6597  ;;  %v1887_v61 = vsub.f32 1.0, %v6596_v41  ;;  %v1893_v2 = vmul.f32 0.0, %v6596_v41 }
0x17e9   :  { %v1914_v53 = vsub.f32 1.0, %v6598_v11  ;;  %v1920_v12 = vmul.f32 0.0, %v6598_v11 }
0x1826   :  { %v1878_v42 = vpop.permute.xlu0 %1877 }
0x1827   :  { %v1880_v44 = vmul.f32 %v6596_v41, %v1878_v42 }
0x1828   :  { %v1905_v45 = vpop.permute.xlu1 %1904 }
0x1829   :  { %v1907_v50 = vmul.f32 %v6598_v11, %v1905_v45  ;;  %1882 = vrot.lane.b32.xlu0 %v1880_v44, %s6831_s14 }
0x182b   :  { %1909 = vrot.lane.b32.xlu1 %v1907_v50, %s6831_s14 }
0x189b   :  { %v1883_v55 = vpop.permute.xlu0 %1882 }
0x189c   :  { %v1885_v16 = vadd.f32 %v1883_v55, %v7272_v27 }
0x189d   :  { %v1910_v60 = vpop.permute.xlu1 %1909 }
0x189e   :  { %6599 = vtanh.f32 %v1885_v16  ;;  %v1912_v56 = vadd.f32 %v1910_v60, %v7272_v27 }
0x18a0   :  { %6601 = vtanh.f32 %v1912_v56 }
0x18ab   :  { %v6600_v57 = vpop.eup %6599 }
0x18ac   :  { %1889 = vrot.lane.b32.xlu0 %v6600_v57, %s6829_s0 }
0x18ad   :  { %v6602_v17 = vpop.eup %6601 }
0x18ae   :  { %1916 = vrot.lane.b32.xlu1 %v6602_v17, %s6829_s0 }
0x191e   :  { %v1890_v8 = vpop.permute.xlu0 %1889 }
0x191f   :  { %v1892_v63 = vmul.f32 %v1890_v8, %v1887_v61 }
0x1920   :  { %v1917_v54 = vpop.permute.xlu1 %1916 }
0x1921   :  { %v1919_v58 = vmul.f32 %v1917_v54, %v1914_v53  ;;  %v7286_v3 = vadd.f32 %v1893_v2, %v1892_v63 }
0x1923   :  { %v7282_v59 = vadd.f32 %v1920_v12, %v1919_v58 }
0x1925   :  { %v1923_v6 = vrot.slane %v7282_v59, 1 }
0x1927   :  { %1924 = vrot.lane.b32.xlu1 %v1923_v6, %s6832_s15 }
0x1999   :  { %v1925_v4 = vpop.permute.xlu1 %1924 }
0x199a   :  { %v1927_v5 = vsel %vm1374_vm11, %v7286_v3, %v1925_v4 }
0x199b   :  { %1939 = vrot.lane.b32.xlu0 %v1927_v5, %s6829_s0  ;;  %v2039_v8 = vrot.slane %v1927_v5, 7 }
0x1a0d   :  { %v1940_v34 = vpop.permute.xlu0 %1939 }
0x1a0e   :  { %6129 = vmatmul.mubr.msk.f32.vlgmr.msra.gmra.mxu0 %vm297_vm6, %v1940_v34 }
0x1a0f   :  { %6139 = vmatpush3.msra.mxu0 %v2234_v9  ;;  %6142 = vmatprep.mubr.msk.f32.mxu0 %vm6828_vm0, %v6827_v1 }
0x1a10   :  { %6140 = vmatprep.subr.mxu0 %v6827_v1 }
0x1a11   :  { %6141 = vmatpush3.msra.mxu0 %v2233_v18  ;;  %v7316_v18 = vld [vmem:[#allocation4 + $0x78] sm:$0xff] }
0x1a12   :  { %6143 = vmatmul.mubr.msk.f32.vlgmr.msra.gmra.mxu0 %vm297_vm6, %v7002_v36  ;;  %6156 = vmatprep.subr.mxu0 %v6827_v1 }
0x1a13   :  { %6164 = vmatprep.mubr.msk.f32.mxu0 %vm6828_vm0, %v6827_v1  ;;  %6157 = vmatpush3.msra.mxu0 %v7316_v18 }
0x1a14   :  { %6158 = vmatprep.subr.mxu0 %v6827_v1 }
0x1ace   :  { %v2009_v47 = vpop.f32.mrf.mxu0 }
0x1acf   :  { %v2010_v23 = vadd.f32 %v7267_v19, %v2009_v47  ;;  %v7319_v47 = vld [vmem:[#allocation4 + $0x70] sm:$0xff] }
0x1ad0   :  { %v6130_v24 = vpop.f32.mrf.mxu0  ;;  %6159 = vmatpush3.msra.mxu0 %v7319_v47 }
0x1ad1   :  { %2050 = vrot.lane.b32.xlu1 %v2010_v23, %s6830_s2  ;;  %v2014_v25 = vrot.slane %v2010_v23, 7  ;;  %v2043_v28 = vadd.f32 %v2010_v23, %v7272_v27  ;;  %6160 = vmatprep.subr.mxu0 %v6827_v1  ;;  %v7327_v23 = vld [vmem:[#allocation4 + $0x60] sm:$0xff] }
0x1ad2   :  { %v7302_v26 = vpop.f32.mrf.mxu0 }
0x1ad3   :  { %2023 = vrot.lane.b32.xlu0 %v2014_v25, %s6830_s2  ;;  %v2016_v29 = vadd.f32 %v2014_v25, %v7272_v27  ;;  %v5733_v31 = vmul.f32 -1.442695, %v2043_v28 }
0x1ad4   :  { %v6144_v14 = vpop.f32.mrf.mxu0 }
0x1ad5   :  { %v5732_v32 = vmul.f32 -1.442695, %v2016_v29  ;;  %6603 = vpow2.f32 %v5733_v31 }
0x1ad7   :  { %6605 = vpow2.f32 %v5732_v32 }
0x1ae2   :  { %v6604_v33 = vpop.eup %6603 }
0x1ae3   :  { %v2047_v39 = vadd.f32 1.0, %v6604_v33 }
0x1ae4   :  { %v6606_v35 = vpop.eup %6605 }
0x1ae5   :  { %v2020_v40 = vadd.f32 1.0, %v6606_v35  ;;  %6607 = vrcp.f32 %v2047_v39  ;;  %v7370_v35 = vld [vmem:[#allocation6 + $0x5] sm:$0x1] }
0x1ae7   :  { %6609 = vrcp.f32 %v2020_v40 }
0x1af2   :  { %v6608_v41 = vpop.eup %6607 }
0x1af3   :  { %v2060_v54 = vsub.f32 1.0, %v6608_v41 }
0x1af4   :  { %v6610_v11 = vpop.eup %6609 }
0x1af5   :  { %v2033_v63 = vsub.f32 1.0, %v6610_v11  ;;  %v2041_v4 = vmul.f32 %v6610_v11, %v2039_v8 }
0x1b43   :  { %v2051_v42 = vpop.permute.xlu1 %2050 }
0x1b44   :  { %v2053_v44 = vmul.f32 %v6608_v41, %v2051_v42  ;;  %v5737_v42 = vld [vmem:[#allocation6 + $0x4] ss:$0 sm:$0xff] }
0x1b45   :  { %v2024_v45 = vpop.permute.xlu0 %2023 }
0x1b46   :  { %v2026_v50 = vmul.f32 %v6610_v11, %v2024_v45  ;;  %2055 = vrot.lane.b32.xlu1 %v2053_v44, %s6831_s14  ;;  %v7375_v44 = vadd.f32 %v5737_v42, %v7302_v26 }
0x1b48   :  { %2028 = vrot.lane.b32.xlu0 %v2026_v50, %s6831_s14 }
0x1b4c   :  { %2066 = vrot.lane.b32.xlu0 %v1927_v5, %s6833_s16  ;;  %v7323_v5 = vld [vmem:[#allocation4 + $0x68] sm:$0xff] }
0x1b4d   :  { %6161 = vmatpush3.msra.mxu0 %v7323_v5 }
0x1b4e   :  { %6162 = vmatprep.subr.mxu0 %v6827_v1 }
0x1b4f   :  { %6163 = vmatpush3.msra.mxu0 %v7327_v23 }
0x1b50   :  { %6178 = vmatprep.subr.mxu0 %v6827_v1 }
0x1bb8   :  { %v2056_v55 = vpop.permute.xlu1 %2055 }
0x1bb9   :  { %v2058_v16 = vadd.f32 %v2056_v55, %v7272_v27 }
0x1bba   :  { %v2029_v60 = vpop.permute.xlu0 %2028 }
0x1bbb   :  { %6611 = vtanh.f32 %v2058_v16  ;;  %v2031_v56 = vadd.f32 %v2029_v60, %v7272_v27 }
0x1bbd   :  { %6613 = vtanh.f32 %v2031_v56 }
0x1bbe   :  { %v2067_v53 = vpop.permute.xlu0 %2066 }
0x1bbf   :  { %v2069_v58 = vmul.f32 %v6608_v41, %v2067_v53 }
0x1bc8   :  { %v6612_v57 = vpop.eup %6611 }
0x1bc9   :  { %2062 = vrot.lane.b32.xlu1 %v6612_v57, %s6829_s0 }
0x1bca   :  { %v6614_v17 = vpop.eup %6613 }
0x1bcd   :  { %2035 = vrot.lane.b32.xlu1 %v6614_v17, %s6829_s0 }
0x1c3b   :  { %v2063_v12 = vpop.permute.xlu1 %2062 }
0x1c3c   :  { %v2065_v6 = vmul.f32 %v2063_v12, %v2060_v54 }
0x1c3e   :  { %v2070_v61 = vadd.f32 %v2069_v58, %v2065_v6 }
0x1c3f   :  { %v2036_v2 = vpop.permute.xlu1 %2035 }
0x1c40   :  { %v2038_v9 = vmul.f32 %v2036_v2, %v2033_v63  ;;  %2075 = vrot.lane.b32.xlu0 %v2070_v61, %s6832_s15 }
0x1c42   :  { %v2042_v34 = vadd.f32 %v2041_v4, %v2038_v9 }
0x1c44   :  { %2079 = vrot.lane.b32.xlu1 %v2042_v34, %s6829_s0  ;;  %v2072_v24 = vrot.slane %v2042_v34, 1 }
0x1cb2   :  { %v2076_v25 = vpop.permute.xlu0 %2075 }
0x1cb3   :  { %v7333_v14 = vsel %vm1374_vm11, %v2072_v24, %v2076_v25  ;;  %vm1555_vm11 = vcmask 259203  }
0x1cb4   :  { %2087 = vrot.lane.b32.xlu0 %v7333_v14, %s6829_s0 }
0x1cb6   :  { %v2080_v28 = vpop.permute.xlu1 %2079 }
0x1cb7   :  { %2083 = vst.msk [vmem:[%s8141_s12] sm:$0x2] %vm2082_vm4, %v2080_v28  ;;  %vm689_vm4 = vcmask 258178  }
0x1cb8   :  { %2085 = vst.msk [vmem:[%s8141_s12] sm:$0x2] %vm2084_vm5, %v2076_v25  ;;  %vm1397_vm5 = vcmask 123904  }
0x1cbf   :  { %v2318_v31 = vld [vmem:[%s8141_s12 + $0x1] sm:$0x1] }
0x1d26   :  { %v2088_v29 = vpop.permute.xlu0 %2087 }
0x1d27   :  { %6136 = vmatmul.mubr.msk.f32.vlgmr.msra.gmra.mxu1 %vm297_vm6, %v2088_v29  ;;  %vm2425_vm6 = vcmask 253952  }
0x1d28   :  { %6146 = vmatpush3.msra.mxu1 %v7316_v18  ;;  %6153 = vmatprep.mubr.msk.f32.mxu1 %vm6828_vm0, %v6827_v1 }
0x1d29   :  { %6147 = vmatprep.subr.mxu1 %v6827_v1 }
0x1d2a   :  { %6148 = vmatpush3.msra.mxu1 %v7319_v47 }
0x1d2b   :  { %6149 = vmatprep.subr.mxu1 %v6827_v1 }
0x1d2c   :  { %6150 = vmatpush3.msra.mxu1 %v7323_v5 }
0x1d2d   :  { %6151 = vmatprep.subr.mxu1 %v6827_v1 }
0x1d2e   :  { %6152 = vmatpush3.msra.mxu1 %v7327_v23 }
0x1d2f   :  { %6154 = vmatmul.mubr.msk.f32.vlgmr.msra.gmra.mxu1 %vm102_vm1, %v2318_v31  ;;  %6167 = vmatprep.subr.mxu1 %v6827_v1 }
0x1d30   :  { %6168 = vmatpush3.msra.mxu1 %v7316_v18  ;;  %6175 = vmatprep.mubr.msk.f32.mxu1 %vm6828_vm0, %v6827_v1 }
0x1d31   :  { %6169 = vmatprep.subr.mxu1 %v6827_v1 }
0x1d32   :  { %6170 = vmatpush3.msra.mxu1 %v7319_v47 }
0x1d33   :  { %6171 = vmatprep.subr.mxu1 %v6827_v1 }
0x1d34   :  { %6172 = vmatpush3.msra.mxu1 %v7323_v5 }
0x1d35   :  { %6173 = vmatprep.subr.mxu1 %v6827_v1 }
0x1d36   :  { %6174 = vmatpush3.msra.mxu1 %v7327_v23 }
0x1d37   :  { %6189 = vmatprep.subr.mxu1 %v6827_v1 }
0x1de7   :  { %v7368_v32 = vpop.f32.mrf.mxu1 }
0x1de9   :  { %v6137_v33 = vpop.f32.mrf.mxu1 }
0x1def   :  { %v2388_v39 = vpop.f32.mrf.mxu1 }
0x1df0   :  { %v2389_v40 = vadd.f32 %v2388_v39, %v7370_v35 }
0x1df1   :  { %v6155_v41 = vpop.f32.mrf.mxu1 }
0x1df2   :  { %2400 = vrot.lane.b32.xlu1 %v2389_v40, %s6834_s20  ;;  %v2392_v11 = vadd.f32 %v2389_v40, %v7375_v44 }
0x1df4   :  { %v5740_v45 = vmul.f32 -1.442695, %v2392_v11 }
0x1df6   :  { %6615 = vpow2.f32 %v5740_v45 }
0x1e03   :  { %v6616_v50 = vpop.eup %6615 }
0x1e04   :  { %v2396_v55 = vadd.f32 1.0, %v6616_v50 }
0x1e06   :  { %6617 = vrcp.f32 %v2396_v55 }
0x1e13   :  { %v6618_v16 = vpop.eup %6617 }
0x1e14   :  { %v2410_v54 = vsub.f32 1.0, %v6618_v16 }
0x1e64   :  { %v2401_v60 = vpop.permute.xlu1 %2400 }
0x1e65   :  { %v2403_v56 = vmul.f32 %v6618_v16, %v2401_v60 }
0x1e67   :  { %2405 = vrot.lane.b32.xlu0 %v2403_v56, %s6834_s20 }
0x1e6b   :  { %2416 = vrot.lane.b32.xlu0 %v2318_v31, %s6831_s14 }
0x1ed9   :  { %v2406_v57 = vpop.permute.xlu0 %2405 }
0x1eda   :  { %v2408_v17 = vadd.f32 %v2406_v57, %v7375_v44 }
0x1edc   :  { %6619 = vtanh.f32 %v2408_v17 }
0x1edd   :  { %v2417_v53 = vpop.permute.xlu0 %2416 }
0x1ede   :  { %v2419_v58 = vmul.f32 %v6618_v16, %v2417_v53 }
0x1ee9   :  { %v6620_v26 = vpop.eup %6619 }
0x1eea   :  { %2412 = vrot.lane.b32.xlu1 %v6620_v26, %s6830_s2 }
0x1f5c   :  { %v2413_v12 = vpop.permute.xlu1 %2412 }
0x1f5d   :  { %v2415_v6 = vmul.f32 %v2413_v12, %v2410_v54 }
0x1f5f   :  { %v2420_v8 = vadd.f32 %v2419_v58, %v2415_v6 }
0x1f61   :  { %2422 = vrot.lane.b32.xlu1 %v2420_v8, %s6830_s2  ;;  %v2525_v42 = vrot.slane %v2420_v8, 7 }
0x1fd3   :  { %v2423_v61 = vpop.permute.xlu1 %2422 }
0x1fd4   :  { %2426 = vst.msk [vmem:[#allocation3] sm:$0x1] %vm2425_vm6, %v2423_v61  ;;  %6165 = vmatmul.mubr.msk.f32.vlgmr.msra.gmra.mxu0 %vm102_vm1, %v2423_v61 }
0x1fd5   :  { %6179 = vmatpush3.msra.mxu0 %v7316_v18  ;;  %6186 = vmatprep.mubr.msk.f32.mxu0 %vm6828_vm0, %v6827_v1 }
0x1fd6   :  { %6180 = vmatprep.subr.mxu0 %v6827_v1 }
0x1fd7   :  { %6181 = vmatpush3.msra.mxu0 %v7319_v47 }
0x1fd8   :  { %6182 = vmatprep.subr.mxu0 %v6827_v1 }
0x1fd9   :  { %6183 = vmatpush3.msra.mxu0 %v7323_v5 }
0x1fda   :  { %6184 = vmatprep.subr.mxu0 %v6827_v1 }
0x1fdb   :  { %6185 = vmatpush3.msra.mxu0 %v7327_v23 }
0x1fdc   :  { %6200 = vmatprep.subr.mxu0 %v6827_v1 }
0x2094   :  { %v2495_v63 = vpop.f32.mrf.mxu0 }
0x2095   :  { %v2496_v2 = vadd.f32 %v2495_v63, %v7370_v35 }
0x2096   :  { %v6166_v4 = vpop.f32.mrf.mxu0 }
0x2097   :  { %v2500_v9 = vrot.slane %v2496_v2, 7 }
0x2099   :  { %2509 = vrot.lane.b32.xlu0 %v2500_v9, %s6834_s20  ;;  %v2502_v34 = vadd.f32 %v2500_v9, %v7375_v44 }
0x209b   :  { %v5742_v24 = vmul.f32 -1.442695, %v2502_v34 }
0x209d   :  { %6621 = vpow2.f32 %v5742_v24 }
0x20aa   :  { %v6622_v25 = vpop.eup %6621 }
0x20ab   :  { %v2506_v28 = vadd.f32 1.0, %v6622_v25 }
0x20ad   :  { %6623 = vrcp.f32 %v2506_v28 }
0x20ba   :  { %v6624_v29 = vpop.eup %6623 }
0x20bb   :  { %v2519_v11 = vsub.f32 1.0, %v6624_v29  ;;  %v2527_v50 = vmul.f32 %v6624_v29, %v2525_v42 }
0x210b   :  { %v2510_v31 = vpop.permute.xlu0 %2509 }
0x210c   :  { %v2512_v33 = vmul.f32 %v6624_v29, %v2510_v31 }
0x210e   :  { %2514 = vrot.lane.b32.xlu1 %v2512_v33, %s6834_s20 }
0x2180   :  { %v2515_v39 = vpop.permute.xlu1 %2514 }
0x2181   :  { %v2517_v40 = vadd.f32 %v2515_v39, %v7375_v44 }
0x2183   :  { %6625 = vtanh.f32 %v2517_v40 }
0x2190   :  { %v6626_v41 = vpop.eup %6625 }
0x2191   :  { %2521 = vrot.lane.b32.xlu0 %v6626_v41, %s6830_s2 }
0x2203   :  { %v2522_v45 = vpop.permute.xlu0 %2521 }
0x2204   :  { %v2524_v55 = vmul.f32 %v2522_v45, %v2519_v11 }
0x2206   :  { %v7401_v16 = vadd.f32 %v2527_v50, %v2524_v55 }
0x2208   :  { %v2535_v60 = vrot.slane %v7401_v16, 1  ;;  %v2636_v24 = vrot.slane %v7401_v16, 7 }
0x220a   :  { %2536 = vrot.lane.b32.xlu1 %v2535_v60, %s6830_s2 }
0x227c   :  { %v2537_v56 = vpop.permute.xlu1 %2536 }
0x227d   :  { %6176 = vmatmul.mubr.msk.f32.vlgmr.msra.gmra.mxu1 %vm102_vm1, %v2537_v56 }
0x227e   :  { %6190 = vmatpush3.msra.mxu1 %v7316_v18  ;;  %6197 = vmatprep.mubr.msk.f32.mxu1 %vm6828_vm0, %v6827_v1 }
0x227f   :  { %6191 = vmatprep.subr.mxu1 %v6827_v1 }
0x2280   :  { %6192 = vmatpush3.msra.mxu1 %v7319_v47 }
0x2281   :  { %6193 = vmatprep.subr.mxu1 %v6827_v1 }
0x2282   :  { %6194 = vmatpush3.msra.mxu1 %v7323_v5 }
0x2283   :  { %6195 = vmatprep.subr.mxu1 %v6827_v1 }
0x2284   :  { %6196 = vmatpush3.msra.mxu1 %v7327_v23 }
0x2285   :  { %6211 = vmatprep.subr.mxu1 %v6827_v1 }
0x233d   :  { %v2606_v57 = vpop.f32.mrf.mxu1 }
0x233e   :  { %v2607_v17 = vadd.f32 %v2606_v57, %v7370_v35 }
0x233f   :  { %v6177_v26 = vpop.f32.mrf.mxu1 }
0x2340   :  { %v2611_v53 = vrot.slane %v2607_v17, 6 }
0x2342   :  { %2620 = vrot.lane.b32.xlu0 %v2611_v53, %s6834_s20  ;;  %v2613_v54 = vadd.f32 %v2611_v53, %v7375_v44 }
0x2344   :  { %v5744_v12 = vmul.f32 -1.442695, %v2613_v54 }
0x2346   :  { %6627 = vpow2.f32 %v5744_v12 }
0x2353   :  { %v6628_v58 = vpop.eup %6627 }
0x2354   :  { %v2617_v6 = vadd.f32 1.0, %v6628_v58 }
0x2356   :  { %6629 = vrcp.f32 %v2617_v6 }
0x2363   :  { %v6630_v8 = vpop.eup %6629 }
0x2364   :  { %v2630_v34 = vsub.f32 1.0, %v6630_v8  ;;  %v2638_v28 = vmul.f32 %v6630_v8, %v2636_v24 }
0x23b4   :  { %v2621_v61 = vpop.permute.xlu0 %2620 }
0x23b5   :  { %v2623_v63 = vmul.f32 %v6630_v8, %v2621_v61 }
0x23b7   :  { %2625 = vrot.lane.b32.xlu1 %v2623_v63, %s6834_s20 }
0x2429   :  { %v2626_v2 = vpop.permute.xlu1 %2625 }
0x242a   :  { %v2628_v4 = vadd.f32 %v2626_v2, %v7375_v44 }
0x242c   :  { %6631 = vtanh.f32 %v2628_v4 }
0x2439   :  { %v6632_v9 = vpop.eup %6631 }
0x243a   :  { %2632 = vrot.lane.b32.xlu0 %v6632_v9, %s6830_s2 }
0x24ac   :  { %v2633_v25 = vpop.permute.xlu0 %2632 }
0x24ad   :  { %v2635_v29 = vmul.f32 %v2633_v25, %v2630_v34 }
0x24af   :  { %v7423_v31 = vadd.f32 %v2638_v28, %v2635_v29 }
0x24b1   :  { %v2646_v33 = vrot.slane %v7423_v31, 2  ;;  %v2747_v26 = vrot.slane %v7423_v31, 7 }
0x24b3   :  { %2647 = vrot.lane.b32.xlu1 %v2646_v33, %s6830_s2 }
0x2525   :  { %v2648_v39 = vpop.permute.xlu1 %2647 }
0x2526   :  { %6187 = vmatmul.mubr.msk.f32.vlgmr.msra.gmra.mxu0 %vm102_vm1, %v2648_v39 }
0x2527   :  { %6201 = vmatpush3.msra.mxu0 %v7316_v18  ;;  %6208 = vmatprep.mubr.msk.f32.mxu0 %vm6828_vm0, %v6827_v1 }
0x2528   :  { %6202 = vmatprep.subr.mxu0 %v6827_v1 }
0x2529   :  { %6203 = vmatpush3.msra.mxu0 %v7319_v47 }
0x252a   :  { %6204 = vmatprep.subr.mxu0 %v6827_v1 }
0x252b   :  { %6205 = vmatpush3.msra.mxu0 %v7323_v5 }
0x252c   :  { %6206 = vmatprep.subr.mxu0 %v6827_v1 }
0x252d   :  { %6207 = vmatpush3.msra.mxu0 %v7327_v23 }
0x252e   :  { %6222 = vmatprep.subr.mxu0 %v6827_v1 }
0x25e6   :  { %v2717_v40 = vpop.f32.mrf.mxu0 }
0x25e7   :  { %v2718_v18 = vadd.f32 %v2717_v40, %v7370_v35 }
0x25e8   :  { %v6188_v41 = vpop.f32.mrf.mxu0 }
0x25e9   :  { %v2722_v42 = vrot.slane %v2718_v18, 5  ;;  %v6753_v18 = vld [vmem:[#allocation6 + $0x1] ss:$0 sm:$0xff] }
0x25ea   :  { %v1629_v41 = vadd.f32 %v6753_v18, %v7265_v13 }
0x25eb   :  { %2731 = vrot.lane.b32.xlu0 %v2722_v42, %s6834_s20  ;;  %v2724_v11 = vadd.f32 %v2722_v42, %v7375_v44 }
0x25ed   :  { %v5746_v47 = vmul.f32 -1.442695, %v2724_v11  ;;  %v1633_v11 = vrot.slane %v1629_v41, 3 }
0x25ef   :  { %6633 = vpow2.f32 %v5746_v47  ;;  %v2158_v47 = vadd.f32 %v7267_v19, %v7368_v32  ;;  %v1662_v13 = vadd.f32 %v1633_v11, %v7007_v43 }
0x25fc   :  { %v6634_v45 = vpop.eup %6633 }
0x25fd   :  { %v2728_v50 = vadd.f32 1.0, %v6634_v45  ;;  %v2191_v45 = vrot.slane %v2158_v47, 1 }
0x25ff   :  { %6635 = vrcp.f32 %v2728_v50  ;;  %v1635_v50 = vadd.f32 %v1633_v11, %v7012_v51 }
0x260c   :  { %v6636_v5 = vpop.eup %6635 }
0x260d   :  { %v2741_v17 = vsub.f32 1.0, %v6636_v5  ;;  %v2749_v54 = vmul.f32 %v6636_v5, %v2747_v26 }
0x265d   :  { %v2732_v55 = vpop.permute.xlu0 %2731 }
0x265e   :  { %v2734_v60 = vmul.f32 %v6636_v5, %v2732_v55  ;;  %v5724_v5 = vmul.f32 -1.442695, %v1635_v50  ;;  %v2193_v55 = vadd.f32 %v2191_v45, %v7272_v27 }
0x2660   :  { %2736 = vrot.lane.b32.xlu1 %v2734_v60, %s6834_s20  ;;  %v5736_v60 = vmul.f32 -1.442695, %v2193_v55 }
0x26d2   :  { %v2737_v23 = vpop.permute.xlu1 %2736 }
0x26d3   :  { %v2739_v56 = vadd.f32 %v2737_v23, %v7375_v44  ;;  %v5725_v23 = vmul.f32 -1.442695, %v1662_v13 }
0x26d5   :  { %6637 = vtanh.f32 %v2739_v56 }
0x26e2   :  { %v6638_v57 = vpop.eup %6637 }
0x26e3   :  { %2743 = vrot.lane.b32.xlu0 %v6638_v57, %s6830_s2 }
0x2755   :  { %v2744_v53 = vpop.permute.xlu0 %2743 }
0x2756   :  { %v2746_v12 = vmul.f32 %v2744_v53, %v2741_v17 }
0x2758   :  { %v7445_v58 = vadd.f32 %v2749_v54, %v2746_v12 }
0x275a   :  { %v2757_v6 = vrot.slane %v7445_v58, 3  ;;  %v2858_v54 = vrot.slane %v7445_v58, 7 }
0x275c   :  { %2758 = vrot.lane.b32.xlu1 %v2757_v6, %s6830_s2 }
0x27ce   :  { %v2759_v8 = vpop.permute.xlu1 %2758 }
0x27cf   :  { %6198 = vmatmul.mubr.msk.f32.vlgmr.msra.gmra.mxu1 %vm102_vm1, %v2759_v8 }
0x27d0   :  { %6219 = vmatprep.mubr.msk.f32.mxu1 %vm6828_vm0, %v6827_v1 }
0x288f   :  { %v2828_v61 = vpop.f32.mrf.mxu1 }
0x2890   :  { %v2829_v63 = vadd.f32 %v2828_v61, %v7370_v35 }
0x2891   :  { %v6199_v2 = vpop.f32.mrf.mxu1 }
0x2892   :  { %v2833_v4 = vrot.slane %v2829_v63, 4 }
0x2894   :  { %2842 = vrot.lane.b32.xlu0 %v2833_v4, %s6834_s20  ;;  %v2835_v9 = vadd.f32 %v2833_v4, %v7375_v44 }
0x2896   :  { %v5748_v34 = vmul.f32 -1.442695, %v2835_v9 }
0x2898   :  { %6639 = vpow2.f32 %v5748_v34 }
0x28a5   :  { %v6640_v24 = vpop.eup %6639 }
0x28a6   :  { %v2839_v25 = vadd.f32 1.0, %v6640_v24 }
0x28a8   :  { %6641 = vrcp.f32 %v2839_v25  ;;  %v2162_v25 = vrot.slane %v2158_v47, 6 }
0x28b5   :  { %v6642_v28 = vpop.eup %6641 }
0x28b6   :  { %v2852_v53 = vsub.f32 1.0, %v6642_v28  ;;  %v2860_v6 = vmul.f32 %v6642_v28, %v2858_v54 }
0x2906   :  { %v2843_v29 = vpop.permute.xlu0 %2842 }
0x2907   :  { %v2845_v33 = vmul.f32 %v6642_v28, %v2843_v29 }
0x2909   :  { %2847 = vrot.lane.b32.xlu1 %v2845_v33, %s6834_s20  ;;  %v1658_v33 = vrot.slane %v7234_v38, 3 }
0x297b   :  { %v2848_v39 = vpop.permute.xlu1 %2847 }
0x297c   :  { %v2850_v40 = vadd.f32 %v2848_v39, %v7375_v44 }
0x297e   :  { %6643 = vtanh.f32 %v2850_v40  ;;  %v2164_v40 = vadd.f32 %v2162_v25, %v7272_v27 }
0x297f   :  { %6645 = vpow2.f32 %v5724_v5 }
0x2980   :  { %6647 = vpow2.f32 %v5736_v60  ;;  %v5735_v18 = vmul.f32 -1.442695, %v2164_v40 }
0x2981   :  { %6649 = vpow2.f32 %v5725_v23 }
0x298b   :  { %v6644_v42 = vpop.eup %6643 }
0x298c   :  { %2854 = vrot.lane.b32.xlu0 %v6644_v42, %s6830_s2  ;;  %v6646_v56 = vpop.eup %6645 }
0x298d   :  { %v1639_v57 = vadd.f32 1.0, %v6646_v56  ;;  %v6648_v19 = vpop.eup %6647 }
0x298e   :  { %v2197_v32 = vadd.f32 1.0, %v6648_v19  ;;  %v6650_v17 = vpop.eup %6649 }
0x298f   :  { %6651 = vrcp.f32 %v1639_v57  ;;  %v1666_v26 = vadd.f32 1.0, %v6650_v17  ;;  %v7499_v57 = vld [vmem:[%s8133_s4 + $0x18] sm:$0xff]  ;;  %v7515_v17 = vld [vmem:[%s8133_s4 + $0x8] sm:$0xff] }
0x2990   :  { %1642 = vrot.lane.b32.xlu0 %v1633_v11, %s6830_s2  ;;  %6653 = vrcp.f32 %v2197_v32  ;;  %6212 = vmatpush3.msra.mxu1 %v7499_v57 }
0x2991   :  { %6655 = vrcp.f32 %v1666_v26  ;;  %6213 = vmatprep.subr.mxu1 %v6827_v1  ;;  %v7525_v26 = vld [vmem:[%s8133_s4] sm:$0xff] }
0x2992   :  { %6657 = vpow2.f32 %v5735_v18 }
0x2994   :  { %2200 = vrot.lane.b32.xlu0 %v2191_v45, %s6830_s2 }
0x299c   :  { %v7469_v63 = vpop.eup %6651 }
0x299d   :  { %v7475_v34 = vpop.eup %6653 }
0x299e   :  { %v6656_v29 = vpop.eup %6655 }
0x299f   :  { %v6658_v41 = vpop.eup %6657 }
0x29a0   :  { %v2168_v42 = vadd.f32 1.0, %v6658_v41 }
0x29a2   :  { %6659 = vrcp.f32 %v2168_v42 }
0x29af   :  { %v7489_v47 = vpop.eup %6659 }
0x29b0   :  { %v2181_v38 = vsub.f32 1.0, %v7489_v47 }
0x29fe   :  { %v2855_v12 = vpop.permute.xlu0 %2854 }
0x29ff   :  { %v2857_v8 = vmul.f32 %v2855_v12, %v2852_v53 }
0x2a01   :  { %v7467_v61 = vadd.f32 %v2860_v6, %v2857_v8  ;;  %v1676_v8 = vsub.f32 1.0, %v6656_v29 }
0x2a02   :  { %v1643_v2 = vpop.permute.xlu0 %1642 }
0x2a03   :  { %v2868_v4 = vrot.slane %v7467_v61, 4  ;;  %v1645_v9 = vmul.f32 %v7469_v63, %v1643_v2  ;;  %v1669_v39 = vmul.f32 %v6656_v29, %v1643_v2 }
0x2a05   :  { %2869 = vrot.lane.b32.xlu1 %v2868_v4, %s6830_s2  ;;  %1647 = vrot.lane.b32.xlu0 %v1645_v9, %s6831_s14 }
0x2a06   :  { %v2201_v24 = vpop.permute.xlu0 %2200 }
0x2a07   :  { %v2203_v28 = vmul.f32 %v7475_v34, %v2201_v24 }
0x2a09   :  { %2171 = vrot.lane.b32.xlu1 %v2162_v25, %s6830_s2  ;;  %2205 = vrot.lane.b32.xlu0 %v2203_v28, %s6831_s14 }
0x2a0d   :  { %1671 = vrot.lane.b32.xlu1 %v1669_v39, %s6831_s14  ;;  %1682 = vrot.lane.b32.xlu0 %v1658_v33, %s6833_s16 }
0x2a77   :  { %v2870_v11 = vpop.permute.xlu1 %2869  ;;  %v1648_v5 = vpop.permute.xlu0 %1647 }
0x2a78   :  { %6209 = vmatmul.mubr.msk.f32.vlgmr.msra.gmra.mxu0 %vm102_vm1, %v2870_v11  ;;  %v1650_v60 = vadd.f32 %v1648_v5, %v7012_v51 }
0x2a79   :  { %6230 = vmatprep.mubr.msk.f32.mxu0 %vm6828_vm0, %v6827_v1 }
0x2a7b   :  { %v2172_v45 = vpop.permute.xlu1 %2171  ;;  %v2206_v23 = vpop.permute.xlu0 %2205 }
0x2a7c   :  { %v2174_v50 = vmul.f32 %v7489_v47, %v2172_v45  ;;  %v2208_v56 = vadd.f32 %v2206_v23, %v7272_v27 }
0x2a7e   :  { %2176 = vrot.lane.b32.xlu1 %v2174_v50, %s6831_s14 }
0x2a7f   :  { %v1672_v55 = vpop.permute.xlu1 %1671  ;;  %v1683_v6 = vpop.permute.xlu0 %1682 }
0x2a80   :  { %v1674_v13 = vadd.f32 %v1672_v55, %v7007_v43  ;;  %v7506_v43 = vld [vmem:[%s8133_s4 + $0x10] sm:$0xff]  ;;  %v1685_v4 = vmul.f32 %v6656_v29, %v1683_v6 }
0x2a81   :  { %6214 = vmatpush3.msra.mxu1 %v7506_v43 }
0x2a82   :  { %6661 = vtanh.f32 %v1674_v13  ;;  %6215 = vmatprep.subr.mxu1 %v6827_v1 }
0x2a83   :  { %6663 = vtanh.f32 %v1650_v60  ;;  %6216 = vmatpush3.msra.mxu1 %v7515_v17 }
0x2a84   :  { %6665 = vtanh.f32 %v2208_v56  ;;  %6217 = vmatprep.subr.mxu1 %v6827_v1 }
0x2a85   :  { %6218 = vmatpush3.msra.mxu1 %v7525_v26 }
0x2a86   :  { %6239 = vmatprep.subr.mxu1 %v6827_v1 }
0x2a8f   :  { %v6662_v19 = vpop.eup %6661 }
0x2a90   :  { %1678 = vrot.lane.b32.xlu1 %v6662_v19, %s6829_s0  ;;  %v6664_v51 = vpop.eup %6663 }
0x2a91   :  { %v6666_v32 = vpop.eup %6665 }
0x2a94   :  { %1654 = vrot.lane.b32.xlu1 %v6664_v51, %s6829_s0 }
0x2a98   :  { %2212 = vrot.lane.b32.xlu1 %v6666_v32, %s6829_s0 }
0x2a9c   :  { %526 = vrot.lane.b32.xlu1 %v7025_v22, %s6829_s0  ;;  %v2216_v22 = vrot.slane %v7333_v14, 1 }
0x2af0   :  { %v2177_v53 = vpop.permute.xlu1 %2176 }
0x2af1   :  { %v2179_v54 = vadd.f32 %v2177_v53, %v7272_v27 }
0x2af3   :  { %6667 = vtanh.f32 %v2179_v54 }
0x2b00   :  { %v6668_v12 = vpop.eup %6667 }
0x2b01   :  { %2183 = vrot.lane.b32.xlu0 %v6668_v12, %s6829_s0 }
0x2b02   :  { %v1679_v2 = vpop.permute.xlu1 %1678 }
0x2b03   :  { %v1681_v9 = vmul.f32 %v1679_v2, %v1676_v8 }
0x2b05   :  { %v1686_v24 = vadd.f32 %v1685_v4, %v1681_v9  ;;  %2217 = vrot.lane.b32.xlu0 %v2216_v22, %s6833_s16 }
0x2b06   :  { %v1655_v25 = vpop.permute.xlu1 %1654 }
0x2b07   :  { %1694 = vrot.lane.b32.xlu1 %v1686_v24, %s6832_s15 }
0x2b09   :  { %681 = vrot.lane.b32.xlu0 %v7053_v7, %s6829_s0  ;;  %v1652_v7 = vsub.f32 1.0, %v7469_v63 }
0x2b0a   :  { %v2213_v27 = vpop.permute.xlu1 %2212 }
0x2b0b   :  { %890 = vrot.lane.b32.xlu1 %v7097_v37, %s6829_s0  ;;  %v1657_v37 = vmul.f32 %v1655_v25, %v1652_v7 }
0x2b0d   :  { %3087 = vrot.lane.b32.xlu0 %v7499_v57, %s6830_s2 }
0x2b0e   :  { %v527_v28 = vpop.permute.xlu1 %526 }
0x2b0f   :  { %530 = vst.msk [vmem:[#allocation2] sm:$0x7] %vm529_vm7, %v527_v28  ;;  %3085 = vrot.lane.b32.xlu1 %v7506_v43, %s6830_s2  ;;  %vm1691_vm7 = vcmask 130053  }
0x2b11   :  { %898 = vrot.lane.b32.xlu0 %v7089_v20, %s6832_s15  ;;  %v1660_v20 = vmul.f32 %v7469_v63, %v1658_v33 }
0x2b13   :  { %1401 = vrot.lane.b32.xlu1 %v7190_v30, %s6832_s15 }
0x2b15   :  { %1389 = vrot.lane.b32.xlu0 %v7198_v49, %s6829_s0 }
0x2b17   :  { %531 = vrot.lane.b32.xlu1 %v7021_v15, %s6832_s15  ;;  %v1661_v15 = vadd.f32 %v1660_v20, %v1657_v37 }
0x2b19   :  { %3083 = vrot.lane.b32.xlu0 %v7515_v17, %s6830_s2 }
0x2b1b   :  { %900 = vrot.lane.b32.xlu1 %v7091_v21, %s6832_s15 }
0x2b1d   :  { %686 = vrot.lane.b32.xlu0 %v7049_v62, %s6832_s15 }
0x2b1f   :  { %1391 = vrot.lane.b32.xlu1 %v7196_v48, %s6829_s0  ;;  %v2187_v48 = vrot.slane %v7333_v14, 6 }
0x2b21   :  { %3081 = vrot.lane.b32.xlu0 %v7525_v26, %s6830_s2 }
0x2b23   :  { %1688 = vrot.lane.b32.xlu1 %v1661_v15, %s6829_s0 }
0x2b25   :  { %1550 = vrot.lane.b32.xlu0 %v7227_v46, %s6829_s0  ;;  %v2189_v46 = vmul.f32 %v7489_v47, %v2187_v48 }
0x2b27   :  { %1929 = vrot.lane.b32.xlu1 %v7286_v3, %s6829_s0  ;;  %v2210_v3 = vsub.f32 1.0, %v7475_v34 }
0x2b38   :  { %v2939_v62 = vpop.f32.mrf.mxu0 }
0x2b39   :  { %v2940_v21 = vadd.f32 %v2939_v62, %v7370_v35  ;;  %v2215_v35 = vmul.f32 %v2213_v27, %v2210_v3 }
0x2b3a   :  { %v6210_v30 = vpop.f32.mrf.mxu0 }
0x2b3b   :  { %v2944_v49 = vrot.slane %v2940_v21, 3  ;;  %v5753_v21 = vld [vmem:[#allocation6 + $0x7] ss:$0 sm:$0xff] }
0x2b3d   :  { %2953 = vrot.lane.b32.xlu0 %v2944_v49, %s6834_s20  ;;  %v2946_v45 = vadd.f32 %v2944_v49, %v7375_v44 }
0x2b3f   :  { %v5750_v5 = vmul.f32 -1.442695, %v2946_v45 }
0x2b41   :  { %1933 = vrot.lane.b32.xlu0 %v7282_v59, %s6832_s15  ;;  %6669 = vpow2.f32 %v5750_v5 }
0x2b4e   :  { %v6670_v12 = vpop.eup %6669 }
0x2b4f   :  { %v2950_v6 = vadd.f32 1.0, %v6670_v12 }
0x2b51   :  { %6671 = vrcp.f32 %v2950_v6 }
0x2b5e   :  { %v6672_v2 = vpop.eup %6671 }
0x2b73   :  { %v2184_v63 = vpop.permute.xlu0 %2183 }
0x2b74   :  { %v2186_v29 = vmul.f32 %v2184_v63, %v2181_v38  ;;  %v2963_v63 = vsub.f32 1.0, %v6672_v2 }
0x2b76   :  { %v2190_v33 = vadd.f32 %v2189_v46, %v2186_v29  ;;  %v2969_v46 = vrot.slane %v7467_v61, 7 }
0x2b77   :  { %v2218_v39 = vpop.permute.xlu0 %2217 }
0x2b78   :  { %v2220_v40 = vmul.f32 %v7475_v34, %v2218_v39  ;;  %2223 = vrot.lane.b32.xlu1 %v2190_v33, %s6829_s0  ;;  %v2971_v3 = vmul.f32 %v6672_v2, %v2969_v46 }
0x2b79   :  { %v1695_v18 = vpop.permute.xlu1 %1694 }
0x2b7a   :  { %v2221_v59 = vadd.f32 %v2220_v40, %v2215_v35  ;;  %1698 = vst.msk [vmem:[#allocation2] sm:$0x7] %vm1697_vm8, %v1695_v18  ;;  %vm1553_vm8 = vcmask 126978   ;;  %v5751_v18 = vld [vmem:[#allocation6 + $0x6] ss:$0 sm:$0xff] }
0x2b7b   :  { %v682_v14 = vpop.permute.xlu0 %681 }
0x2b7c   :  { %685 = vst.msk [vmem:[#allocation2] sm:$0x38] %vm684_vm10, %v682_v14  ;;  %2229 = vrot.lane.b32.xlu0 %v2221_v59, %s6832_s15  ;;  %vm1936_vm10 = vcmask 256130  }
0x2b7d   :  { %1556 = vst.msk [vmem:[#allocation2] sm:$0x38] %vm1555_vm11, %v7230_v52  ;;  %v891_v41 = vpop.permute.xlu1 %890  ;;  %vm2226_vm11 = vcmask 124930  }
0x2b7e   :  { %897 = vst.msk [vmem:[#allocation2 + $0x8] sm:$0x1] %vm896_vm12, %v891_v41 }
0x2b7f   :  { %v3088_v42 = vpop.permute.xlu0 %3087 }
0x2b80   :  { %6223 = vmatpush3.msra.mxu0 %v3088_v42 }
0x2b81   :  { %v3086_v34 = vpop.permute.xlu1 %3085  ;;  %6224 = vmatprep.subr.mxu0 %v6827_v1 }
0x2b82   :  { %6225 = vmatpush3.msra.mxu0 %v3086_v34  ;;  %v2995_v34 = vld [vmem:[#allocation6 + $0xd] sm:$0x1] }
0x2b83   :  { %v899_v11 = vpop.permute.xlu0 %898  ;;  %6226 = vmatprep.subr.mxu0 %v6827_v1 }
0x2b84   :  { %905 = vst.msk [vmem:[#allocation2 + $0x8] sm:$0x80] %vm904_vm13, %v899_v11  ;;  %v7587_v19 = vld [vmem:[#allocation2] sm:$0xff]  ;;  %vm2755_vm13 = vcmask 257027   ;;  %v3261_v11 = vshrl.u32 %v79_v10, 7 }
0x2b85   :  { %v1402_v47 = vpop.permute.xlu1 %1401 }
0x2b86   :  { %1408 = vst.msk [vmem:[#allocation2 + $0x8] sm:$0x1] %vm1407_vm14, %v1402_v47  ;;  %v3262_v47 = vsub.s32 0, %v3261_v11 }
0x2b87   :  { %v1390_v52 = vpop.permute.xlu0 %1389 }
0x2b88   :  { %1396 = vst.msk [vmem:[#allocation2 + $0x8] sm:$0x80] %vm1395_vm15, %v1390_v52  ;;  %vm2866_vm15 = vcmask 258052  }
0x2b89   :  { %v532_v50 = vpop.permute.xlu1 %531 }
0x2b8a   :  { %535 = vst.msk [vmem:[#allocation2 + $0x10] sm:$0xe0] %vm534_vm2, %v532_v50  ;;  %vm2977_vm2 = vcmask 259077   ;;  %v5765_v50 = vld [vmem:[#allocation6 + $0x9] ss:$0 sm:$0xff] }
0x2b8b   :  { %v3084_v55 = vpop.permute.xlu0 %3083 }
0x2b8c   :  { %6227 = vmatpush3.msra.mxu0 %v3084_v55 }
0x2b8d   :  { %v901_v13 = vpop.permute.xlu1 %900  ;;  %6228 = vmatprep.subr.mxu0 %v6827_v1 }
0x2b8e   :  { %907 = vst.msk [vmem:[#allocation2 + $0x10] sm:$0x3] %vm906_vm3, %v901_v13  ;;  %vm3258_vm3 = vcmp.gt.f32.partialorder %v2995_v34, 0.5  ;;  %v3446_v13 = vmul.f32 %v5765_v50, %v7002_v36  ;;  %v7665_v36 = vld [vmem:[%s8135_s6] sm:$0x3] }
0x2b8f   :  { %v687_v60 = vpop.permute.xlu0 %686  ;;  %v7594_v53 = vld [vmem:[#allocation2 + $0x8] sm:$0xff]  ;;  %v3259_v45 = vsel %vm3258_vm3, 1, %v6826_v0 }
0x2b90   :  { %690 = vst.msk [vmem:[#allocation2 + $0x10] sm:$0x1c] %vm689_vm4, %v687_v60  ;;  %v3263_v52 = vrot.slane %v3259_v45, %v3262_v47 }
0x2b91   :  { %v1392_v23 = vpop.permute.xlu1 %1391 }
0x2b92   :  { %1398 = vst.msk [vmem:[#allocation2 + $0x10] sm:$0x3] %vm1397_vm5, %v1392_v23  ;;  %vm3264_vm4 = vcmp.eq.s32.totalorder %v3263_v52, 1  ;;  %vm3357_vm5 = vcmask 193536  }
0x2b93   :  { %v3082_v56 = vpop.permute.xlu0 %3081 }
0x2b94   :  { %6229 = vmatpush3.msra.mxu0 %v3082_v56 }
0x2b95   :  { %v1689_v51 = vpop.permute.xlu1 %1688  ;;  %6231 = vmatmul.mubr.msk.f32.vlgmr.msra.gmra.mxu0 %vm102_vm1, %v7587_v19  ;;  %6244 = vmatprep.subr.mxu0 %v6827_v1 }
0x2b96   :  { %1692 = vst.msk [vmem:[#allocation2 + $0x10] sm:$0xe0] %vm1691_vm7, %v1689_v51  ;;  %6233 = vmatprep.mubr.msk.f32.mxu0 %vm6828_vm0, %v6827_v1  ;;  %vm3266_vm7 = vcmask 21504  }
0x2b97   :  { %v1551_v32 = vpop.permute.xlu0 %1550 }
0x2b98   :  { %1554 = vst.msk [vmem:[#allocation2 + $0x10] sm:$0x1c] %vm1553_vm8, %v1551_v32  ;;  %vm3447_vm8 = vcmask 128000   ;;  %v5766_v32 = vld [vmem:[#allocation6 + $0xa] ss:$0 sm:$0xff] }
0x2b99   :  { %v1930_v54 = vpop.permute.xlu1 %1929  ;;  %6234 = vmatmul.mubr.msk.f32.gmra.mxu0 %vm102_vm1, %v7594_v53  ;;  %v3448_v0 = vsel %vm3447_vm8, %v3446_v13, 0.0  ;;  %v7751_v13 = vld [vmem:[#allocation8 + $0x8] sm:$0xff] }
0x2b9a   :  { %1932 = vst.msk [vmem:[%s8141_s12] sm:$0x1] %vm896_vm12, %v1930_v54  ;;  %6236 = vmatprep.mubr.msk.f32.mxu0 %vm6828_vm0, %v6827_v1  ;;  %vm2533_vm12 = vcmask 254977  }
0x2b9f   :  { %v7604_v8 = vld [vmem:[#allocation2 + $0x10] sm:$0xff] }
0x2ba0   :  { %6237 = vmatmul.mubr.msk.f32.gmra.mxu0 %vm102_vm1, %v7604_v8 }
0x2ba1   :  { %6250 = vmatprep.mubr.msk.f32.mxu0 %vm6828_vm0, %v6827_v1 }
0x2baf   :  { %v2954_v22 = vpop.permute.xlu0 %2953 }
0x2bb0   :  { %v2956_v4 = vmul.f32 %v6672_v2, %v2954_v22 }
0x2bb2   :  { %2958 = vrot.lane.b32.xlu1 %v2956_v4, %s6834_s20 }
0x2bb3   :  { %v1934_v9 = vpop.permute.xlu0 %1933 }
0x2bb4   :  { %1937 = vst.msk [vmem:[%s8141_s12] sm:$0x4] %vm1936_vm10, %v1934_v9  ;;  %vm3456_vm10 = vcmask 259072  }
0x2bb6   :  { %2530 = vrot.lane.b32.xlu1 %v7401_v16, %s6830_s2 }
0x2bba   :  { %2752 = vrot.lane.b32.xlu1 %v7445_v58, %s6830_s2 }
0x2bea   :  { %v2224_v24 = vpop.permute.xlu1 %2223 }
0x2beb   :  { %2227 = vst.msk [vmem:[%s8141_s12] sm:$0x4] %vm2226_vm11, %v2224_v24  ;;  %vm3365_vm11 = vcmask 195584  }
0x2bee   :  { %v2230_v25 = vpop.permute.xlu0 %2229 }
0x2bef   :  { %2232 = vst.msk [vmem:[%s8141_s12] sm:$0x1] %vm1407_vm14, %v2230_v25  ;;  %vm2644_vm14 = vcmask 256002  }
0x2bf6   :  { %v2980_v27 = vld [vmem:[%s8141_s12] sm:$0x7] }
0x2bf7   :  { %6220 = vmatmul.mubr.msk.f32.vlgmr.msra.gmra.mxu1 %vm102_vm1, %v2980_v27  ;;  %v5767_v27 = vld [vmem:[#allocation6 + $0xb] ss:$0 sm:$0xff] }
0x2bf8   :  { %6241 = vmatprep.mubr.msk.f32.mxu1 %vm6828_vm0, %v6827_v1 }
0x2c24   :  { %v2959_v16 = vpop.permute.xlu1 %2958 }
0x2c25   :  { %v2961_v58 = vadd.f32 %v2959_v16, %v7375_v44 }
0x2c27   :  { %6673 = vtanh.f32 %v2961_v58 }
0x2c28   :  { %v2531_v28 = vpop.permute.xlu1 %2530 }
0x2c29   :  { %2534 = vst.msk [vmem:[#allocation3] sm:$0x2] %vm2533_vm12, %v2531_v28  ;;  %vm3576_vm12 = vcmask 16384  }
0x2c2c   :  { %v2753_v7 = vpop.permute.xlu1 %2752 }
0x2c2d   :  { %2756 = vst.msk [vmem:[#allocation3] sm:$0x8] %vm2755_vm13, %v2753_v7  ;;  %vm3584_vm13 = vcmask 15360  }
0x2c34   :  { %v6674_v37 = vpop.eup %6673 }
0x2c35   :  { %2965 = vrot.lane.b32.xlu0 %v6674_v37, %s6830_s2 }
0x2c39   :  { %2641 = vrot.lane.b32.xlu0 %v7423_v31, %s6830_s2 }
0x2c3d   :  { %2863 = vrot.lane.b32.xlu0 %v7467_v61, %s6830_s2 }
0x2c55   :  { %v3168_v20 = vpop.f32.mrf.mxu0 }
0x2c56   :  { %v3169_v31 = vadd.f32 %v5753_v21, %v3168_v20 }
0x2c57   :  { %v6232_v15 = vpop.f32.mrf.mxu0 }
0x2c59   :  { %v3173_v62 = vpop.f32.mrf.mxu0 }
0x2c5a   :  { %v3174_v38 = vadd.f32 %v5753_v21, %v3173_v62 }
0x2c5b   :  { %v6235_v44 = vpop.f32.mrf.mxu0 }
0x2c60   :  { %v3178_v30 = vpop.f32.mrf.mxu0 }
0x2c61   :  { %v3179_v49 = vadd.f32 %v5753_v21, %v3178_v30 }
0x2c62   :  { %v6238_v48 = vpop.f32.mrf.mxu0 }
0x2c63   :  { %6245 = vmatpush3.xpose.msk.msra.mxu0 %vm102_vm1, %v3179_v49 }
0x2c64   :  { %6246 = vmatprep.subr.mxu0 %v6827_v1 }
0x2c67   :  { %6247 = vmatpush3.xpose.msk.msra.mxu0 %vm102_vm1, %v3174_v38 }
0x2c68   :  { %6248 = vmatprep.subr.mxu0 %v6827_v1 }
0x2c6b   :  { %6249 = vmatpush3.xpose.msk.msra.mxu0 %vm102_vm1, %v3169_v31 }
0x2c6c   :  { %6269 = vmatprep.subr.mxu0 %v6827_v1 }
0x2ca7   :  { %v2966_v29 = vpop.permute.xlu0 %2965 }
0x2ca8   :  { %v2968_v33 = vmul.f32 %v2966_v29, %v2963_v63 }
0x2caa   :  { %v2972_v39 = vadd.f32 %v2971_v3, %v2968_v33 }
0x2cab   :  { %v2642_v35 = vpop.permute.xlu0 %2641 }
0x2cac   :  { %2645 = vst.msk [vmem:[#allocation3] sm:$0x4] %vm2644_vm14, %v2642_v35  ;;  %2974 = vrot.lane.b32.xlu1 %v2972_v39, %s6830_s2  ;;  %vm3907_vm14 = vcmask 57344  }
0x2cad   :  { %3909 = vst.msk [vmem:[%s8140_s11] sm:$0x1] %vm3907_vm14, %v6827_v1 }
0x2caf   :  { %v2864_v40 = vpop.permute.xlu0 %2863 }
0x2cb0   :  { %2867 = vst.msk [vmem:[#allocation3] sm:$0x10] %vm2866_vm15, %v2864_v40 }
0x2cb7   :  { %v3069_v59 = vpop.f32.mrf.mxu1 }
0x2cb8   :  { %v3070_v14 = vadd.f32 %v5751_v18, %v3069_v59 }
0x2cb9   :  { %v6221_v41 = vpop.f32.mrf.mxu1 }
0x2cba   :  { %6240 = vmatpush3.xpose.msk.msra.mxu1 %vm102_vm1, %v3070_v14 }
0x2cbb   :  { %6253 = vmatprep.subr.mxu1 %v6827_v1 }
0x2d1e   :  { %v2975_v61 = vpop.permute.xlu1 %2974 }
0x2d1f   :  { %2978 = vst.msk [vmem:[#allocation3] sm:$0x20] %vm2977_vm2, %v2975_v61 }
0x2d26   :  { %v7647_v42 = vld [vmem:[#allocation3] sm:$0x3f] }
0x2d27   :  { %6242 = vmatmul.mubr.msk.f32.vlgmr.msra.gmra.mxu1 %vm102_vm1, %v7647_v42  ;;  %6251 = vmatmul.mubr.msk.f32.vlgmr.msra.gmra.mxu0 %vm102_vm1, %v7647_v42  ;;  %v3455_v54 = vmul.f32 %v5766_v32, %v7647_v42  ;;  %v5768_v32 = vld [vmem:[#allocation6 + $0xc] ss:$0 sm:$0xff] }
0x2d28   :  { %6255 = vmatprep.mubr.msk.f32.mxu1 %vm6828_vm0, %v6827_v1  ;;  %6271 = vmatprep.mubr.msk.f32.mxu0 %vm6828_vm0, %v6827_v1 }
0x2d29   :  { %v3457_v12 = vsel %vm3456_vm10, %v3455_v54, 0.0  ;;  %6254 = vmatpush3.xpose.msk.msra.mxu1 %vm3365_vm11, %v7665_v36  ;;  %6270 = vmatpush3.msk.msra.mxu0 %vm873_vm9, %v7665_v36 }
0x2d2a   :  { %6258 = vmatprep.subr.mxu1 %v6827_v1  ;;  %6283 = vmatprep.subr.mxu0 %v6827_v1 }
0x2de7   :  { %v3254_v5 = vpop.f32.mrf.mxu1  ;;  %v3353_v55 = vpop.f32.mrf.mxu0 }
0x2de8   :  { %v3265_v60 = vsel %vm3264_vm4, %v3254_v5, -inf  ;;  %v3358_v23 = vsel %vm3357_vm5, %v3353_v55, -inf  ;;  %v7748_v5 = vld [vmem:[#allocation8 + $0x10] sm:$0xff] }
0x2de9   :  { %v3267_v56 = vsel %vm3266_vm7, %v3265_v60, -inf  ;;  %v6243_v51 = vpop.f32.mrf.mxu1  ;;  %3359 = vmax.xlane.f32.xlu0 %v3358_v23  ;;  %v6252_v10 = vpop.f32.mrf.mxu0 }
0x2dea   :  { %3268 = vmax.xlane.f32.xlu1 %v3267_v56 }
0x2ded   :  { %3449 = vadd.xlane.f32.xlu0 %v3448_v0 }
0x2df1   :  { %3458 = vadd.xlane.f32.xlu0 %v3457_v12 }
0x2e72   :  { %v3360_v6 = vpop.xlane.xlu0 %3359 }
0x2e73   :  { %v3361_v2 = vsub.f32 %v3353_v55, %v3360_v6  ;;  %v3269_v22 = vpop.xlane.xlu1 %3268 }
0x2e74   :  { %v3270_v4 = vsub.f32 %v3265_v60, %v3269_v22  ;;  %v7757_v60 = vld [vmem:[#allocation8] sm:$0xff] }
0x2e75   :  { %v3362_v9 = vmul.f32 1.442695, %v3361_v2 }
0x2e76   :  { %v3271_v24 = vmul.f32 1.442695, %v3270_v4  ;;  %v3450_v25 = vpop.xlane.xlu0 %3449 }
0x2e77   :  { %6675 = vpow2.f32 %v3362_v9 }
0x2e78   :  { %6677 = vpow2.f32 %v3271_v24 }
0x2e7a   :  { %v3459_v16 = vpop.xlane.xlu0 %3458 }
0x2e7b   :  { %v3460_v58 = vadd.f32 %v3459_v16, %v3450_v25 }
0x2e7d   :  { %v7673_v28 = vadd.f32 %v5767_v27, %v3460_v58 }
0x2e7f   :  { %v5770_v7 = vmul.f32 -1.442695, %v7673_v28 }
0x2e81   :  { %6679 = vpow2.f32 %v5770_v7  ;;  %v7800_v7 = vld [vmem:[#allocation6 + $0x8] sm:$0x1] }
0x2e84   :  { %v7676_v37 = vpop.eup %6675 }
0x2e85   :  { %v6678_v20 = vpop.eup %6677  ;;  %6256 = vmatmul.mubr.msk.f32.vlgmr.msra.gmra.mxu1 %vm3365_vm11, %v7676_v37 }
0x2e86   :  { %v3273_v15 = vsel %vm3266_vm7, %v6678_v20, 0.0  ;;  %6266 = vmatprep.mubr.msk.f32.mxu1 %vm6828_vm0, %v6827_v1 }
0x2e87   :  { %3274 = vadd.xlane.f32.xlu1 %v3273_v15 }
0x2e8e   :  { %v6680_v62 = vpop.eup %6679 }
0x2e8f   :  { %v3559_v44 = vadd.f32 1.0, %v6680_v62 }
0x2e91   :  { %6681 = vrcp.f32 %v3559_v44  ;;  %v3912_v44 = vrot.slane %v7673_v28, 1 }
0x2e9e   :  { %v6682_v21 = vpop.eup %6681 }
0x2e9f   :  { %3571 = vperm.xlu1 %6488, %v6682_v21   ;;  %v3562_v30 = vsub.f32 1.0, %v6682_v21 }
0x2ea1   :  { %3565 = vperm.xlu0 %6487, %v3562_v30  }
0x2ea5   :  { %3476 = vrot.lane.b32.xlu0 %v7499_v57, %s6831_s14 }
0x2ea9   :  { %3474 = vrot.lane.b32.xlu0 %v7506_v43, %s6831_s14 }
0x2ead   :  { %3472 = vrot.lane.b32.xlu0 %v7515_v17, %s6831_s14 }
0x2eb1   :  { %3470 = vrot.lane.b32.xlu0 %v7525_v26, %s6831_s14 }
0x2eb5   :  { %3740 = vrot.lane.b32.xlu0 %v7499_v57, %s6834_s20 }
0x2eb9   :  { %3738 = vrot.lane.b32.xlu0 %v7506_v43, %s6834_s20 }
0x2ebd   :  { %3736 = vrot.lane.b32.xlu0 %v7515_v17, %s6834_s20 }
0x2ec1   :  { %3734 = vrot.lane.b32.xlu0 %v7525_v26, %s6834_s20 }
0x2f10   :  { %v3275_v49 = vpop.xlane.xlu1 %3274 }
0x2f11   :  { %6683 = vrcp.f32 %v3275_v49 }
0x2f1a   :  { %v3572_v31 = vpop.permute.xlu1 %3571 }
0x2f1b   :  { %v3574_v29 = vmul.f32 0.0, %v3572_v31 }
0x2f1c   :  { %v3566_v48 = vpop.permute.xlu0 %3565 }
0x2f1e   :  { %v6684_v38 = vpop.eup %6683 }
0x2f1f   :  { %v7699_v63 = vmul.f32 %v6684_v38, %v6678_v20 }
0x2f20   :  { %v3477_v46 = vpop.permute.xlu0 %3476 }
0x2f21   :  { %v3568_v57 = vmul.f32 %v3566_v48, %v7699_v63  ;;  %6259 = vmatpush3.msra.mxu1 %v3477_v46 }
0x2f22   :  { %6260 = vmatprep.subr.mxu1 %v6827_v1 }
0x2f23   :  { %v3575_v43 = vadd.f32 %v3574_v29, %v3568_v57  ;;  %v3928_v57 = vrot.slane %v7699_v63, 1 }
0x2f24   :  { %v3475_v17 = vpop.permute.xlu0 %3474 }
0x2f25   :  { %v3577_v3 = vsel %vm3576_vm12, %v3575_v43, 0.0  ;;  %6261 = vmatpush3.msra.mxu1 %v3475_v17 }
0x2f26   :  { %3578 = vadd.xlane.f32.xlu1 %v3577_v3  ;;  %6262 = vmatprep.subr.mxu1 %v6827_v1 }
0x2f28   :  { %v3473_v26 = vpop.permute.xlu0 %3472 }
0x2f29   :  { %6263 = vmatpush3.msra.mxu1 %v3473_v26 }
0x2f2a   :  { %6264 = vmatprep.subr.mxu1 %v6827_v1 }
0x2f2c   :  { %v3471_v33 = vpop.permute.xlu0 %3470 }
0x2f2d   :  { %6265 = vmatpush3.msra.mxu1 %v3471_v33 }
0x2f2e   :  { %6267 = vmatmul.mubr.msk.f32.vlgmr.msra.gmra.mxu1 %vm102_vm1, %v7647_v42  ;;  %6274 = vmatprep.subr.mxu1 %v6827_v1 }
0x2f2f   :  { %6275 = vmatpush3.msra.mxu1 %v7604_v8  ;;  %6280 = vmatprep.mubr.msk.f32.mxu1 %vm6828_vm0, %v6827_v1 }
0x2f30   :  { %6276 = vmatprep.subr.mxu1 %v6827_v1  ;;  %v7731_v34 = vpop.permute.xlu0 %3740 }
0x2f31   :  { %6277 = vmatpush3.msra.mxu1 %v7594_v53 }
0x2f32   :  { %6278 = vmatprep.subr.mxu1 %v6827_v1 }
0x2f33   :  { %6279 = vmatpush3.msra.mxu1 %v7587_v19 }
0x2f34   :  { %6294 = vmatprep.subr.mxu1 %v6827_v1  ;;  %v7735_v11 = vpop.permute.xlu0 %3738 }
0x2f38   :  { %v7739_v47 = vpop.permute.xlu0 %3736 }
0x2f3c   :  { %v7743_v45 = vpop.permute.xlu0 %3734 }
0x2f45   :  { %v7717_v39 = vpop.f32.mrf.mxu1 }
0x2f47   :  { %v6257_v35 = vpop.f32.mrf.mxu1 }
0x2f48   :  { %v3944_v35 = vrot.slane %v7717_v39, 1 }
0x2faf   :  { %v3579_v40 = vpop.xlane.xlu1 %3578 }
0x2fb0   :  { %6685 = vrcp.f32 %v3579_v40 }
0x2fb1   :  { %6687 = vrcp.f32 %v7717_v39 }
0x2fbd   :  { %v6686_v18 = vpop.eup %6685 }
0x2fbe   :  { %v7720_v59 = vmul.f32 %v6686_v18, %v3575_v43  ;;  %v6688_v14 = vpop.eup %6687 }
0x2fc0   :  { %3906 = vst.msk [vmem:[%s8139_s10] sm:$0x1] %vm3576_vm12, %v7720_v59  ;;  %v3583_v41 = vmul.f32 %v6688_v14, %v7720_v59 }
0x2fc2   :  { %6272 = vmatmul.mubr.msk.f32.vlgmr.msra.gmra.mxu0 %vm3584_vm13, %v3583_v41 }
0x2fc3   :  { %6291 = vmatprep.mubr.msk.f32.mxu0 %vm6828_vm0, %v6827_v1  ;;  %6284 = vmatpush3.msra.mxu0 %v7731_v34 }
0x2fc4   :  { %6285 = vmatprep.subr.mxu0 %v6827_v1 }
0x2fc5   :  { %6286 = vmatpush3.msra.mxu0 %v7735_v11 }
0x2fc6   :  { %6287 = vmatprep.subr.mxu0 %v6827_v1 }
0x2fc7   :  { %6288 = vmatpush3.msra.mxu0 %v7739_v47 }
0x2fc8   :  { %6289 = vmatprep.subr.mxu0 %v6827_v1 }
0x2fc9   :  { %6290 = vmatpush3.msra.mxu0 %v7743_v45 }
0x2fca   :  { %6303 = vmatprep.subr.mxu0 %v6827_v1 }
0x2fee   :  { %v3548_v61 = vpop.f32.mrf.mxu1 }
0x2fef   :  { %v7795_v0 = vadd.f32 %v5768_v32, %v3548_v61 }
0x2ff0   :  { %v6268_v42 = vpop.f32.mrf.mxu1 }
0x3082   :  { %v3656_v52 = vpop.f32.mrf.mxu0 }
0x3083   :  { %v3660_v50 = vmul.f32 %v7676_v37, %v3656_v52 }
0x3084   :  { %v6273_v55 = vpop.f32.mrf.mxu0 }
0x3085   :  { %6281 = vmatmul.mubr.msk.f32.vlgmr.msra.gmra.mxu1 %vm3365_vm11, %v3660_v50 }
0x3086   :  { %6295 = vmatpush3.msra.mxu1 %v7748_v5  ;;  %6300 = vmatprep.mubr.msk.f32.mxu1 %vm6828_vm0, %v6827_v1 }
0x3087   :  { %6296 = vmatprep.subr.mxu1 %v6827_v1 }
0x3088   :  { %6297 = vmatpush3.msra.mxu1 %v7751_v13 }
0x3089   :  { %6298 = vmatprep.subr.mxu1 %v6827_v1 }
0x308a   :  { %6299 = vmatpush3.msra.mxu1 %v7757_v60 }
0x308b   :  { %6301 = vmatmul.mubr.msk.f32.vlgmr.msra.gmra.mxu1 %vm3365_vm11, %v3660_v50  ;;  %6308 = vmatprep.subr.mxu1 %v6827_v1 }
0x308c   :  { %6309 = vmatpush3.msra.mxu1 %v7604_v8  ;;  %6314 = vmatprep.mubr.msk.f32.mxu1 %vm6828_vm0, %v6827_v1 }
0x308d   :  { %6310 = vmatprep.subr.mxu1 %v6827_v1 }
0x308e   :  { %6311 = vmatpush3.msra.mxu1 %v7594_v53 }
0x308f   :  { %6312 = vmatprep.subr.mxu1 %v6827_v1 }
0x3090   :  { %6313 = vmatpush3.msra.mxu1 %v7587_v19 }
0x3091   :  { %6328 = vmatprep.subr.mxu1 %v6827_v1 }
0x3145   :  { %v3730_v23 = vpop.f32.mrf.mxu1 }
0x3146   :  { %6292 = vmatmul.mubr.msk.f32.vlgmr.msra.gmra.mxu0 %vm102_vm1, %v3730_v23 }
0x3147   :  { %v6282_v56 = vpop.f32.mrf.mxu1  ;;  %6304 = vmatpush3.msk.msra.mxu0 %vm873_vm9, %v7665_v36  ;;  %6305 = vmatprep.mubr.msk.f32.mxu0 %vm6828_vm0, %v6827_v1 }
0x3148   :  { %6317 = vmatprep.subr.mxu0 %v6827_v1 }
0x314b   :  { %v7783_v51 = vpop.f32.mrf.mxu1 }
0x314c   :  { %3908 = vst.msk [vmem:[%s8138_s9] sm:$0x1] %vm3907_vm14, %v7783_v51  ;;  %4264 = vst.msk [vmem:[%s8140_s11 + $0x1] sm:$0x1] %vm3907_vm14, %v7783_v51 }
0x314d   :  { %v6302_v10 = vpop.f32.mrf.mxu1 }
0x3206   :  { %v3815_v54 = vpop.f32.mrf.mxu0 }
0x3207   :  { %v3816_v12 = vadd.f32 %v3815_v54, %v7795_v0 }
0x3208   :  { %v6293_v6 = vpop.f32.mrf.mxu0 }
0x3209   :  { %v3819_v2 = vsel %vm2425_vm6, %v3816_v12, -inf }
0x320a   :  { %3820 = vmax.xlane.f32.xlu0 %v3819_v2 }
0x3293   :  { %v3821_v22 = vpop.xlane.xlu0 %3820 }
0x3294   :  { %v3822_v4 = vsub.f32 %v3816_v12, %v3821_v22  ;;  %v4100_v12 = vrot.slane %v7795_v0, 1 }
0x3296   :  { %v3823_v9 = vmul.f32 1.442695, %v3822_v4 }
0x3298   :  { %6689 = vpow2.f32 %v3823_v9 }
0x32a5   :  { %v6690_v24 = vpop.eup %6689 }
0x32a6   :  { %v3825_v25 = vsel %vm2425_vm6, %v6690_v24, 0.0 }
0x32a7   :  { %3826 = vadd.xlane.f32.xlu1 %v3825_v25 }
0x3330   :  { %v3827_v27 = vpop.xlane.xlu1 %3826 }
0x3331   :  { %6691 = vlog2.f32 %v3827_v27 }
0x333e   :  { %v6692_v16 = vpop.eup %6691 }
0x333f   :  { %v3829_v58 = vmul.f32 0.6931472, %v6692_v16 }
0x3341   :  { %v3830_v20 = vsub.f32 %v3822_v4, %v3829_v58 }
0x3343   :  { %v3831_v15 = vmul.f32 %v3830_v20, %v7800_v7  ;;  %3905 = vst.msk [vmem:[%s8137_s8] sm:$0x1] %vm2425_vm6, %v3830_v20 }
0x3345   :  { %v3832_v62 = vsel %vm2425_vm6, %v3831_v15, 0.0 }
0x3346   :  { %3833 = vadd.xlane.f32.xlu1 %v3832_v62 }
0x33cf   :  { %v3834_v21 = vpop.xlane.xlu1 %3833 }
0x33d0   :  { %v3914_v30 = vadd.f32 %v3912_v44, %v3834_v21  ;;  %v4266_v21 = vrot.slane %v7673_v28, 2 }
0x33d2   :  { %v5776_v49 = vmul.f32 -1.442695, %v3914_v30 }
0x33d4   :  { %6693 = vpow2.f32 %v5776_v49 }
0x33e1   :  { %v6694_v48 = vpop.eup %6693 }
0x33e2   :  { %v3918_v38 = vadd.f32 1.0, %v6694_v48 }
0x33e4   :  { %6695 = vrcp.f32 %v3918_v38 }
0x33f1   :  { %v6696_v31 = vpop.eup %6695 }
0x33f2   :  { %v3921_v46 = vsub.f32 1.0, %v6696_v31 }
0x33f4   :  { %3924 = vperm.xlu1 %6488, %v3921_v46  }
0x33f8   :  { %3933 = vperm.xlu1 %6488, %v6696_v31  }
0x346f   :  { %v3925_v29 = vpop.permute.xlu1 %3924 }
0x3470   :  { %v3930_v17 = vmul.f32 %v3928_v57, %v3925_v29 }
0x3473   :  { %v3934_v43 = vpop.permute.xlu1 %3933 }
0x3474   :  { %v3936_v3 = vmul.f32 %v3934_v43, %v7720_v59  ;;  %v4281_v43 = vrot.slane %v7699_v63, 2 }
0x3476   :  { %v3937_v26 = vadd.f32 %v3936_v3, %v3930_v17 }
0x3478   :  { %v3938_v33 = vsel %vm3576_vm12, %v3937_v26, 0.0 }
0x3479   :  { %3939 = vadd.xlane.f32.xlu1 %v3938_v33 }
0x3502   :  { %v3940_v40 = vpop.xlane.xlu1 %3939 }
0x3503   :  { %6697 = vrcp.f32 %v3940_v40  ;;  %v4296_v40 = vrot.slane %v7717_v39, 2 }
0x3504   :  { %6699 = vrcp.f32 %v3944_v35 }
0x3510   :  { %v6698_v18 = vpop.eup %6697 }
0x3511   :  { %v7813_v14 = vmul.f32 %v6698_v18, %v3937_v26  ;;  %v6700_v41 = vpop.eup %6699 }
0x3513   :  { %4262 = vst.msk [vmem:[%s8139_s10 + $0x1] sm:$0x1] %vm3576_vm12, %v7813_v14  ;;  %v3947_v59 = vmul.f32 %v6700_v41, %v7813_v14 }
0x3515   :  { %6306 = vmatmul.mubr.msk.f32.vlgmr.msra.gmra.mxu0 %vm3584_vm13, %v3947_v59 }
0x3516   :  { %6318 = vmatpush3.msra.mxu0 %v7731_v34  ;;  %6325 = vmatprep.mubr.msk.f32.mxu0 %vm6828_vm0, %v6827_v1 }
0x3517   :  { %6319 = vmatprep.subr.mxu0 %v6827_v1 }
0x3518   :  { %6320 = vmatpush3.msra.mxu0 %v7735_v11 }
0x3519   :  { %6321 = vmatprep.subr.mxu0 %v6827_v1 }
0x351a   :  { %6322 = vmatpush3.msra.mxu0 %v7739_v47 }
0x351b   :  { %6323 = vmatprep.subr.mxu0 %v6827_v1 }
0x351c   :  { %6324 = vmatpush3.msra.mxu0 %v7743_v45 }
0x351d   :  { %6337 = vmatprep.subr.mxu0 %v6827_v1 }
0x35d5   :  { %v4017_v61 = vpop.f32.mrf.mxu0 }
0x35d6   :  { %v4022_v42 = vrot.slane %v4017_v61, 7 }
0x35d7   :  { %v6307_v52 = vpop.f32.mrf.mxu0 }
0x35d8   :  { %v4024_v50 = vmul.f32 %v7676_v37, %v4022_v42 }
0x35da   :  { %v4026_v55 = vrot.slane %v4024_v50, 1 }
0x35dc   :  { %6315 = vmatmul.mubr.msk.f32.vlgmr.msra.gmra.mxu1 %vm3365_vm11, %v4026_v55 }
0x35dd   :  { %6329 = vmatpush3.msra.mxu1 %v7748_v5  ;;  %6334 = vmatprep.mubr.msk.f32.mxu1 %vm6828_vm0, %v6827_v1 }
0x35de   :  { %6330 = vmatprep.subr.mxu1 %v6827_v1 }
0x35df   :  { %6331 = vmatpush3.msra.mxu1 %v7751_v13 }
0x35e0   :  { %6332 = vmatprep.subr.mxu1 %v6827_v1 }
0x35e1   :  { %6333 = vmatpush3.msra.mxu1 %v7757_v60 }
0x35e2   :  { %6335 = vmatmul.mubr.msk.f32.vlgmr.msra.gmra.mxu1 %vm3365_vm11, %v4026_v55  ;;  %6342 = vmatprep.subr.mxu1 %v6827_v1 }
0x35e3   :  { %6343 = vmatpush3.msra.mxu1 %v7604_v8  ;;  %6348 = vmatprep.mubr.msk.f32.mxu1 %vm6828_vm0, %v6827_v1 }
0x35e4   :  { %6344 = vmatprep.subr.mxu1 %v6827_v1 }
0x35e5   :  { %6345 = vmatpush3.msra.mxu1 %v7594_v53 }
0x35e6   :  { %6346 = vmatprep.subr.mxu1 %v6827_v1 }
0x35e7   :  { %6347 = vmatpush3.msra.mxu1 %v7587_v19 }
0x35e8   :  { %6362 = vmatprep.subr.mxu1 %v6827_v1 }
0x369c   :  { %v4095_v23 = vpop.f32.mrf.mxu1 }
0x369d   :  { %6326 = vmatmul.mubr.msk.f32.vlgmr.msra.gmra.mxu0 %vm102_vm1, %v4095_v23 }
0x369e   :  { %v6316_v56 = vpop.f32.mrf.mxu1  ;;  %6338 = vmatpush3.msk.msra.mxu0 %vm873_vm9, %v7665_v36  ;;  %6339 = vmatprep.mubr.msk.f32.mxu0 %vm6828_vm0, %v6827_v1 }
0x369f   :  { %6351 = vmatprep.subr.mxu0 %v6827_v1 }
0x36a2   :  { %v4257_v10 = vpop.f32.mrf.mxu1 }
0x36a3   :  { %4263 = vst.msk [vmem:[%s8138_s9 + $0x1] sm:$0x1] %vm3907_vm14, %v4257_v10  ;;  %v7862_v32 = vadd.f32 %v4257_v10, %v7783_v51 }
0x36a4   :  { %v6336_v54 = vpop.f32.mrf.mxu1 }
0x36a5   :  { %4615 = vst.msk [vmem:[%s8140_s11 + $0x2] sm:$0x1] %vm3907_vm14, %v7862_v32 }
0x375d   :  { %v4171_v6 = vpop.f32.mrf.mxu0 }
0x375e   :  { %v4172_v2 = vadd.f32 %v4171_v6, %v4100_v12  ;;  %v4451_v12 = vrot.slane %v7795_v0, 2 }
0x375f   :  { %v6327_v22 = vpop.f32.mrf.mxu0 }
0x3760   :  { %v4175_v4 = vsel %vm2425_vm6, %v4172_v2, -inf }
0x3761   :  { %4176 = vmax.xlane.f32.xlu0 %v4175_v4 }
0x37ea   :  { %v4177_v9 = vpop.xlane.xlu0 %4176 }
0x37eb   :  { %v4178_v24 = vsub.f32 %v4172_v2, %v4177_v9 }
0x37ed   :  { %v4179_v25 = vmul.f32 1.442695, %v4178_v24 }
0x37ef   :  { %6701 = vpow2.f32 %v4179_v25 }
0x37fc   :  { %v6702_v51 = vpop.eup %6701 }
0x37fd   :  { %v4181_v27 = vsel %vm2425_vm6, %v6702_v51, 0.0 }
0x37fe   :  { %4182 = vadd.xlane.f32.xlu0 %v4181_v27 }
0x3887   :  { %v4183_v16 = vpop.xlane.xlu0 %4182 }
0x3888   :  { %6703 = vlog2.f32 %v4183_v16 }
0x3895   :  { %v6704_v58 = vpop.eup %6703 }
0x3896   :  { %v4185_v20 = vmul.f32 0.6931472, %v6704_v58 }
0x3898   :  { %v4186_v15 = vsub.f32 %v4178_v24, %v4185_v20 }
0x389a   :  { %v4187_v62 = vmul.f32 %v4186_v15, %v7800_v7  ;;  %4261 = vst.msk [vmem:[%s8137_s8 + $0x1] sm:$0x1] %vm2425_vm6, %v4186_v15 }
0x389c   :  { %v4188_v44 = vsel %vm2425_vm6, %v4187_v62, 0.0 }
0x389d   :  { %4189 = vadd.xlane.f32.xlu0 %v4188_v44  ;;  %v4617_v44 = vrot.slane %v7673_v28, 3 }
0x3926   :  { %v4190_v30 = vpop.xlane.xlu0 %4189 }
0x3927   :  { %v4268_v49 = vadd.f32 %v4266_v21, %v4190_v30 }
0x3929   :  { %v5782_v48 = vmul.f32 -1.442695, %v4268_v49 }
0x392b   :  { %6705 = vpow2.f32 %v5782_v48 }
0x3938   :  { %v6706_v38 = vpop.eup %6705 }
0x3939   :  { %v4272_v31 = vadd.f32 1.0, %v6706_v38 }
0x393b   :  { %6707 = vrcp.f32 %v4272_v31 }
0x3948   :  { %v6708_v46 = vpop.eup %6707 }
0x3949   :  { %v4275_v29 = vsub.f32 1.0, %v6708_v46 }
0x394b   :  { %4278 = vperm.xlu0 %6487, %v4275_v29  }
0x394f   :  { %4286 = vperm.xlu0 %6487, %v6708_v46  }
0x39c6   :  { %v4279_v57 = vpop.permute.xlu0 %4278 }
0x39c7   :  { %v4283_v3 = vmul.f32 %v4281_v43, %v4279_v57  ;;  %v4632_v57 = vrot.slane %v7699_v63, 3 }
0x39ca   :  { %v4287_v17 = vpop.permute.xlu0 %4286 }
0x39cb   :  { %v4289_v26 = vmul.f32 %v4287_v17, %v7813_v14 }
0x39cd   :  { %v4290_v33 = vadd.f32 %v4289_v26, %v4283_v3 }
0x39cf   :  { %v4291_v35 = vsel %vm3576_vm12, %v4290_v33, 0.0 }
0x39d0   :  { %4292 = vadd.xlane.f32.xlu1 %v4291_v35  ;;  %v4647_v35 = vrot.slane %v7717_v39, 3 }
0x3a59   :  { %v4293_v18 = vpop.xlane.xlu1 %4292 }
0x3a5a   :  { %6709 = vrcp.f32 %v4293_v18 }
0x3a5b   :  { %6711 = vrcp.f32 %v4296_v40 }
0x3a67   :  { %v6710_v41 = vpop.eup %6709 }
0x3a68   :  { %v7883_v59 = vmul.f32 %v6710_v41, %v4290_v33  ;;  %v6712_v61 = vpop.eup %6711 }
0x3a6a   :  { %4613 = vst.msk [vmem:[%s8139_s10 + $0x2] sm:$0x1] %vm3576_vm12, %v7883_v59  ;;  %v4299_v14 = vmul.f32 %v6712_v61, %v7883_v59 }
0x3a6c   :  { %6340 = vmatmul.mubr.msk.f32.vlgmr.msra.gmra.mxu0 %vm3584_vm13, %v4299_v14 }
0x3a6d   :  { %6352 = vmatpush3.msra.mxu0 %v7731_v34  ;;  %6359 = vmatprep.mubr.msk.f32.mxu0 %vm6828_vm0, %v6827_v1 }
0x3a6e   :  { %6353 = vmatprep.subr.mxu0 %v6827_v1 }
0x3a6f   :  { %6354 = vmatpush3.msra.mxu0 %v7735_v11 }
0x3a70   :  { %6355 = vmatprep.subr.mxu0 %v6827_v1 }
0x3a71   :  { %6356 = vmatpush3.msra.mxu0 %v7739_v47 }
0x3a72   :  { %6357 = vmatprep.subr.mxu0 %v6827_v1 }
0x3a73   :  { %6358 = vmatpush3.msra.mxu0 %v7743_v45 }
0x3a74   :  { %6371 = vmatprep.subr.mxu0 %v6827_v1 }
0x3b2c   :  { %v4369_v42 = vpop.f32.mrf.mxu0 }
0x3b2d   :  { %v4374_v52 = vrot.slane %v4369_v42, 6 }
0x3b2e   :  { %v6341_v50 = vpop.f32.mrf.mxu0 }
0x3b2f   :  { %v4376_v55 = vmul.f32 %v7676_v37, %v4374_v52 }
0x3b31   :  { %v4378_v23 = vrot.slane %v4376_v55, 2 }
0x3b33   :  { %6349 = vmatmul.mubr.msk.f32.vlgmr.msra.gmra.mxu1 %vm3365_vm11, %v4378_v23 }
0x3b34   :  { %6363 = vmatpush3.msra.mxu1 %v7748_v5  ;;  %6368 = vmatprep.mubr.msk.f32.mxu1 %vm6828_vm0, %v6827_v1 }
0x3b35   :  { %6364 = vmatprep.subr.mxu1 %v6827_v1 }
0x3b36   :  { %6365 = vmatpush3.msra.mxu1 %v7751_v13 }
0x3b37   :  { %6366 = vmatprep.subr.mxu1 %v6827_v1 }
0x3b38   :  { %6367 = vmatpush3.msra.mxu1 %v7757_v60 }
0x3b39   :  { %6369 = vmatmul.mubr.msk.f32.vlgmr.msra.gmra.mxu1 %vm3365_vm11, %v4378_v23  ;;  %6376 = vmatprep.subr.mxu1 %v6827_v1  ;;  %v7987_v23 = vld [vmem:[#allocation2 + $0x8] sm:$0xff] }
0x3b3a   :  { %6377 = vmatpush3.msra.mxu1 %v7604_v8  ;;  %6382 = vmatprep.mubr.msk.f32.mxu1 %vm6828_vm0, %v6827_v1 }
0x3b3b   :  { %6378 = vmatprep.subr.mxu1 %v6827_v1 }
0x3b3c   :  { %6379 = vmatpush3.msra.mxu1 %v7594_v53 }
0x3b3d   :  { %6380 = vmatprep.subr.mxu1 %v6827_v1 }
0x3b3e   :  { %6381 = vmatpush3.msra.mxu1 %v7587_v19 }
0x3b3f   :  { %6396 = vmatprep.subr.mxu1 %v6827_v1 }
0x3bf3   :  { %v4447_v56 = vpop.f32.mrf.mxu1 }
0x3bf4   :  { %6360 = vmatmul.mubr.msk.f32.vlgmr.msra.gmra.mxu0 %vm102_vm1, %v4447_v56  ;;  %v7991_v56 = vld [vmem:[#allocation2] sm:$0xff] }
0x3bf5   :  { %v6350_v10 = vpop.f32.mrf.mxu1  ;;  %6372 = vmatpush3.msk.msra.mxu0 %vm873_vm9, %v7665_v36  ;;  %6373 = vmatprep.mubr.msk.f32.mxu0 %vm6828_vm0, %v6827_v1 }
0x3bf6   :  { %6385 = vmatprep.subr.mxu0 %v6827_v1 }
0x3bf9   :  { %v4608_v54 = vpop.f32.mrf.mxu1 }
0x3bfa   :  { %4614 = vst.msk [vmem:[%s8138_s9 + $0x2] sm:$0x1] %vm3907_vm14, %v4608_v54  ;;  %v7932_v19 = vadd.f32 %v4608_v54, %v7862_v32 }
0x3bfb   :  { %v6370_v53 = vpop.f32.mrf.mxu1 }
0x3bfc   :  { %4966 = vst.msk [vmem:[%s8140_s11 + $0x3] sm:$0x1] %vm3907_vm14, %v7932_v19 }
0x3cb4   :  { %v4522_v6 = vpop.f32.mrf.mxu0 }
0x3cb5   :  { %v4523_v2 = vadd.f32 %v4522_v6, %v4451_v12  ;;  %v4802_v6 = vrot.slane %v7795_v0, 3 }
0x3cb6   :  { %v6361_v22 = vpop.f32.mrf.mxu0 }
0x3cb7   :  { %v4526_v4 = vsel %vm2425_vm6, %v4523_v2, -inf }
0x3cb8   :  { %4527 = vmax.xlane.f32.xlu0 %v4526_v4 }
0x3d41   :  { %v4528_v9 = vpop.xlane.xlu0 %4527 }
0x3d42   :  { %v4529_v24 = vsub.f32 %v4523_v2, %v4528_v9 }
0x3d44   :  { %v4530_v25 = vmul.f32 1.442695, %v4529_v24 }
0x3d46   :  { %6713 = vpow2.f32 %v4530_v25 }
0x3d53   :  { %v6714_v32 = vpop.eup %6713 }
0x3d54   :  { %v4532_v51 = vsel %vm2425_vm6, %v6714_v32, 0.0 }
0x3d55   :  { %4533 = vadd.xlane.f32.xlu1 %v4532_v51 }
0x3dde   :  { %v4534_v27 = vpop.xlane.xlu1 %4533 }
0x3ddf   :  { %6715 = vlog2.f32 %v4534_v27 }
0x3dec   :  { %v6716_v16 = vpop.eup %6715 }
0x3ded   :  { %v4536_v58 = vmul.f32 0.6931472, %v6716_v16 }
0x3def   :  { %v4537_v20 = vsub.f32 %v4529_v24, %v4536_v58 }
0x3df1   :  { %v4538_v15 = vmul.f32 %v4537_v20, %v7800_v7  ;;  %4612 = vst.msk [vmem:[%s8137_s8 + $0x2] sm:$0x1] %vm2425_vm6, %v4537_v20 }
0x3df3   :  { %v4539_v62 = vsel %vm2425_vm6, %v4538_v15, 0.0 }
0x3df4   :  { %4540 = vadd.xlane.f32.xlu1 %v4539_v62 }
0x3e7d   :  { %v4541_v21 = vpop.xlane.xlu1 %4540 }
0x3e7e   :  { %v4619_v30 = vadd.f32 %v4617_v44, %v4541_v21  ;;  %v4968_v44 = vrot.slane %v7673_v28, 4 }
0x3e80   :  { %v5788_v49 = vmul.f32 -1.442695, %v4619_v30 }
0x3e82   :  { %6717 = vpow2.f32 %v5788_v49 }
0x3e8f   :  { %v6718_v48 = vpop.eup %6717 }
0x3e90   :  { %v4623_v38 = vadd.f32 1.0, %v6718_v48 }
0x3e92   :  { %6719 = vrcp.f32 %v4623_v38 }
0x3e9f   :  { %v6720_v31 = vpop.eup %6719 }
0x3ea0   :  { %v4626_v46 = vsub.f32 1.0, %v6720_v31 }
0x3ea2   :  { %4629 = vperm.xlu1 %6488, %v4626_v46  }
0x3ea6   :  { %4637 = vperm.xlu1 %6488, %v6720_v31  }
0x3f1d   :  { %v4630_v29 = vpop.permute.xlu1 %4629 }
0x3f1e   :  { %v4634_v17 = vmul.f32 %v4632_v57, %v4630_v29  ;;  %v4983_v57 = vrot.slane %v7699_v63, 4 }
0x3f21   :  { %v4638_v43 = vpop.permute.xlu1 %4637 }
0x3f22   :  { %v4640_v3 = vmul.f32 %v4638_v43, %v7883_v59 }
0x3f24   :  { %v4641_v26 = vadd.f32 %v4640_v3, %v4634_v17 }
0x3f26   :  { %v4642_v33 = vsel %vm3576_vm12, %v4641_v26, 0.0 }
0x3f27   :  { %4643 = vadd.xlane.f32.xlu1 %v4642_v33 }
0x3fb0   :  { %v4644_v40 = vpop.xlane.xlu1 %4643 }
0x3fb1   :  { %6721 = vrcp.f32 %v4644_v40 }
0x3fb2   :  { %6723 = vrcp.f32 %v4647_v35  ;;  %v4998_v35 = vrot.slane %v7717_v39, 4 }
0x3fbe   :  { %v6722_v18 = vpop.eup %6721 }
0x3fbf   :  { %v7953_v41 = vmul.f32 %v6722_v18, %v4641_v26  ;;  %v6724_v61 = vpop.eup %6723 }
0x3fc1   :  { %4964 = vst.msk [vmem:[%s8139_s10 + $0x3] sm:$0x1] %vm3576_vm12, %v7953_v41  ;;  %v4650_v59 = vmul.f32 %v6724_v61, %v7953_v41 }
0x3fc3   :  { %6374 = vmatmul.mubr.msk.f32.vlgmr.msra.gmra.mxu0 %vm3584_vm13, %v4650_v59 }
0x3fc4   :  { %6386 = vmatpush3.msra.mxu0 %v7731_v34  ;;  %6393 = vmatprep.mubr.msk.f32.mxu0 %vm6828_vm0, %v6827_v1 }
0x3fc5   :  { %6387 = vmatprep.subr.mxu0 %v6827_v1 }
0x3fc6   :  { %6388 = vmatpush3.msra.mxu0 %v7735_v11 }
0x3fc7   :  { %6389 = vmatprep.subr.mxu0 %v6827_v1 }
0x3fc8   :  { %6390 = vmatpush3.msra.mxu0 %v7739_v47 }
0x3fc9   :  { %6391 = vmatprep.subr.mxu0 %v6827_v1 }
0x3fca   :  { %6392 = vmatpush3.msra.mxu0 %v7743_v45 }
0x3fcb   :  { %6405 = vmatprep.subr.mxu0 %v6827_v1 }
0x4083   :  { %v4720_v14 = vpop.f32.mrf.mxu0 }
0x4084   :  { %v4725_v42 = vrot.slane %v4720_v14, 5 }
0x4085   :  { %v6375_v52 = vpop.f32.mrf.mxu0 }
0x4086   :  { %v4727_v50 = vmul.f32 %v7676_v37, %v4725_v42 }
0x4088   :  { %v4729_v55 = vrot.slane %v4727_v50, 3 }
0x408a   :  { %6383 = vmatmul.mubr.msk.f32.vlgmr.msra.gmra.mxu1 %vm3365_vm11, %v4729_v55 }
0x408b   :  { %6397 = vmatpush3.msra.mxu1 %v7748_v5  ;;  %6402 = vmatprep.mubr.msk.f32.mxu1 %vm6828_vm0, %v6827_v1 }
0x408c   :  { %6398 = vmatprep.subr.mxu1 %v6827_v1 }
0x408d   :  { %6399 = vmatpush3.msra.mxu1 %v7751_v13 }
0x408e   :  { %6400 = vmatprep.subr.mxu1 %v6827_v1 }
0x408f   :  { %6401 = vmatpush3.msra.mxu1 %v7757_v60 }
0x4090   :  { %6403 = vmatmul.mubr.msk.f32.vlgmr.msra.gmra.mxu1 %vm3365_vm11, %v4729_v55  ;;  %6410 = vmatprep.subr.mxu1 %v6827_v1 }
0x4091   :  { %6411 = vmatpush3.msra.mxu1 %v7604_v8  ;;  %6416 = vmatprep.mubr.msk.f32.mxu1 %vm6828_vm0, %v6827_v1 }
0x4092   :  { %6412 = vmatprep.subr.mxu1 %v6827_v1 }
0x4093   :  { %6413 = vmatpush3.msra.mxu1 %v7987_v23 }
0x4094   :  { %6414 = vmatprep.subr.mxu1 %v6827_v1 }
0x4095   :  { %6415 = vmatpush3.msra.mxu1 %v7991_v56 }
0x4096   :  { %6430 = vmatprep.subr.mxu1 %v6827_v1 }
0x414a   :  { %v4798_v10 = vpop.f32.mrf.mxu1 }
0x414b   :  { %6394 = vmatmul.mubr.msk.f32.vlgmr.msra.gmra.mxu0 %vm102_vm1, %v4798_v10  ;;  %v6756_v10 = vld [vmem:[#allocation2 + $0x10] sm:$0xff] }
0x414c   :  { %v6384_v8 = vpop.f32.mrf.mxu1  ;;  %6406 = vmatpush3.msk.msra.mxu0 %vm873_vm9, %v7665_v36  ;;  %6407 = vmatprep.mubr.msk.f32.mxu0 %vm6828_vm0, %v6827_v1 }
0x414d   :  { %6419 = vmatprep.subr.mxu0 %v6827_v1 }
0x4150   :  { %v4959_v54 = vpop.f32.mrf.mxu1 }
0x4151   :  { %4965 = vst.msk [vmem:[%s8138_s9 + $0x3] sm:$0x1] %vm3907_vm14, %v4959_v54  ;;  %v8006_v53 = vadd.f32 %v4959_v54, %v7932_v19 }
0x4152   :  { %v6404_v12 = vpop.f32.mrf.mxu1 }
0x4153   :  { %5317 = vst.msk [vmem:[%s8140_s11 + $0x4] sm:$0x1] %vm3907_vm14, %v8006_v53 }
0x420b   :  { %v4873_v2 = vpop.f32.mrf.mxu0 }
0x420c   :  { %v4874_v22 = vadd.f32 %v4873_v2, %v4802_v6 }
0x420d   :  { %v6395_v4 = vpop.f32.mrf.mxu0 }
0x420e   :  { %v4877_v9 = vsel %vm2425_vm6, %v4874_v22, -inf }
0x420f   :  { %4878 = vmax.xlane.f32.xlu0 %v4877_v9 }
0x4298   :  { %v4879_v24 = vpop.xlane.xlu0 %4878 }
0x4299   :  { %v4880_v25 = vsub.f32 %v4874_v22, %v4879_v24 }
0x429b   :  { %v4881_v32 = vmul.f32 1.442695, %v4880_v25 }
0x429d   :  { %6725 = vpow2.f32 %v4881_v32 }
0x42aa   :  { %v6726_v19 = vpop.eup %6725 }
0x42ab   :  { %v4883_v51 = vsel %vm2425_vm6, %v6726_v19, 0.0 }
0x42ac   :  { %4884 = vadd.xlane.f32.xlu0 %v4883_v51 }
0x4335   :  { %v4885_v27 = vpop.xlane.xlu0 %4884 }
0x4336   :  { %6727 = vlog2.f32 %v4885_v27 }
0x4343   :  { %v6728_v16 = vpop.eup %6727 }
0x4344   :  { %v4887_v58 = vmul.f32 0.6931472, %v6728_v16 }
0x4346   :  { %v4888_v20 = vsub.f32 %v4880_v25, %v4887_v58 }
0x4348   :  { %v4889_v15 = vmul.f32 %v4888_v20, %v7800_v7  ;;  %4963 = vst.msk [vmem:[%s8137_s8 + $0x3] sm:$0x1] %vm2425_vm6, %v4888_v20 }
0x434a   :  { %v4890_v62 = vsel %vm2425_vm6, %v4889_v15, 0.0  ;;  %v5319_v15 = vrot.slane %v7673_v28, 5 }
0x434b   :  { %4891 = vadd.xlane.f32.xlu0 %v4890_v62 }
0x43d4   :  { %v4892_v21 = vpop.xlane.xlu0 %4891 }
0x43d5   :  { %v4970_v30 = vadd.f32 %v4968_v44, %v4892_v21 }
0x43d7   :  { %v5794_v49 = vmul.f32 -1.442695, %v4970_v30 }
0x43d9   :  { %6729 = vpow2.f32 %v5794_v49 }
0x43e6   :  { %v6730_v48 = vpop.eup %6729 }
0x43e7   :  { %v4974_v38 = vadd.f32 1.0, %v6730_v48 }
0x43e9   :  { %6731 = vrcp.f32 %v4974_v38 }
0x43f6   :  { %v6732_v31 = vpop.eup %6731 }
0x43f7   :  { %v4977_v46 = vsub.f32 1.0, %v6732_v31 }
0x43f9   :  { %4980 = vperm.xlu0 %6487, %v4977_v46  }
0x43fd   :  { %4988 = vperm.xlu0 %6487, %v6732_v31   ;;  %v5334_v31 = vrot.slane %v7699_v63, 5 }
0x4474   :  { %v4981_v29 = vpop.permute.xlu0 %4980 }
0x4475   :  { %v4985_v17 = vmul.f32 %v4983_v57, %v4981_v29 }
0x4478   :  { %v4989_v43 = vpop.permute.xlu0 %4988 }
0x4479   :  { %v4991_v3 = vmul.f32 %v4989_v43, %v7953_v41 }
0x447b   :  { %v4992_v26 = vadd.f32 %v4991_v3, %v4985_v17  ;;  %v5349_v17 = vrot.slane %v7717_v39, 5 }
0x447d   :  { %v4993_v33 = vsel %vm3576_vm12, %v4992_v26, 0.0 }
0x447e   :  { %4994 = vadd.xlane.f32.xlu1 %v4993_v33 }
0x4507   :  { %v4995_v40 = vpop.xlane.xlu1 %4994 }
0x4508   :  { %6733 = vrcp.f32 %v4995_v40 }
0x4509   :  { %6735 = vrcp.f32 %v4998_v35 }
0x4515   :  { %v6734_v18 = vpop.eup %6733 }
0x4516   :  { %v8027_v61 = vmul.f32 %v6734_v18, %v4992_v26  ;;  %v6736_v59 = vpop.eup %6735 }
0x4518   :  { %5315 = vst.msk [vmem:[%s8139_s10 + $0x4] sm:$0x1] %vm3576_vm12, %v8027_v61  ;;  %v5001_v41 = vmul.f32 %v6736_v59, %v8027_v61 }
0x451a   :  { %6408 = vmatmul.mubr.msk.f32.vlgmr.msra.gmra.mxu0 %vm3584_vm13, %v5001_v41 }
0x451b   :  { %6420 = vmatpush3.msra.mxu0 %v7731_v34  ;;  %6427 = vmatprep.mubr.msk.f32.mxu0 %vm6828_vm0, %v6827_v1 }
0x451c   :  { %6421 = vmatprep.subr.mxu0 %v6827_v1 }
0x451d   :  { %6422 = vmatpush3.msra.mxu0 %v7735_v11 }
0x451e   :  { %6423 = vmatprep.subr.mxu0 %v6827_v1 }
0x451f   :  { %6424 = vmatpush3.msra.mxu0 %v7739_v47 }
0x4520   :  { %6425 = vmatprep.subr.mxu0 %v6827_v1 }
0x4521   :  { %6426 = vmatpush3.msra.mxu0 %v7743_v45 }
0x4522   :  { %6439 = vmatprep.subr.mxu0 %v6827_v1 }
0x45da   :  { %v5071_v14 = vpop.f32.mrf.mxu0 }
0x45db   :  { %v5076_v42 = vrot.slane %v5071_v14, 4 }
0x45dc   :  { %v6409_v52 = vpop.f32.mrf.mxu0 }
0x45dd   :  { %v5078_v50 = vmul.f32 %v7676_v37, %v5076_v42 }
0x45df   :  { %v5080_v55 = vrot.slane %v5078_v50, 4 }
0x45e1   :  { %6417 = vmatmul.mubr.msk.f32.vlgmr.msra.gmra.mxu1 %vm3365_vm11, %v5080_v55 }
0x45e2   :  { %6431 = vmatpush3.msra.mxu1 %v7748_v5  ;;  %6436 = vmatprep.mubr.msk.f32.mxu1 %vm6828_vm0, %v6827_v1 }
0x45e3   :  { %6432 = vmatprep.subr.mxu1 %v6827_v1 }
0x45e4   :  { %6433 = vmatpush3.msra.mxu1 %v7751_v13 }
0x45e5   :  { %6434 = vmatprep.subr.mxu1 %v6827_v1 }
0x45e6   :  { %6435 = vmatpush3.msra.mxu1 %v7757_v60 }
0x45e7   :  { %6437 = vmatmul.mubr.msk.f32.vlgmr.msra.gmra.mxu1 %vm3365_vm11, %v5080_v55  ;;  %6444 = vmatprep.subr.mxu1 %v6827_v1 }
0x45e8   :  { %6445 = vmatpush3.msra.mxu1 %v6756_v10  ;;  %6450 = vmatprep.mubr.msk.f32.mxu1 %vm6828_vm0, %v6827_v1 }
0x45e9   :  { %6446 = vmatprep.subr.mxu1 %v6827_v1 }
0x45ea   :  { %6447 = vmatpush3.msra.mxu1 %v7987_v23 }
0x45eb   :  { %6448 = vmatprep.subr.mxu1 %v6827_v1 }
0x45ec   :  { %6449 = vmatpush3.msra.mxu1 %v7991_v56 }
0x45ed   :  { %6464 = vmatprep.subr.mxu1 %v6827_v1 }
0x46a1   :  { %v5149_v8 = vpop.f32.mrf.mxu1 }
0x46a2   :  { %6428 = vmatmul.mubr.msk.f32.vlgmr.msra.gmra.mxu0 %vm102_vm1, %v5149_v8 }
0x46a3   :  { %v6418_v54 = vpop.f32.mrf.mxu1  ;;  %6440 = vmatpush3.msk.msra.mxu0 %vm873_vm9, %v7665_v36  ;;  %6441 = vmatprep.mubr.msk.f32.mxu0 %vm6828_vm0, %v6827_v1  ;;  %v5153_v36 = vrot.slane %v7795_v0, 4 }
0x46a4   :  { %6453 = vmatprep.subr.mxu0 %v6827_v1 }
0x46a7   :  { %v5310_v12 = vpop.f32.mrf.mxu1 }
0x46a8   :  { %5316 = vst.msk [vmem:[%s8138_s9 + $0x4] sm:$0x1] %vm3907_vm14, %v5310_v12  ;;  %v5318_v23 = vadd.f32 %v5310_v12, %v8006_v53 }
0x46a9   :  { %v6438_v56 = vpop.f32.mrf.mxu1 }
0x46aa   :  { %5664 = vst.msk [vmem:[%s8140_s11 + $0x5] sm:$0x1] %vm3907_vm14, %v5318_v23 }
0x4762   :  { %v5224_v6 = vpop.f32.mrf.mxu0 }
0x4763   :  { %v5225_v2 = vadd.f32 %v5224_v6, %v5153_v36 }
0x4764   :  { %v6429_v22 = vpop.f32.mrf.mxu0 }
0x4765   :  { %v5228_v4 = vsel %vm2425_vm6, %v5225_v2, -inf }
0x4766   :  { %5229 = vmax.xlane.f32.xlu0 %v5228_v4 }
0x47ef   :  { %v5230_v9 = vpop.xlane.xlu0 %5229 }
0x47f0   :  { %v5231_v24 = vsub.f32 %v5225_v2, %v5230_v9 }
0x47f2   :  { %v5232_v25 = vmul.f32 1.442695, %v5231_v24 }
0x47f4   :  { %6737 = vpow2.f32 %v5232_v25 }
0x4801   :  { %v6738_v32 = vpop.eup %6737 }
0x4802   :  { %v5234_v53 = vsel %vm2425_vm6, %v6738_v32, 0.0 }
0x4803   :  { %5235 = vadd.xlane.f32.xlu1 %v5234_v53 }
0x488c   :  { %v5236_v19 = vpop.xlane.xlu1 %5235 }
0x488d   :  { %6739 = vlog2.f32 %v5236_v19 }
0x489a   :  { %v6740_v51 = vpop.eup %6739 }
0x489b   :  { %v5238_v27 = vmul.f32 0.6931472, %v6740_v51 }
0x489d   :  { %v5239_v16 = vsub.f32 %v5231_v24, %v5238_v27 }
0x489f   :  { %v5240_v58 = vmul.f32 %v5239_v16, %v7800_v7  ;;  %5314 = vst.msk [vmem:[%s8137_s8 + $0x4] sm:$0x1] %vm2425_vm6, %v5239_v16 }
0x48a1   :  { %v5241_v20 = vsel %vm2425_vm6, %v5240_v58, 0.0 }
0x48a2   :  { %5242 = vadd.xlane.f32.xlu1 %v5241_v20 }
0x492b   :  { %v5243_v62 = vpop.xlane.xlu1 %5242 }
0x492c   :  { %v5321_v44 = vadd.f32 %v5319_v15, %v5243_v62 }
0x492e   :  { %v5800_v21 = vmul.f32 -1.442695, %v5321_v44 }
0x4930   :  { %6741 = vpow2.f32 %v5800_v21 }
0x493d   :  { %v6742_v30 = vpop.eup %6741 }
0x493e   :  { %v5325_v49 = vadd.f32 1.0, %v6742_v30 }
0x4940   :  { %6743 = vrcp.f32 %v5325_v49 }
0x494d   :  { %v6744_v48 = vpop.eup %6743 }
0x494e   :  { %v5328_v38 = vsub.f32 1.0, %v6744_v48 }
0x4950   :  { %5331 = vperm.xlu1 %6488, %v5328_v38  }
0x4954   :  { %5339 = vperm.xlu1 %6488, %v6744_v48  }
0x49cb   :  { %v5332_v7 = vpop.permute.xlu1 %5331 }
0x49cc   :  { %v5336_v29 = vmul.f32 %v5334_v31, %v5332_v7 }
0x49cf   :  { %v5340_v46 = vpop.permute.xlu1 %5339 }
0x49d0   :  { %v5342_v57 = vmul.f32 %v5340_v46, %v8027_v61 }
0x49d2   :  { %v5343_v43 = vadd.f32 %v5342_v57, %v5336_v29 }
0x49d4   :  { %v5344_v28 = vsel %vm3576_vm12, %v5343_v43, 0.0 }
0x49d5   :  { %5345 = vadd.xlane.f32.xlu1 %v5344_v28 }
0x4a5e   :  { %v5346_v3 = vpop.xlane.xlu1 %5345 }
0x4a5f   :  { %6745 = vrcp.f32 %v5346_v3 }
0x4a60   :  { %6747 = vrcp.f32 %v5349_v17 }
0x4a6c   :  { %v6746_v26 = vpop.eup %6745 }
0x4a6d   :  { %v5348_v33 = vmul.f32 %v6746_v26, %v5343_v43  ;;  %v6748_v35 = vpop.eup %6747 }
0x4a6f   :  { %5662 = vst.msk [vmem:[%s8139_s10 + $0x5] sm:$0x1] %vm3576_vm12, %v5348_v33  ;;  %v5352_v63 = vmul.f32 %v6748_v35, %v5348_v33 }
0x4a71   :  { %6442 = vmatmul.mubr.msk.f32.vlgmr.msra.gmra.mxu0 %vm3584_vm13, %v5352_v63 }
0x4a72   :  { %6454 = vmatpush3.msra.mxu0 %v7731_v34  ;;  %6461 = vmatprep.mubr.msk.f32.mxu0 %vm6828_vm0, %v6827_v1 }
0x4a73   :  { %6455 = vmatprep.subr.mxu0 %v6827_v1 }
0x4a74   :  { %6456 = vmatpush3.msra.mxu0 %v7735_v11 }
0x4a75   :  { %6457 = vmatprep.subr.mxu0 %v6827_v1 }
0x4a76   :  { %6458 = vmatpush3.msra.mxu0 %v7739_v47 }
0x4a77   :  { %6459 = vmatprep.subr.mxu0 %v6827_v1 }
0x4a78   :  { %6460 = vmatpush3.msra.mxu0 %v7743_v45 }
0x4b31   :  { %v5422_v39 = vpop.f32.mrf.mxu0 }
0x4b32   :  { %v5427_v40 = vrot.slane %v5422_v39, 3 }
0x4b33   :  { %v6443_v18 = vpop.f32.mrf.mxu0 }
0x4b34   :  { %v5429_v34 = vmul.f32 %v7676_v37, %v5427_v40 }
0x4b36   :  { %v5431_v61 = vrot.slane %v5429_v34, 5 }
0x4b38   :  { %6451 = vmatmul.mubr.msk.f32.vlgmr.msra.gmra.mxu1 %vm3365_vm11, %v5431_v61 }
0x4b39   :  { %6465 = vmatpush3.msra.mxu1 %v7748_v5  ;;  %6470 = vmatprep.mubr.msk.f32.mxu1 %vm6828_vm0, %v6827_v1  ;;  %v5504_v5 = vrot.slane %v7795_v0, 5 }
0x4b3a   :  { %6466 = vmatprep.subr.mxu1 %v6827_v1 }
0x4b3b   :  { %6467 = vmatpush3.msra.mxu1 %v7751_v13 }
0x4b3c   :  { %6468 = vmatprep.subr.mxu1 %v6827_v1 }
0x4b3d   :  { %6469 = vmatpush3.msra.mxu1 %v7757_v60 }
0x4b3e   :  { %6471 = vmatmul.mubr.msk.f32.vlgmr.msra.gmra.mxu1 %vm3365_vm11, %v5431_v61 }
0x4bf8   :  { %v5500_v11 = vpop.f32.mrf.mxu1 }
0x4bf9   :  { %6462 = vmatmul.mubr.msk.f32.vlgmr.msra.gmra.mxu0 %vm102_vm1, %v5500_v11 }
0x4bfa   :  { %v6452_v37 = vpop.f32.mrf.mxu1 }
0x4bfe   :  { %v5657_v47 = vpop.f32.mrf.mxu1 }
0x4bff   :  { %5663 = vst.msk [vmem:[%s8138_s9 + $0x5] sm:$0x1] %vm3907_vm14, %v5657_v47 }
0x4c00   :  { %v6472_v45 = vpop.f32.mrf.mxu1 }
0x4cb9   :  { %v5575_v13 = vpop.f32.mrf.mxu0 }
0x4cba   :  { %v5576_v59 = vadd.f32 %v5575_v13, %v5504_v5 }
0x4cbb   :  { %v6463_v1 = vpop.f32.mrf.mxu0 }
0x4cbc   :  { %v5579_v60 = vsel %vm2425_vm6, %v5576_v59, -inf }
0x4cbd   :  { %5580 = vmax.xlane.f32.xlu0 %v5579_v60 }
0x4d46   :  { %v5581_v41 = vpop.xlane.xlu0 %5580 }
0x4d47   :  { %v5582_v14 = vsub.f32 %v5576_v59, %v5581_v41 }
0x4d49   :  { %v5583_v42 = vmul.f32 1.442695, %v5582_v14 }
0x4d4b   :  { %6749 = vpow2.f32 %v5583_v42 }
0x4d58   :  { %v6750_v52 = vpop.eup %6749 }
0x4d59   :  { %v5585_v50 = vsel %vm2425_vm6, %v6750_v52, 0.0 }
0x4d5a   :  { %5586 = vadd.xlane.f32.xlu0 %v5585_v50 }
0x4de3   :  { %v5587_v55 = vpop.xlane.xlu0 %5586 }
0x4de4   :  { %6751 = vlog2.f32 %v5587_v55 }
0x4df1   :  { %v6752_v10 = vpop.eup %6751 }
0x4df2   :  { %v5589_v8 = vmul.f32 0.6931472, %v6752_v10 }
0x4df4   :  { %v5590_v54 = vsub.f32 %v5582_v14, %v5589_v8 }
0x4df6   :  { %5661 = vst.msk [vmem:[%s8137_s8 + $0x5] sm:$0x1] %vm2425_vm6, %v5590_v54 }
0x4df7   :  { %5685 = vsyncpa [#allocation5], 1 }
0x4df8   :  { %5686 = vsyncpa [#allocation7], 1 }

</bundles_post_ra>
